<compile_context>
chip_gen: v7x
topology: tpu7x:2x2x1
jax: 0.10.0
libtpu: 0.0.40
codegen_flags: <defaults>
</compile_context>

<pallas_src>
import functools

import numpy as np
import jax
import jax.numpy as jnp
from jax import lax
from jax.experimental import pallas as pl
from jax.experimental.pallas import tpu as pltpu

_LANE = 128


def _round_up(a: int, b: int) -> int:
    return (a + b - 1) // b * b


def _pos_enc_kernel(mean_ref, out_ref, *, w_vals, in_dims):
    """One grid step == (Bt batch elements) x (one lane-tile of H*W).

    mean_ref : (Bt, X, HWt)        input means (lane axis = flattened H*W tile)
    out_ref  : (Bt, 2*X, Y, HWt)   out[:, x]   = sin(w[y] * mean[:, x])
                                   out[:, X+x] = cos(w[y] * mean[:, x])
    """
    X = in_dims
    Y = len(w_vals)

    # Frequency weights as compile-time constants (no DMA'd weight input).
    # Built from scalar literals via iota + select so the values are bit-identical
    # to the host-side f32 parameter.
    y_idx = lax.broadcasted_iota(jnp.int32, (1, Y, 1), 1)
    w = jnp.zeros((1, Y, 1), jnp.float32)
    for y, wv in enumerate(w_vals):
        w = jnp.where(y_idx == y, jnp.float32(wv), w)           # (1, Y, 1) f32

    # Static unroll over the X input channels (an untiled leading dim of the block).
    # Each iteration is one dense (Bt, Y, HWt) broadcast-multiply + sin/cos in f32
    # and two stores that line up exactly with the output block's (Y, HWt) tiles.
    for x in range(X):
        m_x = mean_ref[:, x:x + 1, :].astype(jnp.float32)       # (Bt, 1, HWt)
        wm = m_x * w                                            # (Bt, Y, HWt) f32
        out_ref[:, x, :, :] = jnp.sin(wm).astype(out_ref.dtype)       # sin, channel x
        out_ref[:, X + x, :, :] = jnp.cos(wm).astype(out_ref.dtype)   # cos, channel x


class ScaleAgnosticPositionalEncoderPallas:
    """JAX/Pallas port of ScaleAgnostictPositionalEncoder (MipNeRF-style pos. enc.)."""

    def __init__(self, in_dims: int, num_freqs: int = 10, max_freq: float = 4.0,
                 out_dtype=None):
        frequencies = jnp.linspace(0.0, max_freq, num_freqs)
        # deterministic, non-trainable parameter (matches nn.Parameter(2.0 ** freqs))
        self.mean_weights = (2.0 ** frequencies).astype(jnp.float32)     # (num_freqs,)
        self.in_dims = in_dims
        self.num_freqs = num_freqs
        self.output_dim = 2 * in_dims * num_freqs
        # Optional lower-precision output (e.g. jnp.bfloat16) to halve writeback bytes;
        # compute stays f32 either way.  Default: match the input dtype.
        self.out_dtype = out_dtype
        # Exact f32 weight values baked into the kernel as compile-time constants.
        self._w_vals = tuple(float(v) for v in np.asarray(self.mean_weights, np.float32))

    def __call__(self, mean, scale=None):
        # `scale` is accepted for API parity; the reference forward never reads it.
        B, X, H, W = mean.shape
        assert X == self.in_dims
        Y = self.num_freqs
        HW = H * W
        out_dtype = jnp.dtype(self.out_dtype) if self.out_dtype is not None else mean.dtype
        in_isz = jnp.dtype(mean.dtype).itemsize
        out_isz = jnp.dtype(out_dtype).itemsize

        # ---- lane (H*W) tiling: multiples of 128, target ~2048 lanes per tile ----
        lane_tile = min(2048, _round_up(HW, _LANE))
        HWp = _round_up(HW, lane_tile)

        mean_flat = mean.reshape(B, X, HW)
        if HWp != HW:
            mean_flat = jnp.pad(mean_flat, ((0, 0), (0, 0), (0, HWp - HW)))

        # ---- pack small batches per grid step, keeping tiles well under VMEM ----
        y_pad = _round_up(Y, 8)                       # VMEM sublane padding of Y
        per_b_bytes = 2 * X * y_pad * lane_tile * out_isz + X * lane_tile * in_isz
        budget = 2 * 1024 * 1024                      # per-buffer budget (x2 for dbl-buffer)
        bt = 1
        for d in range(B, 0, -1):
            if B % d == 0 and d * per_b_bytes <= budget:
                bt = d
                break

        grid = (B // bt, HWp // lane_tile)
        kernel = functools.partial(_pos_enc_kernel, w_vals=self._w_vals, in_dims=X)

        cost = pl.CostEstimate(
            flops=B * X * Y * HW,
            transcendentals=2 * B * X * Y * HW,
            bytes_accessed=B * X * HW * in_isz + B * 2 * X * Y * HW * out_isz,
        )

        out4 = pl.pallas_call(
            kernel,
            out_shape=jax.ShapeDtypeStruct((B, 2 * X, Y, HWp), out_dtype),
            grid_spec=pltpu.PrefetchScalarGridSpec(
                num_scalar_prefetch=0,
                grid=grid,
                in_specs=[
                    pl.BlockSpec((bt, X, lane_tile), lambda b, t: (b, 0, t)),
                ],
                out_specs=pl.BlockSpec((bt, 2 * X, Y, lane_tile),
                                       lambda b, t: (b, 0, 0, t)),
            ),
            compiler_params=pltpu.CompilerParams(
                dimension_semantics=("parallel", "parallel"),
                vmem_limit_bytes=32 * 1024 * 1024,   # tiles sized << this on v5e/v6e/v7x
            ),
            cost_estimate=cost,
        )(mean_flat)

        # (B, 2X, Y, HWp) -> (B, 2*X*Y, HWp) is a free row-major merge and reproduces
        # the reference channel order: [sin (x,y)-major ; cos (x,y)-major].
        out = out4.reshape(B, 2 * X * Y, HWp)
        if HWp != HW:
            out = out[:, :, :HW]
        return out.reshape(B, 2 * X * Y, H, W)


def _reference_forward(weights, mean):
    """Pure-JAX reference mirroring the PyTorch forward exactly."""
    B, X, H, W = mean.shape
    Y = weights.shape[0]
    wm = jnp.einsum('y,bxhw->bxyhw', weights, mean).reshape(B, X * Y, H, W)
    return jnp.concatenate([jnp.sin(wm), jnp.cos(wm)], axis=1)


if __name__ == "__main__":
    B, in_dims, H, W = 2, 4, 16, 16
    num_freqs = 10
    max_freq = 4.0

    key = jax.random.PRNGKey(0)
    k_mean, k_scale = jax.random.split(key)
    mean = jax.random.normal(k_mean, (B, in_dims, H, W), dtype=jnp.float32)
    scale = jax.random.normal(k_scale, (B, in_dims, H, W), dtype=jnp.float32)  # unused by forward

    enc = ScaleAgnosticPositionalEncoderPallas(in_dims, num_freqs=num_freqs, max_freq=max_freq)

    out = enc(mean, scale)
    out = jax.block_until_ready(out)

    assert out.shape == (B, enc.output_dim, H, W), out.shape
    ref = _reference_forward(enc.mean_weights, mean)
    assert jnp.allclose(out, ref, atol=1e-5, rtol=1e-5), float(jnp.max(jnp.abs(out - ref)))

    print("KERNEL_OK")
</pallas_src>

<mosaic_0001>
module attributes {stable_mosaic.version = 11 : i64} {
  func.func @_pos_enc_kernel(%arg0: i32, %arg1: i32, %arg2: memref<2x4x256xf32, #tpu.memory_space<vmem>>, %arg3: memref<2x8x10x256xf32, #tpu.memory_space<vmem>>) attributes {dimension_semantics = [#tpu.dimension_semantics<parallel>, #tpu.dimension_semantics<parallel>], iteration_bounds = array<i64: 1, 1>, scalar_prefetch = 0 : i64, scratch_operands = 0 : i64, tpu.core_type = #tpu.core_type<tc>, window_params = [{transform_indices = @transform_0, window_bounds = array<i64: 2, 4, 256>}, {transform_indices = @transform_1, window_bounds = array<i64: 2, 8, 10, 256>}]} {
    %0 = tpu.iota {dimensions = array<i32: 1>} : vector<1x10x1xi32>
    %cst = arith.constant 0.000000e+00 : f32
    %1 = vector.broadcast %cst : f32 to vector<1x10x1xf32>
    %c0_i32 = arith.constant 0 : i32
    %2 = vector.broadcast %c0_i32 : i32 to vector<1x10x1xi32>
    %3 = arith.cmpi eq, %0, %2 : vector<1x10x1xi32>
    %cst_0 = arith.constant 1.000000e+00 : f32
    %4 = vector.broadcast %cst_0 : f32 to vector<1x10x1xf32>
    %5 = arith.select %3, %4, %1 : vector<1x10x1xi1>, vector<1x10x1xf32>
    %c1_i32 = arith.constant 1 : i32
    %6 = vector.broadcast %c1_i32 : i32 to vector<1x10x1xi32>
    %7 = arith.cmpi eq, %0, %6 : vector<1x10x1xi32>
    %cst_1 = arith.constant 1.360790e+00 : f32
    %8 = vector.broadcast %cst_1 : f32 to vector<1x10x1xf32>
    %9 = arith.select %7, %8, %5 : vector<1x10x1xi1>, vector<1x10x1xf32>
    %c2_i32 = arith.constant 2 : i32
    %10 = vector.broadcast %c2_i32 : i32 to vector<1x10x1xi32>
    %11 = arith.cmpi eq, %0, %10 : vector<1x10x1xi32>
    %cst_2 = arith.constant 1.85174942 : f32
    %12 = vector.broadcast %cst_2 : f32 to vector<1x10x1xf32>
    %13 = arith.select %11, %12, %9 : vector<1x10x1xi1>, vector<1x10x1xf32>
    %c3_i32 = arith.constant 3 : i32
    %14 = vector.broadcast %c3_i32 : i32 to vector<1x10x1xi32>
    %15 = arith.cmpi eq, %0, %14 : vector<1x10x1xi32>
    %cst_3 = arith.constant 2.51984215 : f32
    %16 = vector.broadcast %cst_3 : f32 to vector<1x10x1xf32>
    %17 = arith.select %15, %16, %13 : vector<1x10x1xi1>, vector<1x10x1xf32>
    %c4_i32 = arith.constant 4 : i32
    %18 = vector.broadcast %c4_i32 : i32 to vector<1x10x1xi32>
    %19 = arith.cmpi eq, %0, %18 : vector<1x10x1xi32>
    %cst_4 = arith.constant 3.42897606 : f32
    %20 = vector.broadcast %cst_4 : f32 to vector<1x10x1xf32>
    %21 = arith.select %19, %20, %17 : vector<1x10x1xi1>, vector<1x10x1xf32>
    %c5_i32 = arith.constant 5 : i32
    %22 = vector.broadcast %c5_i32 : i32 to vector<1x10x1xi32>
    %23 = arith.cmpi eq, %0, %22 : vector<1x10x1xi32>
    %cst_5 = arith.constant 4.66611671 : f32
    %24 = vector.broadcast %cst_5 : f32 to vector<1x10x1xf32>
    %25 = arith.select %23, %24, %21 : vector<1x10x1xi1>, vector<1x10x1xf32>
    %c6_i32 = arith.constant 6 : i32
    %26 = vector.broadcast %c6_i32 : i32 to vector<1x10x1xi32>
    %27 = arith.cmpi eq, %0, %26 : vector<1x10x1xi32>
    %cst_6 = arith.constant 6.3496046 : f32
    %28 = vector.broadcast %cst_6 : f32 to vector<1x10x1xf32>
    %29 = arith.select %27, %28, %25 : vector<1x10x1xi1>, vector<1x10x1xf32>
    %c7_i32 = arith.constant 7 : i32
    %30 = vector.broadcast %c7_i32 : i32 to vector<1x10x1xi32>
    %31 = arith.cmpi eq, %0, %30 : vector<1x10x1xi32>
    %cst_7 = arith.constant 8.64047813 : f32
    %32 = vector.broadcast %cst_7 : f32 to vector<1x10x1xf32>
    %33 = arith.select %31, %32, %29 : vector<1x10x1xi1>, vector<1x10x1xf32>
    %c8_i32 = arith.constant 8 : i32
    %34 = vector.broadcast %c8_i32 : i32 to vector<1x10x1xi32>
    %35 = arith.cmpi eq, %0, %34 : vector<1x10x1xi32>
    %cst_8 = arith.constant 11.7578764 : f32
    %36 = vector.broadcast %cst_8 : f32 to vector<1x10x1xf32>
    %37 = arith.select %35, %36, %33 : vector<1x10x1xi1>, vector<1x10x1xf32>
    %c9_i32 = arith.constant 9 : i32
    %38 = vector.broadcast %c9_i32 : i32 to vector<1x10x1xi32>
    %39 = arith.cmpi eq, %0, %38 : vector<1x10x1xi32>
    %cst_9 = arith.constant 1.600000e+01 : f32
    %40 = vector.broadcast %cst_9 : f32 to vector<1x10x1xf32>
    %41 = arith.select %39, %40, %37 : vector<1x10x1xi1>, vector<1x10x1xf32>
    %c0 = arith.constant 0 : index
    %c0_10 = arith.constant 0 : index
    %c0_11 = arith.constant 0 : index
    %42 = vector.load %arg2[%c0, %c0_10, %c0_11] : memref<2x4x256xf32, #tpu.memory_space<vmem>>, vector<2x1x256xf32>
    %43 = vector.broadcast %42 : vector<2x1x256xf32> to vector<2x10x256xf32>
    %44 = vector.broadcast %41 : vector<1x10x1xf32> to vector<2x10x256xf32>
    %45 = arith.mulf %43, %44 : vector<2x10x256xf32>
    %46 = math.sin %45 : vector<2x10x256xf32>
    %c0_12 = arith.constant 0 : index
    %c0_13 = arith.constant 0 : index
    %c0_14 = arith.constant 0 : index
    %c0_15 = arith.constant 0 : index
    %47 = vector.load %arg3[%c0_12, %c0_13, %c0_14, %c0_15] : memref<2x8x10x256xf32, #tpu.memory_space<vmem>>, vector<2x1x10x256xf32>
    %48 = vector.shape_cast %47 : vector<2x1x10x256xf32> to vector<2x10x256xf32>
    %49 = vector.shape_cast %46 : vector<2x10x256xf32> to vector<2x1x10x256xf32>
    tpu.vector_store %arg3[%c0_12, %c0_13, %c0_14, %c0_15], %49 {strides = array<i32>} : memref<2x8x10x256xf32, #tpu.memory_space<vmem>>, vector<2x1x10x256xf32>,
    %50 = math.cos %45 : vector<2x10x256xf32>
    %c0_16 = arith.constant 0 : index
    %c4 = arith.constant 4 : index
    %c0_17 = arith.constant 0 : index
    %c0_18 = arith.constant 0 : index
    %51 = vector.load %arg3[%c0_16, %c4, %c0_17, %c0_18] : memref<2x8x10x256xf32, #tpu.memory_space<vmem>>, vector<2x1x10x256xf32>
    %52 = vector.shape_cast %51 : vector<2x1x10x256xf32> to vector<2x10x256xf32>
    %53 = vector.shape_cast %50 : vector<2x10x256xf32> to vector<2x1x10x256xf32>
    tpu.vector_store %arg3[%c0_16, %c4, %c0_17, %c0_18], %53 {strides = array<i32>} : memref<2x8x10x256xf32, #tpu.memory_space<vmem>>, vector<2x1x10x256xf32>,
    %c0_19 = arith.constant 0 : index
    %c1 = arith.constant 1 : index
    %c0_20 = arith.constant 0 : index
    %54 = vector.load %arg2[%c0_19, %c1, %c0_20] : memref<2x4x256xf32, #tpu.memory_space<vmem>>, vector<2x1x256xf32>
    %55 = vector.broadcast %54 : vector<2x1x256xf32> to vector<2x10x256xf32>
    %56 = vector.broadcast %41 : vector<1x10x1xf32> to vector<2x10x256xf32>
    %57 = arith.mulf %55, %56 : vector<2x10x256xf32>
    %58 = math.sin %57 : vector<2x10x256xf32>
    %c0_21 = arith.constant 0 : index
    %c1_22 = arith.constant 1 : index
    %c0_23 = arith.constant 0 : index
    %c0_24 = arith.constant 0 : index
    %59 = vector.load %arg3[%c0_21, %c1_22, %c0_23, %c0_24] : memref<2x8x10x256xf32, #tpu.memory_space<vmem>>, vector<2x1x10x256xf32>
    %60 = vector.shape_cast %59 : vector<2x1x10x256xf32> to vector<2x10x256xf32>
    %61 = vector.shape_cast %58 : vector<2x10x256xf32> to vector<2x1x10x256xf32>
    tpu.vector_store %arg3[%c0_21, %c1_22, %c0_23, %c0_24], %61 {strides = array<i32>} : memref<2x8x10x256xf32, #tpu.memory_space<vmem>>, vector<2x1x10x256xf32>,
    %62 = math.cos %57 : vector<2x10x256xf32>
    %c0_25 = arith.constant 0 : index
    %c5 = arith.constant 5 : index
    %c0_26 = arith.constant 0 : index
    %c0_27 = arith.constant 0 : index
    %63 = vector.load %arg3[%c0_25, %c5, %c0_26, %c0_27] : memref<2x8x10x256xf32, #tpu.memory_space<vmem>>, vector<2x1x10x256xf32>
    %64 = vector.shape_cast %63 : vector<2x1x10x256xf32> to vector<2x10x256xf32>
    %65 = vector.shape_cast %62 : vector<2x10x256xf32> to vector<2x1x10x256xf32>
    tpu.vector_store %arg3[%c0_25, %c5, %c0_26, %c0_27], %65 {strides = array<i32>} : memref<2x8x10x256xf32, #tpu.memory_space<vmem>>, vector<2x1x10x256xf32>,
    %c0_28 = arith.constant 0 : index
    %c2 = arith.constant 2 : index
    %c0_29 = arith.constant 0 : index
    %66 = vector.load %arg2[%c0_28, %c2, %c0_29] : memref<2x4x256xf32, #tpu.memory_space<vmem>>, vector<2x1x256xf32>
    %67 = vector.broadcast %66 : vector<2x1x256xf32> to vector<2x10x256xf32>
    %68 = vector.broadcast %41 : vector<1x10x1xf32> to vector<2x10x256xf32>
    %69 = arith.mulf %67, %68 : vector<2x10x256xf32>
    %70 = math.sin %69 : vector<2x10x256xf32>
    %c0_30 = arith.constant 0 : index
    %c2_31 = arith.constant 2 : index
    %c0_32 = arith.constant 0 : index
    %c0_33 = arith.constant 0 : index
    %71 = vector.load %arg3[%c0_30, %c2_31, %c0_32, %c0_33] : memref<2x8x10x256xf32, #tpu.memory_space<vmem>>, vector<2x1x10x256xf32>
    %72 = vector.shape_cast %71 : vector<2x1x10x256xf32> to vector<2x10x256xf32>
    %73 = vector.shape_cast %70 : vector<2x10x256xf32> to vector<2x1x10x256xf32>
    tpu.vector_store %arg3[%c0_30, %c2_31, %c0_32, %c0_33], %73 {strides = array<i32>} : memref<2x8x10x256xf32, #tpu.memory_space<vmem>>, vector<2x1x10x256xf32>,
    %74 = math.cos %69 : vector<2x10x256xf32>
    %c0_34 = arith.constant 0 : index
    %c6 = arith.constant 6 : index
    %c0_35 = arith.constant 0 : index
    %c0_36 = arith.constant 0 : index
    %75 = vector.load %arg3[%c0_34, %c6, %c0_35, %c0_36] : memref<2x8x10x256xf32, #tpu.memory_space<vmem>>, vector<2x1x10x256xf32>
    %76 = vector.shape_cast %75 : vector<2x1x10x256xf32> to vector<2x10x256xf32>
    %77 = vector.shape_cast %74 : vector<2x10x256xf32> to vector<2x1x10x256xf32>
    tpu.vector_store %arg3[%c0_34, %c6, %c0_35, %c0_36], %77 {strides = array<i32>} : memref<2x8x10x256xf32, #tpu.memory_space<vmem>>, vector<2x1x10x256xf32>,
    %c0_37 = arith.constant 0 : index
    %c3 = arith.constant 3 : index
    %c0_38 = arith.constant 0 : index
    %78 = vector.load %arg2[%c0_37, %c3, %c0_38] : memref<2x4x256xf32, #tpu.memory_space<vmem>>, vector<2x1x256xf32>
    %79 = vector.broadcast %78 : vector<2x1x256xf32> to vector<2x10x256xf32>
    %80 = vector.broadcast %41 : vector<1x10x1xf32> to vector<2x10x256xf32>
    %81 = arith.mulf %79, %80 : vector<2x10x256xf32>
    %82 = math.sin %81 : vector<2x10x256xf32>
    %c0_39 = arith.constant 0 : index
    %c3_40 = arith.constant 3 : index
    %c0_41 = arith.constant 0 : index
    %c0_42 = arith.constant 0 : index
    %83 = vector.load %arg3[%c0_39, %c3_40, %c0_41, %c0_42] : memref<2x8x10x256xf32, #tpu.memory_space<vmem>>, vector<2x1x10x256xf32>
    %84 = vector.shape_cast %83 : vector<2x1x10x256xf32> to vector<2x10x256xf32>
    %85 = vector.shape_cast %82 : vector<2x10x256xf32> to vector<2x1x10x256xf32>
    tpu.vector_store %arg3[%c0_39, %c3_40, %c0_41, %c0_42], %85 {strides = array<i32>} : memref<2x8x10x256xf32, #tpu.memory_space<vmem>>, vector<2x1x10x256xf32>,
    %86 = math.cos %81 : vector<2x10x256xf32>
    %c0_43 = arith.constant 0 : index
    %c7 = arith.constant 7 : index
    %c0_44 = arith.constant 0 : index
    %c0_45 = arith.constant 0 : index
    %87 = vector.load %arg3[%c0_43, %c7, %c0_44, %c0_45] : memref<2x8x10x256xf32, #tpu.memory_space<vmem>>, vector<2x1x10x256xf32>
    %88 = vector.shape_cast %87 : vector<2x1x10x256xf32> to vector<2x10x256xf32>
    %89 = vector.shape_cast %86 : vector<2x10x256xf32> to vector<2x1x10x256xf32>
    tpu.vector_store %arg3[%c0_43, %c7, %c0_44, %c0_45], %89 {strides = array<i32>} : memref<2x8x10x256xf32, #tpu.memory_space<vmem>>, vector<2x1x10x256xf32>,
    return
  }
  func.func @transform_0(%arg0: i32, %arg1: i32) -> (i32, i32, i32) {
    %c0_i32 = arith.constant 0 : i32
    %c0_i32_0 = arith.constant 0 : i32
    return %arg0, %c0_i32, %arg1 : i32, i32, i32
  }
  func.func @transform_1(%arg0: i32, %arg1: i32) -> (i32, i32, i32, i32) {
    %c0_i32 = arith.constant 0 : i32
    %c0_i32_0 = arith.constant 0 : i32
    %c0_i32_1 = arith.constant 0 : i32
    return %arg0, %c0_i32, %c0_i32_0, %arg1 : i32, i32, i32, i32
  }
}

</mosaic_0001>

<bundles_post_ra>
// kernel: tpu_custom_call.1
= control target key start
LH: loop header
LB: loop body
LE: loop exit
PB: predicated region body
PF: predicated region fallthrough
CT: control target
= control target key end

     0   :  { %6 = vsyncpa [#allocation3], 0  ;;  %s7502_s6 = smov [#allocation2]   ;;  %s11173_s0 = inlined_call_operand.hbm [shape: f32[2,4,256], index: 0, kind: input, shape index: {}]   ;;  %s11174_s1 = inlined_call_operand.vmem [shape: f32[2,8,10,256], index: 1, kind: output, shape index: {}]  }
   0x1   :  { %s12_s7 = sshll.u32 %s7502_s6, 4  ;;  %s7478_s10 = scalar_lea.hbm %s11173_s0, 256  ;;  %s13_s7 = int_to_ptr.vmem [resolvable:$true] %s12_s7 }
   0x2   :  { %p7479_p0 = scmp.ne.s32.totalorder %s11173_s0, %s7478_s10  ;;  %p7482_p1 = scmp.lt.u32.totalorder %s7478_s10, %s11173_s0 }
   0x4   :  { %p7484_p2 = pnand %p7482_p1, %p7479_p0 }
   0x6   :  { %7487 = shalt.err (!%p7484_p2)
}
   0x7   :  { %s7488_s15 = scalar_lea.vmem %s13_s7, 256  ;;  %p7493_p4 = scmp.lt.s32.totalorder %s13_s7, %s13_s7 }
   0x8   :  { %p7489_p3 = scmp.ne.s32.totalorder %s13_s7, %s7488_s15  ;;  %p7494_p5 = scmp.lt.s32.totalorder %s7488_s15, %s7488_s15 }
   0xa   :  { %p7495_p6 = por %p7494_p5, %p7493_p4 }
   0xc   :  { %p7496_p7 = pnand %p7495_p6, %p7489_p3 }
   0xe   :  { %7499 = shalt.err (!%p7496_p7)
}
   0xf   :  { %s7503_s16 = smov 128   ;;  %s7504_s17 = smov 8  }
  0x10   :  { %18 = dma.hbm_to_vmem [thread:$0]  %s11173_s0, 256, %s13_s7, [#allocation3], %s7503_s16, %s7503_s16, %s7504_s17  }
  0x11   :  { %7500 = dma.done.wait [#allocation3], 256  }
  0x12   :  { %7501 = vsyncadd [#allocation3], 4294967040  ;;  %v22_v0 = vlaneseq  ;;  %v7505_v2 = vmov 0.0   ;;  %v65_v8 = vld [vmem:[#allocation2] ss:$4 sm:$0x3] }
  0x13   :  { %v7562_v35 = vld [vmem:[#allocation2 + $0x8] ss:$4 sm:$0x3]  ;;  %v11198_v54 = vmov 683565275  }
  0x14   :  { %v23_v1 = vshrl.u32 %v22_v0, 7  ;;  %v11187_v56 = vmov 2475754826   ;;  %v11185_v58 = vmov 2131351028  }
  0x15   :  { %v11183_v60 = vmov 2102212464   ;;  %v7510_v62 = vmov 920167782  }
  0x16   :  { %vm25_vm0 = vcmp.eq.s32.totalorder %v23_v1, 0  ;;  %vm29_vm1 = vcmp.eq.s32.totalorder %v23_v1, 1  ;;  %vm33_vm2 = vcmp.eq.s32.totalorder %v23_v1, 2  ;;  %vm37_vm3 = vcmp.eq.s32.totalorder %v23_v1, 3 }
  0x17   :  { %v27_v3 = vsel %vm25_vm0, 1.0, %v7505_v2  ;;  %vm41_vm4 = vcmp.eq.s32.totalorder %v23_v1, 4  ;;  %vm45_vm5 = vcmp.eq.s32.totalorder %v23_v1, 5  ;;  %v7534_v5 = vsub.s32 0, %v23_v1 }
  0x18   :  { %v31_v4 = vsel %vm29_vm1, 1.36079, %v27_v3  ;;  %v7536_v6 = vsub.s32 1, %v23_v1  ;;  %v24_v9 = vadd.s32 8, %v23_v1  ;;  %vm49_vm6 = vcmp.eq.s32.totalorder %v23_v1, 6 }
  0x19   :  { %v35_v7 = vsel %vm33_vm2, 1.8517494, %v31_v4  ;;  %vm53_vm7 = vcmp.eq.s32.totalorder %v23_v1, 7  ;;  %v73_v11 = vrot.slane %v65_v8, %v7534_v5  ;;  %v7566_v41 = vrot.slane %v7562_v35, %v7534_v5 }
  0x1a   :  { %v39_v10 = vsel %vm37_vm3, 2.5198421, %v35_v7  ;;  %v77_v13 = vrot.slane %v65_v8, %v7536_v6  ;;  %vm58_vm8 = vcmp.eq.s32.totalorder %v24_v9, 8  ;;  %vm62_vm9 = vcmp.eq.s32.totalorder %v24_v9, 9 }
  0x1b   :  { %v43_v12 = vsel %vm41_vm4, 3.428976, %v39_v10  ;;  %v60_v15 = vsel %vm58_vm8, 11.757876, %v7505_v2  ;;  %v11211_v8 = vmov 1326507024  }
  0x1c   :  { %v47_v14 = vsel %vm45_vm5, 4.6661167, %v43_v12  ;;  %v7540_v17 = vsel %vm62_vm9, 16.0, %v60_v15 }
  0x1d   :  { %v51_v16 = vsel %vm49_vm6, 6.3496046, %v47_v14  ;;  %11224 = vst [vmem:[#allocation5_spill] sm:$0xff] %v7540_v17  ;;  %v7545_v19 = vmul.f32 %v73_v11, %v7540_v17  ;;  %v7570_v44 = vmul.f32 %v77_v13, %v7540_v17 }
  0x1e   :  { %v7542_v18 = vsel %vm53_vm7, 8.640478, %v51_v16 }
  0x1f   :  { %v7548_v20 = vmul.f32 %v73_v11, %v7542_v18  ;;  %v7551_v21 = vmul.f32 %v77_v13, %v7542_v18  ;;  %v309_v22 = vand.u32 2139095040, %v7545_v19  ;;  %v306_v43 = vand.u32 2147483647, %v7545_v19 }
  0x21   :  { %v98_v23 = vand.u32 2147483647, %v7548_v20  ;;  %v101_v24 = vand.u32 2139095040, %v7548_v20  ;;  %v202_v25 = vand.u32 2147483647, %v7551_v21  ;;  %v205_v26 = vand.u32 2139095040, %v7551_v21 }
  0x22   :  { %v310_v28 = vshrl.u32 %v309_v22, 23  ;;  %vm100_vm6 = vcmp.lt.s32.totalorder %v7548_v20, 0 }
  0x23   :  { %v102_v27 = vshrl.u32 %v101_v24, 23  ;;  %v105_v29 = vand.u32 8388607, %v98_v23  ;;  %v206_v30 = vshrl.u32 %v205_v26, 23  ;;  %v209_v31 = vand.u32 8388607, %v202_v25 }
  0x24   :  { %v6908_v33 = vadd.s32 4294967169, %v310_v28  ;;  %vm7677_vm8 = vcmp.le.f32.partialorder %v98_v23, 0.7853982 }
  0x25   :  { %v6900_v32 = vadd.s32 4294967169, %v102_v27  ;;  %v6904_v34 = vadd.s32 4294967169, %v206_v30  ;;  %v106_v38 = vor.u32 8388608, %v105_v29  ;;  %v210_v39 = vor.u32 8388608, %v209_v31 }
  0x26   :  { %v316_v37 = vadd.s32 1, %v6908_v33 }
  0x27   :  { %v108_v36 = vadd.s32 1, %v6900_v32  ;;  %v212_v40 = vadd.s32 1, %v6904_v34  ;;  %v7574_v49 = vshll.u32 %v106_v38, 8  ;;  %v7578_v52 = vshll.u32 %v210_v39, 8 }
  0x28   :  { %vm317_vm11 = vcmp.gt.s32.totalorder %v316_v37, 0 }
  0x29   :  { %vm109_vm10 = vcmp.gt.s32.totalorder %v108_v36, 0  ;;  %vm213_vm12 = vcmp.gt.s32.totalorder %v212_v40, 0  ;;  %v7572_v48 = vsel %vm317_vm11, %v316_v37, 0 }
  0x2a   :  { %v110_v42 = vsel %vm109_vm10, %v108_v36, 0  ;;  %v214_v47 = vsel %vm213_vm12, %v212_v40, 0  ;;  %v7586_v0 = vand.u32 31, %v7572_v48 }
  0x2b   :  { %v111_v45 = vshrl.u32 %v110_v42, 5  ;;  %v112_v46 = vand.u32 31, %v110_v42  ;;  %v7576_v50 = vshrl.u32 %v214_v47, 5  ;;  %v216_v51 = vand.u32 31, %v214_v47 }
  0x2d   :  { %v113_v53 = vsub.s32 32, %v112_v46  ;;  %v115_v55 = vshll.u32 %v11198_v54, %v112_v46  ;;  %v118_v57 = vshll.u32 %v11187_v56, %v112_v46  ;;  %v121_v59 = vshll.u32 %v11185_v58, %v112_v46 }
  0x2e   :  { %v124_v61 = vshll.u32 %v11183_v60, %v112_v46  ;;  %v127_v63 = vshll.u32 %v7510_v62, %v112_v46  ;;  %vm130_vm13 = vcmp.lt.s32.totalorder %v111_v45, 1  ;;  %vm131_vm14 = vcmp.lt.s32.totalorder %v111_v45, 2 }
  0x2f   :  { %v114_v1 = vshrl.u32 %v11198_v54, %v113_v53  ;;  %v116_v2 = vshrl.u32 %v11187_v56, %v113_v53  ;;  %v119_v3 = vshrl.u32 %v11185_v58, %v113_v53  ;;  %v122_v4 = vshrl.u32 %v11183_v60, %v113_v53 }
  0x30   :  { %v125_v7 = vshrl.u32 %v7510_v62, %v113_v53  ;;  %v128_v9 = vshrl.u32 %v11211_v8, %v113_v53  ;;  %vm133_vm15 = vcmp.lt.s32.totalorder %v111_v45, 4  ;;  %v217_v13 = vsub.s32 32, %v216_v51 }
  0x31   :  { %v117_v10 = vor.u32 %v116_v2, %v115_v55  ;;  %v120_v11 = vor.u32 %v119_v3, %v118_v57  ;;  %v123_v12 = vor.u32 %v122_v4, %v121_v59  ;;  %vm132_vm0 = vcmp.lt.s32.totalorder %v111_v45, 3 }
  0x32   :  { %v126_v14 = vor.u32 %v125_v7, %v124_v61  ;;  %v129_v15 = vor.u32 %v128_v9, %v127_v63  ;;  %v219_v16 = vshll.u32 %v11198_v54, %v216_v51  ;;  %v222_v31 = vshll.u32 %v11187_v56, %v216_v51 }
  0x33   :  { %v134_v22 = vsel %vm130_vm13, %v114_v1, %v117_v10  ;;  %v135_v24 = vsel %vm133_vm15, %v123_v12, 2102212464  ;;  %v138_v26 = vsel %vm130_vm13, %v117_v10, %v120_v11  ;;  %v142_v27 = vsel %vm130_vm13, %v120_v11, %v123_v12 }
  0x34   :  { %v136_v28 = vsel %vm132_vm0, %v120_v11, %v135_v24  ;;  %v139_v29 = vsel %vm133_vm15, %v126_v14, 920167782  ;;  %v143_v30 = vsel %vm133_vm15, %v129_v15, 1326507024  ;;  %v218_v34 = vshrl.u32 %v11198_v54, %v217_v13 }
  0x35   :  { %v140_v32 = vsel %vm132_vm0, %v123_v12, %v139_v29  ;;  %v144_v33 = vsel %vm132_vm0, %v126_v14, %v143_v30  ;;  %v220_v36 = vshrl.u32 %v11187_v56, %v217_v13  ;;  %v137_v37 = vsel %vm131_vm14, %v134_v22, %v136_v28 }
  0x36   :  { %v141_v38 = vsel %vm131_vm14, %v138_v26, %v140_v32  ;;  %v145_v39 = vsel %vm131_vm14, %v142_v27, %v144_v33  ;;  %v223_v40 = vshrl.u32 %v11185_v58, %v217_v13  ;;  %v225_v59 = vshll.u32 %v11185_v58, %v216_v51 }
  0x37   :  { %v7606_v42 = vmul.u32.u64.low %v7574_v49, %v145_v39  ;;  %v7607_v46 = vmul.u32.u64.high %v7574_v49, %v145_v39, %v7606_v42  ;;  %v7610_v47 = vmul.u32.u64.low %v7574_v49, %v141_v38  ;;  %v7611_v53 = vmul.u32.u64.high %v7574_v49, %v141_v38, %v7610_v47 }
  0x38   :  { %v221_v55 = vor.u32 %v220_v36, %v219_v16  ;;  %v224_v57 = vor.u32 %v223_v40, %v222_v31  ;;  %v226_v61 = vshrl.u32 %v11183_v60, %v217_v13  ;;  %v228_v45 = vshll.u32 %v11183_v60, %v216_v51 }
  0x39   :  { %v229_v63 = vshrl.u32 %v7510_v62, %v217_v13  ;;  %v231_v1 = vshll.u32 %v7510_v62, %v216_v51  ;;  %v232_v2 = vshrl.u32 %v11211_v8, %v217_v13  ;;  %v153_v3 = vmul.u32 %v7574_v49, %v137_v37 }
  0x3a   :  { %v227_v4 = vor.u32 %v226_v61, %v225_v59  ;;  %vm234_vm1 = vcmp.lt.s32.totalorder %v7576_v50, 1  ;;  %vm235_vm2 = vcmp.lt.s32.totalorder %v7576_v50, 2  ;;  %vm155_vm3 = vc.u32 %v7607_v46, %v7610_v47 }
  0x3b   :  { %v156_v7 = vadd.s32 1, %v7611_v53  ;;  %v230_v9 = vor.u32 %v229_v63, %v228_v45  ;;  %vm236_vm4 = vcmp.lt.s32.totalorder %v7576_v50, 3  ;;  %v233_v10 = vor.u32 %v232_v2, %v231_v1 }
  0x3c   :  { %vm237_vm5 = vcmp.lt.s32.totalorder %v7576_v50, 4  ;;  %v238_v51 = vsel %vm234_vm1, %v218_v34, %v221_v55  ;;  %v242_v11 = vsel %vm234_vm1, %v221_v55, %v224_v57  ;;  %v246_v14 = vsel %vm234_vm1, %v224_v57, %v227_v4 }
  0x3d   :  { %v157_v49 = vsel %vm155_vm3, %v156_v7, %v7611_v53  ;;  %v239_v12 = vsel %vm237_vm5, %v227_v4, 2102212464  ;;  %v243_v13 = vsel %vm237_vm5, %v230_v9, 920167782  ;;  %v247_v24 = vsel %vm237_vm5, %v233_v10, 1326507024 }
  0x3e   :  { %v158_v15 = vadd.s32 %v157_v49, %v153_v3  ;;  %v240_v16 = vsel %vm236_vm4, %v224_v57, %v239_v12  ;;  %v244_v22 = vsel %vm236_vm4, %v227_v4, %v243_v13  ;;  %v248_v28 = vsel %vm236_vm4, %v230_v9, %v247_v24 }
  0x3f   :  { %v241_v26 = vsel %vm235_vm2, %v238_v51, %v240_v16  ;;  %v245_v27 = vsel %vm235_vm2, %v242_v11, %v244_v22  ;;  %v321_v29 = vsub.s32 32, %v7586_v0  ;;  %v249_v31 = vsel %vm235_vm2, %v246_v14, %v248_v28 }
  0x40   :  { %v159_v30 = vadd.s32 536870912, %v158_v15  ;;  %v7637_v32 = vmul.u32.u64.low %v7578_v52, %v245_v27  ;;  %v7638_v33 = vmul.u32.u64.high %v7578_v52, %v245_v27, %v7637_v32  ;;  %v7647_v37 = vrot.slane %v7562_v35, %v7536_v6 }
  0x41   :  { %v7642_v34 = vmul.u32.u64.low %v7578_v52, %v249_v31  ;;  %v7643_v36 = vmul.u32.u64.high %v7578_v52, %v249_v31, %v7642_v34  ;;  %v313_v39 = vand.u32 8388607, %v306_v43  ;;  %v410_v50 = vand.u32 2147483647, %v7570_v44 }
  0x42   :  { %v160_v38 = vshrl.u32 %v159_v30, 30  ;;  %v7654_v40 = vmul.f32 %v7566_v41, %v7542_v18  ;;  %v257_v42 = vmul.u32 %v7578_v52, %v241_v26  ;;  %v7659_v53 = vshrl.u32 %v7572_v48, 5 }
  0x43   :  { %v323_v35 = vshll.u32 %v11198_v54, %v7586_v0  ;;  %v413_v55 = vand.u32 2139095040, %v7570_v44  ;;  %v260_v59 = vadd.s32 1, %v7638_v33  ;;  %v324_v61 = vshrl.u32 %v11187_v56, %v321_v29 }
  0x44   :  { %v161_v57 = vshll.u32 %v160_v38, 30  ;;  %v332_v45 = vshll.u32 %v11183_v60, %v7586_v0  ;;  %vm259_vm7 = vc.u32 %v7643_v36, %v7637_v32  ;;  %v326_v48 = vshll.u32 %v11187_v56, %v7586_v0 }
  0x45   :  { %v327_v52 = vshrl.u32 %v11185_v58, %v321_v29  ;;  %v329_v63 = vshll.u32 %v11185_v58, %v7586_v0  ;;  %v261_v3 = vsel %vm259_vm7, %v260_v59, %v7638_v33  ;;  %v330_v4 = vshrl.u32 %v11183_v60, %v321_v29 }
  0x46   :  { %v7681_v2 = vsub.s32 %v158_v15, %v161_v57  ;;  %v333_v7 = vshrl.u32 %v7510_v62, %v321_v29  ;;  %v262_v9 = vadd.s32 %v261_v3, %v257_v42  ;;  %v314_v10 = vor.u32 8388608, %v313_v39 }
  0x47   :  { %v335_v51 = vshll.u32 %v7510_v62, %v7586_v0  ;;  %v336_v11 = vshrl.u32 %v11211_v8, %v321_v29  ;;  %v184_v49 = vsub.s32 4, %v160_v38  ;;  %v414_v13 = vshrl.u32 %v413_v55, 23 }
  0x48   :  { %v164_v23 = vsub.s32 0, %v7681_v2  ;;  %v334_v12 = vor.u32 %v333_v7, %v332_v45  ;;  %v263_v14 = vadd.s32 536870912, %v262_v9  ;;  %v322_v15 = vshrl.u32 %v11198_v54, %v321_v29 }
  0x49   :  { %v325_v16 = vor.u32 %v324_v61, %v323_v35  ;;  %v328_v22 = vor.u32 %v327_v52, %v326_v48  ;;  %v331_v26 = vor.u32 %v330_v4, %v329_v63  ;;  %vm338_vm9 = vcmp.lt.s32.totalorder %v7659_v53, 1 }
  0x4a   :  { %v6901_v24 = vmin.u32 %v164_v23, %v7681_v2  ;;  %vm341_vm10 = vcmp.lt.s32.totalorder %v7659_v53, 4  ;;  %v264_v0 = vshrl.u32 %v263_v14, 30  ;;  %v337_v27 = vor.u32 %v336_v11, %v335_v51 }
  0x4b   :  { %vm340_vm11 = vcmp.lt.s32.totalorder %v7659_v53, 3  ;;  %v347_v28 = vsel %vm341_vm10, %v334_v12, 920167782  ;;  %v185_v29 = vsel %vm100_vm6, %v184_v49, %v160_v38  ;;  %v354_v31 = vshll.u32 %v314_v10, 8 }
  0x4c   :  { %v166_v30 = vclz %v6901_v24  ;;  %v6912_v33 = vadd.s32 4294967169, %v414_v13  ;;  %v154_v34 = vadd.s32 %v7610_v47, %v7607_v46  ;;  %v265_v39 = vshll.u32 %v264_v0, 30 }
  0x4d   :  { %vm339_vm12 = vcmp.lt.s32.totalorder %v7659_v53, 2  ;;  %v343_v42 = vsel %vm341_vm10, %v331_v26, 2102212464  ;;  %v346_v55 = vsel %vm338_vm9, %v325_v16, %v328_v22  ;;  %v348_v57 = vsel %vm340_vm11, %v331_v26, %v347_v28 }
  0x4e   :  { %v6902_v35 = vadd.s32 4294967294, %v166_v30  ;;  %v350_v38 = vsel %vm338_vm9, %v328_v22, %v331_v26  ;;  %v7712_v59 = vsel %vm7677_vm8, 0, %v185_v29  ;;  %v7714_v46 = vsub.s32 %v262_v9, %v265_v39 }
  0x4f   :  { %v342_v47 = vsel %vm338_vm9, %v322_v15, %v325_v16  ;;  %v351_v61 = vsel %vm341_vm10, %v337_v27, 1326507024  ;;  %v288_v45 = vsub.s32 4, %v264_v0  ;;  %v344_v48 = vsel %vm340_vm11, %v328_v22, %v343_v42 }
  0x50   :  { %vm6903_vm13 = vcmp.lt.s32.totalorder %v6902_v35, 0  ;;  %v352_v52 = vsel %vm340_vm11, %v334_v12, %v351_v61  ;;  %v268_v3 = vsub.s32 0, %v7714_v46  ;;  %v349_v4 = vsel %vm339_vm12, %v346_v55, %v348_v57 }
  0x51   :  { %v169_v63 = vsel %vm6903_vm13, 0, %v6902_v35  ;;  %v353_v7 = vsel %vm339_vm12, %v350_v38, %v352_v52  ;;  %v420_v11 = vadd.s32 1, %v6912_v33  ;;  %v345_v49 = vsel %vm339_vm12, %v342_v47, %v344_v48 }
  0x52   :  { %v170_v9 = vsub.s32 32, %v169_v63  ;;  %v171_v10 = vshll.u32 %v7681_v2, %v169_v63  ;;  %v174_v51 = vsub.s32 4294967266, %v169_v63  ;;  %v6905_v23 = vmin.u32 %v268_v3, %v7714_v46 }
  0x53   :  { %v7733_v12 = vmul.u32.u64.low %v354_v31, %v353_v7  ;;  %v7734_v13 = vmul.u32.u64.high %v354_v31, %v353_v7, %v7733_v12  ;;  %v7736_v16 = vmul.u32.u64.low %v354_v31, %v349_v4  ;;  %v7737_v22 = vmul.u32.u64.high %v354_v31, %v349_v4, %v7736_v16 }
  0x54   :  { %v172_v14 = vshrl.u32 %v154_v34, %v170_v9  ;;  %v175_v15 = vadd.s32 127, %v174_v51  ;;  %v191_v24 = vadd.s32 3, %v7712_v59  ;;  %vm7743_vm14 = vcmp.le.f32.partialorder %v202_v25, 0.7853982 }
  0x55   :  { %vm204_vm15 = vcmp.lt.s32.totalorder %v7551_v21, 0  ;;  %v270_v53 = vclz %v6905_v23  ;;  %vm421_vm0 = vcmp.gt.s32.totalorder %v420_v11, 0  ;;  %v361_v29 = vmul.u32 %v354_v31, %v345_v49 }
  0x56   :  { %v173_v26 = vor.u32 %v172_v14, %v171_v10  ;;  %v176_v27 = vshll.u32 %v175_v15, 23  ;;  %v289_v28 = vsel %vm204_vm15, %v288_v45, %v264_v0  ;;  %vm363_vm1 = vc.u32 %v7734_v13, %v7736_v16 }
  0x57   :  { %v6906_v30 = vadd.s32 4294967294, %v270_v53  ;;  %v422_v33 = vsel %vm421_vm0, %v420_v11, 0  ;;  %v364_v39 = vadd.s32 1, %v7737_v22  ;;  %v417_v42 = vand.u32 8388607, %v410_v50 }
  0x58   :  { %v177_v34 = vor.u32 4788187, %v176_v27  ;;  %v180_v25 = vcvt.s32.f32 %v173_v26  ;;  %v258_v35 = vadd.s32 %v7637_v32, %v7643_v36  ;;  %v7759_v0 = vsel %vm7743_vm14, 0, %v289_v28 }
  0x59   :  { %vm6907_vm2 = vcmp.lt.s32.totalorder %v6906_v30, 0  ;;  %v424_v31 = vand.u32 31, %v422_v33  ;;  %v7761_v57 = vand.u32 3, %v191_v24  ;;  %v365_v47 = vsel %vm363_vm1, %v364_v39, %v7737_v22 }
  0x5a   :  { %v178_v55 = vand.u32 2147483647, %v177_v34  ;;  %v273_v38 = vsel %vm6907_vm2, 0, %v6906_v30  ;;  %v366_v52 = vadd.s32 %v365_v47, %v361_v29  ;;  %v295_v32 = vadd.s32 3, %v7759_v0 }
  0x5b   :  { %v274_v61 = vsub.s32 32, %v273_v38  ;;  %v275_v45 = vshll.u32 %v7714_v46, %v273_v38  ;;  %v278_v48 = vsub.s32 4294967266, %v273_v38  ;;  %v418_v36 = vor.u32 8388608, %v417_v42 }
  0x5c   :  { %v181_v63 = vmul.f32 %v180_v25, %v178_v55  ;;  %v425_v3 = vsub.s32 32, %v424_v31  ;;  %v367_v9 = vadd.s32 536870912, %v366_v52  ;;  %v7766_v10 = vshrl.u32 %v422_v33, 5 }
  0x5d   :  { %v276_v4 = vshrl.u32 %v258_v35, %v274_v61  ;;  %v279_v7 = vadd.s32 127, %v278_v48  ;;  %v427_v11 = vshll.u32 %v11198_v54, %v424_v31  ;;  %v430_v23 = vshll.u32 %v11187_v56, %v424_v31 }
  0x5e   :  { %v182_v51 = vxor.u32 2147483648, %v181_v63  ;;  %v433_v49 = vshll.u32 %v11185_v58, %v424_v31  ;;  %v7771_v14 = vshrl.u32 %v367_v9, 30  ;;  %v428_v15 = vshrl.u32 %v11187_v56, %v425_v3 }
  0x5f   :  { %v277_v46 = vor.u32 %v276_v4, %v275_v45  ;;  %v280_v12 = vshll.u32 %v279_v7, 23  ;;  %v431_v24 = vshrl.u32 %v11185_v58, %v425_v3  ;;  %v434_v53 = vshrl.u32 %v11183_v60, %v425_v3 }
  0x60   :  { %v183_v22 = vsel %vm100_vm6, %v182_v51, %v181_v63  ;;  %v436_v26 = vshll.u32 %v11183_v60, %v424_v31  ;;  %v369_v29 = vshll.u32 %v7771_v14, 30  ;;  %v7783_v33 = vand.u32 3, %v295_v32 }
  0x61   :  { %v186_v27 = vsel %vm7677_vm8, %v7548_v20, %v183_v22  ;;  %v281_v28 = vor.u32 4788187, %v280_v12  ;;  %v284_v30 = vcvt.s32.f32 %v277_v46  ;;  %v437_v34 = vshrl.u32 %v7510_v62, %v425_v3 }
  0x62   :  { %7350 = vcosq.f32 %v186_v27  ;;  %v7786_v25 = vshll.u32 %v418_v36, 8  ;;  %v7788_v42 = vsub.s32 %v366_v52, %v369_v29  ;;  %v439_v35 = vshll.u32 %v7510_v62, %v424_v31 }
  0x63   :  { %7352 = vsinq.f32 %v186_v27  ;;  %v282_v39 = vand.u32 2147483647, %v281_v28  ;;  %vm197_vm3 = vcmp.eq.s32.totalorder %v7761_v57, 2  ;;  %v429_v1 = vor.u32 %v428_v15, %v427_v11 }
  0x64   :  { %v432_v55 = vor.u32 %v431_v24, %v430_v23  ;;  %v438_v38 = vor.u32 %v437_v34, %v436_v26  ;;  %v440_v47 = vshrl.u32 %v11211_v8, %v425_v3  ;;  %vm194_vm4 = vcmp.eq.s32.totalorder %v7761_v57, 0 }
  0x65   :  { %v285_v61 = vmul.f32 %v284_v30, %v282_v39  ;;  %v372_v45 = vsub.s32 0, %v7788_v42  ;;  %v435_v48 = vor.u32 %v434_v53, %v433_v49  ;;  %vm442_vm5 = vcmp.lt.s32.totalorder %v7766_v10, 1 }
  0x66   :  { %vm193_vm6 = vcmp.lt.s32.totalorder %v7761_v57, 2  ;;  %v362_v31 = vadd.s32 %v7736_v16, %v7734_v13  ;;  %v426_v52 = vshrl.u32 %v11198_v54, %v425_v3  ;;  %vm444_vm7 = vcmp.lt.s32.totalorder %v7766_v10, 3 }
  0x67   :  { %vm445_vm8 = vcmp.lt.s32.totalorder %v7766_v10, 4  ;;  %vm190_vm9 = vweird.f32 %v7548_v20  ;;  %v286_v63 = vxor.u32 2147483648, %v285_v61  ;;  %vm308_vm10 = vcmp.lt.s32.totalorder %v7545_v19, 0 }
  0x68   :  { %v6909_v32 = vmin.u32 %v372_v45, %v7788_v42  ;;  %v441_v36 = vor.u32 %v440_v47, %v439_v35  ;;  %v447_v4 = vsel %vm445_vm8, %v435_v48, 2102212464  ;;  %vm443_vm11 = vcmp.lt.s32.totalorder %v7766_v10, 2 }
  0x69   :  { %v450_v13 = vsel %vm442_vm5, %v429_v1, %v432_v55  ;;  %v451_v16 = vsel %vm445_vm8, %v438_v38, 920167782  ;;  %v514_v3 = vand.u32 2147483647, %v7654_v40  ;;  %v287_v7 = vsel %vm204_vm15, %v286_v63, %v285_v61 }
  0x6a   :  { %v374_v9 = vclz %v6909_v32  ;;  %v392_v51 = vsub.s32 4, %v7771_v14  ;;  %v452_v11 = vsel %vm444_vm7, %v435_v48, %v451_v16  ;;  %v290_v23 = vsel %vm7743_vm14, %v7551_v21, %v287_v7 }
  0x6b   :  { %v446_v49 = vsel %vm442_vm5, %v426_v52, %v429_v1  ;;  %v448_v46 = vsel %vm444_vm7, %v432_v55, %v447_v4  ;;  %v454_v12 = vsel %vm442_vm5, %v432_v55, %v435_v48  ;;  %7354 = vcosq.f32 %v290_v23 }
  0x6c   :  { %v6910_v15 = vadd.s32 4294967294, %v374_v9  ;;  %v453_v22 = vsel %vm443_vm11, %v450_v13, %v452_v11  ;;  %v455_v24 = vsel %vm445_vm8, %v441_v36, 1326507024  ;;  %v7831_v53 = vpop.eup %7350  ;;  %7356 = vsinq.f32 %v290_v23 }
  0x6d   :  { %v456_v2 = vsel %vm444_vm7, %v438_v38, %v455_v24  ;;  %v7836_v26 = vmul.u32.u64.low %v7786_v25, %v453_v22  ;;  %v7837_v27 = vmul.u32.u64.high %v7786_v25, %v453_v22, %v7836_v26  ;;  %v7840_v28 = vpop.eup %7352  ;;  %v198_v30 = vxor.u32 2147483648, %v7831_v53 }
  0x6e   :  { %vm6911_vm12 = vcmp.lt.s32.totalorder %v6910_v15, 0  ;;  %v449_v29 = vsel %vm443_vm11, %v446_v49, %v448_v46  ;;  %v457_v34 = vsel %vm443_vm11, %v454_v12, %v456_v2  ;;  %v195_v39 = vxor.u32 2147483648, %v7840_v28 }
  0x6f   :  { %v377_v35 = vsel %vm6911_vm12, 0, %v6910_v15  ;;  %v7849_v1 = vmul.u32.u64.low %v7786_v25, %v457_v34  ;;  %v7850_v55 = vmul.u32.u64.high %v7786_v25, %v457_v34, %v7849_v1  ;;  %v199_v38 = vsel %vm197_vm3, %v198_v30, %v7840_v28 }
  0x70   :  { %v378_v47 = vsub.s32 32, %v377_v35  ;;  %v379_v61 = vshll.u32 %v7788_v42, %v377_v35  ;;  %v382_v45 = vsub.s32 4294967266, %v377_v35  ;;  %v196_v10 = vsel %vm194_vm4, %v7831_v53, %v195_v39 }
  0x71   :  { %v393_v48 = vsel %vm308_vm10, %v392_v51, %v7771_v14  ;;  %v465_v52 = vmul.u32 %v7786_v25, %v449_v29  ;;  %v468_v63 = vadd.s32 1, %v7837_v27  ;;  %v200_v32 = vsel %vm193_vm6, %v196_v10, %v199_v38 }
  0x72   :  { %v380_v36 = vshrl.u32 %v362_v31, %v378_v47  ;;  %v383_v42 = vadd.s32 127, %v382_v45  ;;  %v517_v4 = vand.u32 2139095040, %v7654_v40  ;;  %v201_v13 = vsel %vm190_vm9, nan, %v200_v32 }
  0x73   :  { %vm7875_vm13 = vcmp.le.f32.partialorder %v306_v43, 0.7853982  ;;  %vm467_vm14 = vc.u32 %v7850_v55, %v7836_v26  ;;  %v7883_v57 = vmul.f32 %v7647_v37, %v7542_v18  ;;  %930 = vst [vmem:[%s11174_s1] sm:$0xff] %v201_v13  ;;  %vm294_vm15 = vweird.f32 %v7551_v21 }
  0x74   :  { %v381_v14 = vor.u32 %v380_v36, %v379_v61  ;;  %v384_v25 = vshll.u32 %v383_v42, 23  ;;  %v469_v31 = vsel %vm467_vm14, %v468_v63, %v7837_v27  ;;  %v518_v7 = vshrl.u32 %v517_v4, 23 }
  0x75   :  { %v7892_v43 = vsel %vm7875_vm13, 0, %v393_v48  ;;  %v470_v9 = vadd.s32 %v469_v31, %v465_v52  ;;  %v521_v51 = vand.u32 8388607, %v514_v3  ;;  %v7896_v11 = vpop.eup %7354  ;;  %vm301_vm0 = vcmp.eq.s32.totalorder %v7783_v33, 2 }
  0x76   :  { %v385_v23 = vor.u32 4788187, %v384_v25  ;;  %v388_v49 = vcvt.s32.f32 %v381_v14  ;;  %v6916_v46 = vadd.s32 4294967169, %v518_v7  ;;  %v7899_v12 = vpop.eup %7356  ;;  %vm297_vm1 = vcmp.lt.s32.totalorder %v7783_v33, 2 }
  0x77   :  { %vm298_vm2 = vcmp.eq.s32.totalorder %v7783_v33, 0  ;;  %v11180_v15 = vxor.u32 2147483648, %v7896_v11  ;;  %v471_v22 = vadd.s32 536870912, %v470_v9  ;;  %v11181_v24 = vxor.u32 2147483648, %v7899_v12 }
  0x78   :  { %v386_v2 = vand.u32 2147483647, %v385_v23  ;;  %v399_v27 = vadd.s32 3, %v7892_v43  ;;  %vm412_vm3 = vcmp.lt.s32.totalorder %v7570_v44, 0  ;;  %v524_v29 = vadd.s32 1, %v6916_v46 }
  0x79   :  { %v303_v34 = vsel %vm301_vm0, %v11180_v15, %v7899_v12  ;;  %v472_v35 = vshrl.u32 %v471_v22, 30  ;;  %v522_v1 = vor.u32 8388608, %v521_v51  ;;  %v618_v38 = vand.u32 2147483647, %v7883_v57 }
  0x7a   :  { %v300_v47 = vsel %vm298_vm2, %v7896_v11, %v11181_v24  ;;  %v389_v61 = vmul.f32 %v388_v49, %v386_v2  ;;  %vm525_vm4 = vcmp.gt.s32.totalorder %v524_v29, 0  ;;  %v621_v45 = vand.u32 2139095040, %v7883_v57 }
  0x7b   :  { %v304_v10 = vsel %vm297_vm1, %v300_v47, %v303_v34  ;;  %vm7919_vm5 = vcmp.le.f32.partialorder %v410_v50, 0.7853982  ;;  %v473_v52 = vshll.u32 %v472_v35, 30  ;;  %v526_v63 = vsel %vm525_vm4, %v524_v29, 0 }
  0x7c   :  { %v305_v32 = vsel %vm294_vm15, nan, %v304_v10  ;;  %v390_v36 = vxor.u32 2147483648, %v389_v61  ;;  %v7925_v42 = vand.u32 3, %v399_v27  ;;  %v528_v4 = vand.u32 31, %v526_v63 }
  0x7d   :  { %931 = vst [vmem:[%s11174_s1 + $0x8] sm:$0xff] %v305_v32  ;;  %v7932_v33 = vadd.s32 %v7836_v26, %v7850_v55  ;;  %v7934_v50 = vsub.s32 %v470_v9, %v473_v52  ;;  %v496_v13 = vsub.s32 4, %v472_v35  ;;  %v7936_v14 = vshll.u32 %v522_v1, 8 }
  0x7e   :  { %v391_v25 = vsel %vm308_vm10, %v390_v36, %v389_v61  ;;  %v529_v31 = vsub.s32 32, %v528_v4  ;;  %v622_v7 = vshrl.u32 %v621_v45, 23  ;;  %v7942_v51 = vand.u32 8388607, %v618_v38 }
  0x7f   :  { %v394_v23 = vsel %vm7875_vm13, %v7545_v19, %v391_v25  ;;  %v476_v26 = vsub.s32 0, %v7934_v50  ;;  %v531_v55 = vshll.u32 %v11198_v54, %v528_v4  ;;  %v534_v9 = vshll.u32 %v11187_v56, %v528_v4 }
  0x80   :  { %7358 = vcosq.f32 %v394_v23  ;;  %v527_v49 = vshrl.u32 %v526_v63, 5  ;;  %v532_v46 = vshrl.u32 %v11187_v56, %v529_v31  ;;  %v535_v22 = vshrl.u32 %v11185_v58, %v529_v31 }
  0x81   :  { %7360 = vsinq.f32 %v394_v23  ;;  %v6913_v2 = vmin.u32 %v476_v26, %v7934_v50  ;;  %v497_v27 = vsel %vm412_vm3, %v496_v13, %v472_v35  ;;  %v537_v16 = vshll.u32 %v11185_v58, %v528_v4 }
  0x82   :  { %vm405_vm6 = vcmp.eq.s32.totalorder %v7925_v42, 2  ;;  %v538_v29 = vshrl.u32 %v11183_v60, %v529_v31  ;;  %v540_v34 = vshll.u32 %v11183_v60, %v528_v4  ;;  %v6920_v1 = vadd.s32 4294967169, %v622_v7 }
  0x83   :  { %v626_v47 = vor.u32 8388608, %v7942_v51  ;;  %vm402_vm7 = vcmp.eq.s32.totalorder %v7925_v42, 0  ;;  %v478_v61 = vclz %v6913_v2  ;;  %v530_v45 = vshrl.u32 %v11198_v54, %v529_v31 }
  0x84   :  { %v533_v10 = vor.u32 %v532_v46, %v531_v55  ;;  %v536_v52 = vor.u32 %v535_v22, %v534_v9  ;;  %vm401_vm8 = vcmp.lt.s32.totalorder %v7925_v42, 2  ;;  %v7965_v35 = vsel %vm7919_vm5, 0, %v497_v27 }
  0x85   :  { %v541_v63 = vshrl.u32 %v7510_v62, %v529_v31  ;;  %v543_v32 = vshll.u32 %v7510_v62, %v528_v4  ;;  %v544_v36 = vshrl.u32 %v11211_v8, %v529_v31  ;;  %vm398_vm10 = vweird.f32 %v7545_v19 }
  0x86   :  { %v6914_v13 = vadd.s32 4294967294, %v478_v61  ;;  %v539_v25 = vor.u32 %v538_v29, %v537_v16  ;;  %vm546_vm11 = vcmp.lt.s32.totalorder %v527_v49, 1  ;;  %vm547_vm12 = vcmp.lt.s32.totalorder %v527_v49, 2 }
  0x87   :  { %v542_v7 = vor.u32 %v541_v63, %v540_v34  ;;  %v545_v23 = vor.u32 %v544_v36, %v543_v32  ;;  %vm548_vm13 = vcmp.lt.s32.totalorder %v527_v49, 3  ;;  %vm549_vm14 = vcmp.lt.s32.totalorder %v527_v49, 4 }
  0x88   :  { %vm6915_vm0 = vcmp.lt.s32.totalorder %v6914_v13, 0  ;;  %v550_v26 = vsel %vm546_vm11, %v530_v45, %v533_v10  ;;  %v551_v55 = vsel %vm549_vm14, %v539_v25, 2102212464  ;;  %v554_v9 = vsel %vm546_vm11, %v533_v10, %v536_v52 }
  0x89   :  { %v481_v46 = vsel %vm6915_vm0, 0, %v6914_v13  ;;  %v552_v4 = vsel %vm548_vm13, %v536_v52, %v551_v55  ;;  %v555_v31 = vsel %vm549_vm14, %v542_v7, 920167782  ;;  %v559_v22 = vsel %vm549_vm14, %v545_v23, 1326507024 }
  0x8a   :  { %v482_v2 = vsub.s32 32, %v481_v46  ;;  %v483_v27 = vshll.u32 %v7934_v50, %v481_v46  ;;  %v486_v16 = vsub.s32 4294967266, %v481_v46  ;;  %v558_v29 = vsel %vm546_vm11, %v536_v52, %v539_v25  ;;  %v7976_v34 = vpop.eup %7358 }
  0x8b   :  { %v553_v61 = vsel %vm547_vm12, %v550_v26, %v552_v4  ;;  %v556_v45 = vsel %vm548_vm13, %v539_v25, %v555_v31  ;;  %v560_v63 = vsel %vm548_vm13, %v542_v7, %v559_v22  ;;  %v628_v10 = vadd.s32 1, %v6920_v1  ;;  %v7981_v32 = vpop.eup %7360 }
  0x8c   :  { %v11175_v36 = vxor.u32 2147483648, %v7976_v34  ;;  %v484_v13 = vshrl.u32 %v7932_v33, %v482_v2  ;;  %v487_v23 = vadd.s32 127, %v486_v16  ;;  %v557_v50 = vsel %vm547_vm12, %v554_v9, %v556_v45 }
  0x8d   :  { %v11176_v52 = vxor.u32 2147483648, %v7981_v32  ;;  %v561_v55 = vsel %vm547_vm12, %v558_v29, %v560_v63  ;;  %v7989_v26 = vmul.u32.u64.low %v7936_v14, %v557_v50  ;;  %v7990_v46 = vmul.u32.u64.high %v7936_v14, %v557_v50, %v7989_v26 }
  0x8e   :  { %v407_v1 = vsel %vm405_vm6, %v11175_v36, %v7981_v32  ;;  %v485_v25 = vor.u32 %v484_v13, %v483_v27  ;;  %v488_v33 = vshll.u32 %v487_v23, 23  ;;  %vm629_vm1 = vcmp.gt.s32.totalorder %v628_v10, 0 }
  0x8f   :  { %v404_v49 = vsel %vm402_vm7, %v7976_v34, %v11176_v52  ;;  %v8004_v7 = vmul.u32.u64.low %v7936_v14, %v561_v55  ;;  %v8005_v9 = vmul.u32.u64.high %v7936_v14, %v561_v55, %v8004_v7  ;;  %v630_v4 = vsel %vm629_vm1, %v628_v10, 0 }
  0x90   :  { %v408_v31 = vsel %vm401_vm8, %v404_v49, %v407_v1  ;;  %v489_v22 = vor.u32 4788187, %v488_v33  ;;  %v492_v2 = vcvt.s32.f32 %v485_v25  ;;  %v8009_v16 = vshrl.u32 %v630_v4, 5 }
  0x91   :  { %v409_v27 = vsel %vm398_vm10, nan, %v408_v31  ;;  %v569_v29 = vmul.u32 %v7936_v14, %v553_v61  ;;  %v572_v45 = vadd.s32 1, %v7990_v46  ;;  %v632_v63 = vand.u32 31, %v630_v4 }
  0x92   :  { %932 = vst [vmem:[%s11174_s1 + $0x10] sm:$0x3] %v409_v27  ;;  %v490_v10 = vand.u32 2147483647, %v489_v22  ;;  %v503_v42 = vadd.s32 3, %v7965_v35  ;;  %v8021_v13 = vshll.u32 %v626_v47, 8  ;;  %v8025_v23 = vmul.f32 %v7566_v41, %v7540_v17 }
  0x93   :  { %vm571_vm2 = vc.u32 %v8005_v9, %v7989_v26  ;;  %v633_v14 = vsub.s32 32, %v632_v63  ;;  %v635_v61 = vshll.u32 %v11198_v54, %v632_v63  ;;  %vm650_vm4 = vcmp.lt.s32.totalorder %v8009_v16, 1 }
  0x94   :  { %v493_v50 = vmul.f32 %v492_v2, %v490_v10  ;;  %v573_v55 = vsel %vm571_vm2, %v572_v45, %v7990_v46  ;;  %v638_v1 = vshll.u32 %v11187_v56, %v632_v63  ;;  %v641_v51 = vshll.u32 %v11185_v58, %v632_v63 }
  0x95   :  { %v574_v47 = vadd.s32 %v573_v55, %v569_v29  ;;  %v634_v25 = vshrl.u32 %v11198_v54, %v633_v14  ;;  %v636_v41 = vshrl.u32 %v11187_v56, %v633_v14  ;;  %v639_v33 = vshrl.u32 %v11185_v58, %v633_v14 }
  0x96   :  { %v494_v49 = vxor.u32 2147483648, %v493_v50  ;;  %v642_v7 = vshrl.u32 %v11183_v60, %v633_v14  ;;  %v644_v4 = vshll.u32 %v11183_v60, %v632_v63  ;;  %v645_v31 = vshrl.u32 %v7510_v62, %v633_v14 }
  0x97   :  { %v575_v22 = vadd.s32 536870912, %v574_v47  ;;  %v637_v46 = vor.u32 %v636_v41, %v635_v61  ;;  %v640_v2 = vor.u32 %v639_v33, %v638_v1  ;;  %v647_v27 = vshll.u32 %v7510_v62, %v632_v63 }
  0x98   :  { %v495_v29 = vsel %vm412_vm3, %v494_v49, %v493_v50  ;;  %v643_v45 = vor.u32 %v642_v7, %v641_v51  ;;  %v646_v10 = vor.u32 %v645_v31, %v644_v4  ;;  %v648_v55 = vshrl.u32 %v11211_v8, %v633_v14 }
  0x99   :  { %v498_v36 = vsel %vm7919_vm5, %v7570_v44, %v495_v29  ;;  %v576_v52 = vshrl.u32 %v575_v22, 30  ;;  %vm651_vm6 = vcmp.lt.s32.totalorder %v8009_v16, 2  ;;  %vm653_vm7 = vcmp.lt.s32.totalorder %v8009_v16, 4 }
  0x9a   :  { %7362 = vcosq.f32 %v498_v36  ;;  %v649_v61 = vor.u32 %v648_v55, %v647_v27  ;;  %vm652_vm8 = vcmp.lt.s32.totalorder %v8009_v16, 3  ;;  %v655_v63 = vsel %vm653_vm7, %v643_v45, 2102212464 }
  0x9b   :  { %7364 = vsinq.f32 %v498_v36  ;;  %v577_v50 = vshll.u32 %v576_v52, 30  ;;  %v654_v1 = vsel %vm650_vm4, %v634_v25, %v637_v46  ;;  %v658_v14 = vsel %vm650_vm4, %v637_v46, %v640_v2 }
  0x9c   :  { %v600_v48 = vsub.s32 4, %v576_v52  ;;  %v659_v51 = vsel %vm653_vm7, %v646_v10, 920167782  ;;  %v662_v41 = vsel %vm650_vm4, %v640_v2, %v643_v45  ;;  %v663_v33 = vsel %vm653_vm7, %v649_v61, 1326507024 }
  0x9d   :  { %v8056_v49 = vsub.s32 %v574_v47, %v577_v50  ;;  %v656_v7 = vsel %vm652_vm8, %v640_v2, %v655_v63  ;;  %v660_v4 = vsel %vm652_vm8, %v643_v45, %v659_v51  ;;  %v664_v31 = vsel %vm652_vm8, %v646_v10, %v663_v33 }
  0x9e   :  { %v661_v36 = vsel %vm651_vm6, %v658_v14, %v660_v4  ;;  %v665_v25 = vsel %vm651_vm6, %v662_v41, %v664_v31  ;;  %v504_v22 = vand.u32 3, %v503_v42  ;;  %vm516_vm3 = vcmp.lt.s32.totalorder %v7654_v40, 0 }
  0x9f   :  { %v580_v46 = vsub.s32 0, %v8056_v49  ;;  %v8064_v27 = vmul.u32.u64.low %v8021_v13, %v665_v25  ;;  %v8065_v29 = vmul.u32.u64.high %v8021_v13, %v665_v25, %v8064_v27  ;;  %v657_v47 = vsel %vm651_vm6, %v654_v1, %v656_v7 }
  0xa0   :  { %v8071_v2 = vmul.u32.u64.low %v8021_v13, %v661_v36  ;;  %v8072_v45 = vmul.u32.u64.high %v8021_v13, %v661_v36, %v8071_v2  ;;  %v601_v42 = vsel %vm516_vm3, %v600_v48, %v576_v52  ;;  %v725_v55 = vand.u32 2139095040, %v8025_v23 }
  0xa1   :  { %v6917_v10 = vmin.u32 %v580_v46, %v8056_v49  ;;  %vm502_vm5 = vweird.f32 %v7570_v44  ;;  %vm8081_vm11 = vcmp.le.f32.partialorder %v514_v3, 0.7853982  ;;  %v11182_v16 = vand.u32 2147483647, %v8025_v23 }
  0xa2   :  { %vm505_vm12 = vcmp.lt.s32.totalorder %v504_v22, 2  ;;  %vm509_vm13 = vcmp.eq.s32.totalorder %v504_v22, 2  ;;  %v673_v50 = vmul.u32 %v8021_v13, %v657_v47  ;;  %v8091_v52 = vsel %vm8081_vm11, 0, %v601_v42 }
  0xa3   :  { %v582_v63 = vclz %v6917_v10  ;;  %vm675_vm14 = vc.u32 %v8065_v29, %v8071_v2  ;;  %v676_v3 = vadd.s32 1, %v8072_v45  ;;  %v726_v14 = vshrl.u32 %v725_v55, 23 }
  0xa4   :  { %v8087_v1 = vpop.eup %7362  ;;  %vm506_vm0 = vcmp.eq.s32.totalorder %v504_v22, 0  ;;  %v570_v41 = vadd.s32 %v7989_v26, %v8005_v9  ;;  %v729_v31 = vand.u32 8388607, %v11182_v16  ;;  %v607_v25 = vadd.s32 3, %v8091_v52 }
  0xa5   :  { %v8095_v48 = vpop.eup %7364  ;;  %v11177_v51 = vxor.u32 2147483648, %v8087_v1  ;;  %v6918_v13 = vadd.s32 4294967294, %v582_v63  ;;  %v677_v7 = vsel %vm675_vm14, %v676_v3, %v8072_v45  ;;  %v6924_v4 = vadd.s32 4294967169, %v726_v14 }
  0xa6   :  { %v11179_v33 = vxor.u32 2147483648, %v8095_v48  ;;  %v678_v46 = vadd.s32 %v677_v7, %v673_v50  ;;  %v8114_v47 = vmul.f32 %v7647_v37, %v7540_v17  ;;  %v730_v3 = vor.u32 8388608, %v729_v31 }
  0xa7   :  { %v511_v36 = vsel %vm509_vm13, %v11177_v51, %v8095_v48  ;;  %vm6919_vm1 = vcmp.lt.s32.totalorder %v6918_v13, 0  ;;  %v732_v27 = vadd.s32 1, %v6924_v4  ;;  %vm620_vm4 = vcmp.lt.s32.totalorder %v7883_v57, 0 }
  0xa8   :  { %v508_v26 = vsel %vm506_vm0, %v8087_v1, %v11179_v33  ;;  %v585_v9 = vsel %vm6919_vm1, 0, %v6918_v13  ;;  %v679_v50 = vadd.s32 536870912, %v678_v46  ;;  %v8128_v31 = vand.u32 3, %v7712_v59 }
  0xa9   :  { %v512_v45 = vsel %vm505_vm12, %v508_v26, %v511_v36  ;;  %v586_v10 = vsub.s32 32, %v585_v9  ;;  %v587_v42 = vshll.u32 %v8056_v49, %v585_v9  ;;  %v590_v55 = vsub.s32 4294967266, %v585_v9 }
  0xaa   :  { %v513_v63 = vsel %vm502_vm5, nan, %v512_v45  ;;  %vm733_vm2 = vcmp.gt.s32.totalorder %v732_v27, 0  ;;  %v680_v22 = vshrl.u32 %v679_v50, 30  ;;  %v11178_v49 = vand.u32 2147483647, %v8114_v47 }
  0xab   :  { %933 = vst [vmem:[%s11174_s1 + $0x18] sm:$0x3] %v513_v63  ;;  %v588_v14 = vshrl.u32 %v570_v41, %v586_v10  ;;  %v591_v13 = vadd.s32 127, %v590_v55  ;;  %v734_v37 = vsel %vm733_vm2, %v732_v27, 0  ;;  %v8125_v26 = vand.u32 3, %v607_v25 }
  0xac   :  { %v736_v7 = vand.u32 31, %v734_v37  ;;  %v8131_v9 = vadd.s32 %v8071_v2, %v8065_v29  ;;  %v681_v45 = vshll.u32 %v680_v22, 30  ;;  %v8133_v10 = vshll.u32 %v730_v3, 8 }
  0xad   :  { %v589_v4 = vor.u32 %v588_v14, %v587_v42  ;;  %v592_v36 = vshll.u32 %v591_v13, 23  ;;  %v704_v63 = vsub.s32 4, %v680_v22  ;;  %v829_v50 = vand.u32 2139095040, %v8114_v47 }
  0xae   :  { %v737_v41 = vsub.s32 32, %v736_v7  ;;  %v8136_v51 = vsub.s32 %v678_v46, %v681_v45  ;;  %v735_v42 = vshrl.u32 %v734_v37, 5  ;;  %v739_v25 = vshll.u32 %v11198_v54, %v736_v7 }
  0xaf   :  { %v593_v27 = vor.u32 4788187, %v592_v36  ;;  %v596_v55 = vcvt.s32.f32 %v589_v4  ;;  %v8141_v59 = vand.u32 8388607, %v11178_v49  ;;  %v742_v3 = vshll.u32 %v11187_v56, %v736_v7 }
  0xb0   :  { %v740_v2 = vshrl.u32 %v11187_v56, %v737_v41  ;;  %v743_v14 = vshrl.u32 %v11185_v58, %v737_v41  ;;  %v684_v13 = vsub.s32 0, %v8136_v51  ;;  %v745_v4 = vshll.u32 %v11185_v58, %v736_v7 }
  0xb1   :  { %v594_v29 = vand.u32 2147483647, %v593_v27  ;;  %v746_v46 = vshrl.u32 %v11183_v60, %v737_v41  ;;  %v748_v37 = vshll.u32 %v11183_v60, %v736_v7  ;;  %v705_v45 = vsel %vm620_vm4, %v704_v63, %v680_v22 }
  0xb2   :  { %v749_v27 = vshrl.u32 %v7510_v62, %v737_v41  ;;  %v830_v49 = vshrl.u32 %v829_v50, 23  ;;  %vm8155_vm6 = vcmp.le.f32.partialorder %v618_v38, 0.7853982  ;;  %v6921_v15 = vmin.u32 %v684_v13, %v8136_v51 }
  0xb3   :  { %v597_v36 = vmul.f32 %v596_v55, %v594_v29  ;;  %v738_v24 = vshrl.u32 %v11198_v54, %v737_v41  ;;  %v751_v16 = vshll.u32 %v7510_v62, %v736_v7  ;;  %v752_v55 = vshrl.u32 %v11211_v8, %v737_v41 }
  0xb4   :  { %v741_v60 = vor.u32 %v740_v2, %v739_v25  ;;  %v744_v22 = vor.u32 %v743_v14, %v742_v3  ;;  %v750_v63 = vor.u32 %v749_v27, %v748_v37  ;;  %v686_v58 = vclz %v6921_v15 }
  0xb5   :  { %v598_v29 = vxor.u32 2147483648, %v597_v36  ;;  %v747_v50 = vor.u32 %v746_v46, %v745_v4  ;;  %vm754_vm7 = vcmp.lt.s32.totalorder %v735_v42, 1  ;;  %vm755_vm8 = vcmp.lt.s32.totalorder %v735_v42, 2 }
  0xb6   :  { %v753_v56 = vor.u32 %v752_v55, %v751_v16  ;;  %vm756_vm12 = vcmp.lt.s32.totalorder %v735_v42, 3  ;;  %vm757_vm13 = vcmp.lt.s32.totalorder %v735_v42, 4  ;;  %v6922_v13 = vadd.s32 4294967294, %v686_v58 }
  0xb7   :  { %v599_v38 = vsel %vm516_vm3, %v598_v29, %v597_v36  ;;  %v758_v41 = vsel %vm754_vm7, %v738_v24, %v741_v60  ;;  %v759_v25 = vsel %vm757_vm13, %v747_v50, 2102212464  ;;  %v762_v2 = vsel %vm754_vm7, %v741_v60, %v744_v22 }
  0xb8   :  { %v602_v7 = vsel %vm8081_vm11, %v7654_v40, %v599_v38  ;;  %v760_v15 = vsel %vm756_vm12, %v744_v22, %v759_v25  ;;  %v763_v3 = vsel %vm757_vm13, %v750_v63, 920167782  ;;  %vm6923_vm3 = vcmp.lt.s32.totalorder %v6922_v13, 0 }
  0xb9   :  { %7366 = vcosq.f32 %v602_v7  ;;  %v761_v16 = vsel %vm755_vm8, %v758_v41, %v760_v15  ;;  %v764_v14 = vsel %vm756_vm12, %v747_v50, %v763_v3  ;;  %v689_v61 = vsel %vm6923_vm3, 0, %v6922_v13 }
  0xba   :  { %7368 = vsinq.f32 %v602_v7  ;;  %v765_v58 = vsel %vm755_vm8, %v762_v2, %v764_v14  ;;  %v766_v24 = vsel %vm754_vm7, %v744_v22, %v747_v50  ;;  %v767_v4 = vsel %vm757_vm13, %v753_v56, 1326507024 }
  0xbb   :  { %vm610_vm11 = vcmp.eq.s32.totalorder %v8125_v26, 0  ;;  %v690_v46 = vsub.s32 32, %v689_v61  ;;  %v691_v60 = vshll.u32 %v8136_v51, %v689_v61  ;;  %v694_v37 = vsub.s32 4294967266, %v689_v61 }
  0xbc   :  { %v768_v36 = vsel %vm756_vm12, %v750_v63, %v767_v4  ;;  %v8183_v27 = vsel %vm8155_vm6, 0, %v705_v45  ;;  %v8187_v29 = vmul.u32.u64.low %v8133_v10, %v765_v58  ;;  %v8188_v38 = vmul.u32.u64.high %v8133_v10, %v765_v58, %v8187_v29 }
  0xbd   :  { %v769_v55 = vsel %vm755_vm8, %v766_v24, %v768_v36  ;;  %vm606_vm14 = vweird.f32 %v7654_v40  ;;  %v692_v56 = vshrl.u32 %v8131_v9, %v690_v46  ;;  %v695_v22 = vadd.s32 127, %v694_v37 }
  0xbe   :  { %v8194_v51 = vmul.u32.u64.low %v8133_v10, %v769_v55  ;;  %v8195_v50 = vmul.u32.u64.high %v8133_v10, %v769_v55, %v8194_v51  ;;  %v777_v63 = vmul.u32 %v8133_v10, %v761_v16  ;;  %v6928_v45 = vadd.s32 4294967169, %v830_v49 }
  0xbf   :  { %vm1032_vm0 = vcmp.lt.s32.totalorder %v8128_v31, 2  ;;  %vm1033_vm1 = vcmp.eq.s32.totalorder %v8128_v31, 0  ;;  %v693_v42 = vor.u32 %v692_v56, %v691_v60  ;;  %v696_v7 = vshll.u32 %v695_v22, 23 }
  0xc0   :  { %v1035_v13 = vsel %vm1033_vm1, %v7831_v53, %v195_v39  ;;  %vm1036_vm2 = vcmp.eq.s32.totalorder %v8128_v31, 2  ;;  %vm613_vm7 = vcmp.eq.s32.totalorder %v8125_v26, 2  ;;  %v780_v9 = vadd.s32 1, %v8188_v38 }
  0xc1   :  { %v836_v41 = vadd.s32 1, %v6928_v45  ;;  %v1038_v49 = vsel %vm1036_vm2, %v198_v30, %v7840_v28  ;;  %v697_v10 = vor.u32 4788187, %v696_v7  ;;  %v700_v25 = vcvt.s32.f32 %v693_v42 }
  0xc2   :  { %v711_v15 = vadd.s32 3, %v8183_v27  ;;  %vm779_vm8 = vc.u32 %v8195_v50, %v8187_v29  ;;  %v834_v3 = vor.u32 8388608, %v8141_v59  ;;  %v1039_v16 = vsel %vm1032_vm0, %v1035_v13, %v1038_v49 }
  0xc3   :  { %v8212_v2 = vpop.eup %7366  ;;  %v781_v39 = vsel %vm779_vm8, %v780_v9, %v8188_v38  ;;  %vm837_vm12 = vcmp.gt.s32.totalorder %v836_v41, 0  ;;  %v698_v28 = vand.u32 2147483647, %v697_v10  ;;  %vm609_vm13 = vcmp.lt.s32.totalorder %v8125_v26, 2 }
  0xc4   :  { %v8218_v14 = vpop.eup %7368  ;;  %v614_v53 = vxor.u32 2147483648, %v8212_v2  ;;  %v782_v30 = vadd.s32 %v781_v39, %v777_v63  ;;  %v838_v61 = vsel %vm837_vm12, %v836_v41, 0  ;;  %v1040_v4 = vsel %vm190_vm9, nan, %v1039_v16 }
  0xc5   :  { %v611_v58 = vxor.u32 2147483648, %v8218_v14  ;;  %v840_v24 = vand.u32 31, %v838_v61  ;;  %v701_v59 = vmul.f32 %v700_v25, %v698_v28  ;;  %v8230_v46 = vand.u32 3, %v711_v15  ;;  %6964 = vst [vmem:[%s11174_s1 + $0x80] sm:$0xff] %v1040_v4 }
  0xc6   :  { %v615_v31 = vsel %vm613_vm7, %v614_v53, %v8218_v14  ;;  %v783_v60 = vadd.s32 536870912, %v782_v30  ;;  %vm724_vm9 = vcmp.lt.s32.totalorder %v8025_v23, 0  ;;  %v8241_v37 = vshrl.u32 %v838_v61, 5 }
  0xc7   :  { %v612_v20 = vsel %vm610_vm11, %v8212_v2, %v611_v58  ;;  %v841_v36 = vsub.s32 32, %v840_v24  ;;  %v8243_v55 = vshll.u32 %v834_v3, 8  ;;  %v702_v56 = vxor.u32 2147483648, %v701_v59 }
  0xc8   :  { %v616_v38 = vsel %vm609_vm13, %v612_v20, %v615_v31  ;;  %v784_v22 = vshrl.u32 %v783_v60, 30  ;;  %v843_v51 = vshll.u32 %v11198_v54, %v840_v24  ;;  %v11237_v45 = vmov 2475754826  }
  0xc9   :  { %v617_v63 = vsel %vm606_vm14, nan, %v616_v38  ;;  %v844_v42 = vshrl.u32 %v11237_v45, %v841_v36  ;;  %v846_v26 = vshll.u32 %v11237_v45, %v840_v24  ;;  %v11238_v7 = vmov 2131351028  }
  0xca   :  { %v847_v13 = vshrl.u32 %v11238_v7, %v841_v36  ;;  %934 = vst [vmem:[%s11174_s1 + $0x100] sm:$0xff] %v617_v63  ;;  %v703_v9 = vsel %vm620_vm4, %v702_v56, %v701_v59  ;;  %v11239_v41 = vand.u32 2147483647, %v8025_v23  ;;  %v785_v10 = vshll.u32 %v784_v22, 30 }
  0xcb   :  { %v849_v25 = vshll.u32 %v11238_v7, %v840_v24  ;;  %v11242_v15 = vmov 2102212464   ;;  %v706_v3 = vsel %vm8155_vm6, %v7883_v57, %v703_v9  ;;  %v842_v16 = vshrl.u32 %v11198_v54, %v841_v36 }
  0xcc   :  { %vm8258_vm3 = vcmp.le.f32.partialorder %v11239_v41, 0.7853982  ;;  %v850_v39 = vshrl.u32 %v11242_v15, %v841_v36  ;;  %v852_v28 = vshll.u32 %v11242_v15, %v840_v24  ;;  %v8270_v61 = vand.u32 3, %v7759_v0 }
  0xcd   :  { %7370 = vcosq.f32 %v706_v3  ;;  %v8272_v4 = vsub.s32 %v782_v30, %v785_v10  ;;  %v808_v31 = vsub.s32 4, %v784_v22  ;;  %v845_v59 = vor.u32 %v844_v42, %v843_v51 }
  0xce   :  { %7372 = vsinq.f32 %v706_v3  ;;  %v848_v60 = vor.u32 %v847_v13, %v846_v26  ;;  %v853_v20 = vshrl.u32 %v7510_v62, %v841_v36  ;;  %v855_v38 = vshll.u32 %v7510_v62, %v840_v24 }
  0xcf   :  { %vm717_vm4 = vcmp.eq.s32.totalorder %v8230_v46, 2  ;;  %v788_v33 = vsub.s32 0, %v8272_v4  ;;  %v851_v56 = vor.u32 %v850_v39, %v849_v25  ;;  %v856_v63 = vshrl.u32 %v11211_v8, %v841_v36 }
  0xd0   :  { %vm858_vm6 = vcmp.lt.s32.totalorder %v8241_v37, 1  ;;  %vm714_vm11 = vcmp.eq.s32.totalorder %v8230_v46, 0  ;;  %v778_v0 = vadd.s32 %v8187_v29, %v8195_v50  ;;  %v854_v30 = vor.u32 %v853_v20, %v852_v28 }
  0xd1   :  { %vm861_vm0 = vcmp.lt.s32.totalorder %v8241_v37, 4  ;;  %vm1136_vm1 = vcmp.eq.s32.totalorder %v8270_v61, 0  ;;  %vm713_vm2 = vcmp.lt.s32.totalorder %v8230_v46, 2  ;;  %v6925_v24 = vmin.u32 %v788_v33, %v8272_v4 }
  0xd2   :  { %v809_v51 = vsel %vm724_vm9, %v808_v31, %v784_v22  ;;  %v857_v36 = vor.u32 %v856_v63, %v855_v38  ;;  %vm860_vm7 = vcmp.lt.s32.totalorder %v8241_v37, 3  ;;  %vm710_vm8 = vweird.f32 %v7883_v57 }
  0xd3   :  { %vm859_vm12 = vcmp.lt.s32.totalorder %v8241_v37, 2  ;;  %v863_v29 = vsel %vm861_vm0, %v851_v56, 2102212464  ;;  %v866_v50 = vsel %vm858_vm6, %v845_v59, %v848_v60  ;;  %v867_v42 = vsel %vm861_vm0, %v854_v30, 920167782 }
  0xd4   :  { %v790_v26 = vclz %v6925_v24  ;;  %v862_v22 = vsel %vm858_vm6, %v842_v16, %v845_v59  ;;  %v870_v13 = vsel %vm858_vm6, %v848_v60, %v851_v56  ;;  %vm1135_vm13 = vcmp.lt.s32.totalorder %v8270_v61, 2 }
  0xd5   :  { %v8305_v9 = vsel %vm8258_vm3, 0, %v809_v51  ;;  %v864_v41 = vsel %vm860_vm7, %v848_v60, %v863_v29  ;;  %v868_v10 = vsel %vm860_vm7, %v851_v56, %v867_v42  ;;  %v871_v25 = vsel %vm861_vm0, %v857_v36, 1326507024 }
  0xd6   :  { %v6926_v39 = vadd.s32 4294967294, %v790_v26  ;;  %v869_v3 = vsel %vm859_vm12, %v866_v50, %v868_v10  ;;  %v872_v16 = vsel %vm860_vm7, %v854_v30, %v871_v25  ;;  %v11243_v28 = vxor.u32 2147483648, %v7899_v12 }
  0xd7   :  { %v865_v59 = vsel %vm859_vm12, %v862_v22, %v864_v41  ;;  %v873_v60 = vsel %vm859_vm12, %v870_v13, %v872_v16  ;;  %v8327_v20 = vmul.u32.u64.low %v8243_v55, %v869_v3  ;;  %v8328_v38 = vmul.u32.u64.high %v8243_v55, %v869_v3, %v8327_v20  ;;  %v8331_v33 = vpop.eup %7370 }
  0xd8   :  { %v1138_v31 = vsel %vm1136_vm1, %v7896_v11, %v11243_v28  ;;  %vm6927_vm6 = vcmp.lt.s32.totalorder %v6926_v39, 0  ;;  %v8334_v56 = vmul.u32.u64.low %v8243_v55, %v873_v60  ;;  %v8335_v63 = vmul.u32.u64.high %v8243_v55, %v873_v60, %v8334_v56  ;;  %v8338_v30 = vpop.eup %7372 }
  0xd9   :  { %vm1139_vm0 = vcmp.eq.s32.totalorder %v8270_v61, 2  ;;  %v718_v24 = vxor.u32 2147483648, %v8331_v33  ;;  %v793_v37 = vsel %vm6927_vm6, 0, %v6926_v39  ;;  %v11244_v51 = vxor.u32 2147483648, %v7896_v11 }
  0xda   :  { %v1237_v29 = vand.u32 3, %v7892_v43  ;;  %v715_v50 = vxor.u32 2147483648, %v8338_v30  ;;  %v794_v42 = vsub.s32 32, %v793_v37  ;;  %v795_v26 = vshll.u32 %v8272_v4, %v793_v37 }
  0xdb   :  { %v1141_v36 = vsel %vm1139_vm0, %v11244_v51, %v7899_v12  ;;  %v798_v22 = vsub.s32 4294967266, %v793_v37  ;;  %v719_v13 = vsel %vm717_vm4, %v718_v24, %v8338_v30  ;;  %v881_v41 = vmul.u32 %v8243_v55, %v865_v59 }
  0xdc   :  { %v884_v10 = vadd.s32 1, %v8328_v38  ;;  %v1142_v11 = vsel %vm1135_vm13, %v1138_v31, %v1141_v36  ;;  %v716_v43 = vsel %vm714_vm11, %v8331_v33, %v715_v50  ;;  %v796_v12 = vshrl.u32 %v778_v0, %v794_v42 }
  0xdd   :  { %v799_v4 = vadd.s32 127, %v798_v22  ;;  %vm1238_vm1 = vcmp.lt.s32.totalorder %v1237_v29, 2  ;;  %v720_v25 = vsel %vm713_vm2, %v716_v43, %v719_v13  ;;  %vm883_vm4 = vc.u32 %v8335_v63, %v8327_v20 }
  0xde   :  { %v1143_v55 = vsel %vm294_vm15, nan, %v1142_v11  ;;  %vm1239_vm7 = vcmp.eq.s32.totalorder %v1237_v29, 0  ;;  %v721_v61 = vsel %vm710_vm8, nan, %v720_v25  ;;  %v797_v39 = vor.u32 %v796_v12, %v795_v26  ;;  %v1772_v11 = vld [vmem:[#allocation2 + $0x1] ss:$4 sm:$0x3] }
  0xdf   :  { %v800_v3 = vshll.u32 %v799_v4, 23  ;;  %v885_v16 = vsel %vm883_vm4, %v884_v10, %v8328_v38  ;;  %6965 = vst [vmem:[%s11174_s1 + $0x88] sm:$0xff] %v1143_v55  ;;  %935 = vst [vmem:[%s11174_s1 + $0x108] sm:$0xff] %v721_v61  ;;  %v11245_v21 = vxor.u32 2147483648, %v7981_v32  ;;  %vm1242_vm15 = vcmp.eq.s32.totalorder %v1237_v29, 2 }
  0xe0   :  { %v886_v46 = vadd.s32 %v885_v16, %v881_v41  ;;  %v1340_v28 = vand.u32 3, %v7965_v35  ;;  %v804_v59 = vcvt.s32.f32 %v797_v39  ;;  %v11246_v60 = vxor.u32 2147483648, %v7976_v34 }
  0xe1   :  { %v1241_v0 = vsel %vm1239_vm7, %v7976_v34, %v11245_v21  ;;  %v801_v31 = vor.u32 4788187, %v800_v3  ;;  %v1443_v56 = vand.u32 3, %v8091_v52  ;;  %v11247_v26 = vxor.u32 2147483648, %v8095_v48 }
  0xe2   :  { %v1244_v38 = vsel %vm1242_vm15, %v11246_v60, %v7981_v32  ;;  %v887_v37 = vadd.s32 536870912, %v886_v46  ;;  %vm1341_vm11 = vcmp.lt.s32.totalorder %v1340_v28, 2  ;;  %vm1342_vm2 = vcmp.eq.s32.totalorder %v1340_v28, 0 }
  0xe3   :  { %v1245_v51 = vsel %vm1238_vm1, %v1241_v0, %v1244_v38  ;;  %v802_v36 = vand.u32 2147483647, %v801_v31  ;;  %v1344_v35 = vsel %vm1342_vm2, %v8087_v1, %v11247_v26  ;;  %vm1345_vm12 = vcmp.eq.s32.totalorder %v1340_v28, 2 }
  0xe4   :  { %v1246_v42 = vsel %vm398_vm10, nan, %v1245_v51  ;;  %v888_v22 = vshrl.u32 %v887_v37, 30  ;;  %v11248_v34 = vxor.u32 2147483648, %v8087_v1  ;;  %vm1444_vm13 = vcmp.lt.s32.totalorder %v1443_v56, 2 }
  0xe5   :  { %6966 = vst [vmem:[%s11174_s1 + $0x90] sm:$0x3] %v1246_v42  ;;  %vm1445_vm6 = vcmp.eq.s32.totalorder %v1443_v56, 0  ;;  %v805_v52 = vmul.f32 %v804_v59, %v802_v36  ;;  %vm1448_vm10 = vcmp.eq.s32.totalorder %v1443_v56, 2  ;;  %v1546_v43 = vand.u32 3, %v8183_v27 }
  0xe6   :  { %v1347_v32 = vsel %vm1345_vm12, %v11248_v34, %v8095_v48  ;;  %v1447_v19 = vsel %vm1445_vm6, %v8212_v2, %v611_v58  ;;  %v889_v13 = vshll.u32 %v888_v22, 30  ;;  %v1450_v10 = vsel %vm1448_vm10, %v614_v53, %v8218_v14 }
  0xe7   :  { %v1348_v29 = vsel %vm1341_vm11, %v1344_v35, %v1347_v32  ;;  %v806_v1 = vxor.u32 2147483648, %v805_v52  ;;  %v1451_v48 = vsel %vm1444_vm13, %v1447_v19, %v1450_v10  ;;  %v815_v58 = vadd.s32 3, %v8305_v9 }
  0xe8   :  { %v1349_v41 = vsel %vm502_vm5, nan, %v1348_v29  ;;  %v890_v12 = vsub.s32 %v886_v46, %v889_v13  ;;  %v1452_v44 = vsel %vm606_vm14, nan, %v1451_v48  ;;  %v912_v2 = vsub.s32 4, %v888_v22 }
  0xe9   :  { %6967 = vst [vmem:[%s11174_s1 + $0x98] sm:$0x3] %v1349_v41  ;;  %v807_v4 = vsel %vm724_vm9, %v806_v1, %v805_v52  ;;  %6968 = vst [vmem:[%s11174_s1 + $0x180] sm:$0xff] %v1452_v44  ;;  %vm1548_vm5 = vcmp.eq.s32.totalorder %v1546_v43, 0  ;;  %v8417_v14 = vrot.slane %v1772_v11, %v7534_v5  ;;  %vm1547_vm0 = vcmp.lt.s32.totalorder %v1546_v43, 2 }
  0xea   :  { %v810_v27 = vsel %vm8258_vm3, %v8025_v23, %v807_v4  ;;  %v892_v53 = vsub.s32 0, %v890_v12  ;;  %v1550_v40 = vsel %vm1548_vm5, %v8331_v33, %v715_v50  ;;  %vm1551_vm14 = vcmp.eq.s32.totalorder %v1546_v43, 2 }
  0xeb   :  { %7374 = vcosq.f32 %v810_v27  ;;  %vm828_vm9 = vcmp.lt.s32.totalorder %v8114_v47, 0  ;;  %v1553_v55 = vsel %vm1551_vm14, %v718_v24, %v8338_v30  ;;  %v816_v61 = vand.u32 3, %v815_v58 }
  0xec   :  { %7376 = vsinq.f32 %v810_v27  ;;  %v6929_v25 = vmin.u32 %v892_v53, %v890_v12  ;;  %v913_v49 = vsel %vm828_vm9, %v912_v2, %v888_v22  ;;  %v1554_v39 = vsel %vm1547_vm0, %v1550_v40, %v1553_v55 }
  0xed   :  { %v8433_v3 = vmul.f32 %v8417_v14, %v7542_v18  ;;  %v11249_v16 = vand.u32 2147483647, %v8114_v47  ;;  %v1555_v33 = vsel %vm710_vm8, nan, %v1554_v39  ;;  %vm814_vm1 = vweird.f32 %v8025_v23 }
  0xee   :  { %v894_v50 = vclz %v6929_v25  ;;  %6969 = vst [vmem:[%s11174_s1 + $0x188] sm:$0xff] %v1555_v33  ;;  %vm817_vm4 = vcmp.lt.s32.totalorder %v816_v61, 2  ;;  %vm818_vm7 = vcmp.eq.s32.totalorder %v816_v61, 0  ;;  %v1649_v28 = vand.u32 3, %v8305_v9 }
  0xef   :  { %vm8437_vm3 = vcmp.le.f32.partialorder %v11249_v16, 0.7853982  ;;  %v1805_v21 = vand.u32 2147483647, %v8433_v3  ;;  %v1808_v0 = vand.u32 2139095040, %v8433_v3  ;;  %v8453_v57 = vrot.slane %v1772_v11, %v7536_v6 }
  0xf0   :  { %v6930_v30 = vadd.s32 4294967294, %v894_v50  ;;  %v915_v24 = vsel %vm8437_vm3, 0, %v913_v49  ;;  %vm821_vm8 = vcmp.eq.s32.totalorder %v816_v61, 2  ;;  %v882_v31 = vadd.s32 %v8327_v20, %v8335_v63 }
  0xf1   :  { %v1809_v59 = vshrl.u32 %v1808_v0, 23  ;;  %v919_v38 = vadd.s32 3, %v915_v24  ;;  %v1812_v56 = vand.u32 8388607, %v1805_v21  ;;  %v8461_v37 = vmul.f32 %v8453_v57, %v7542_v18 }
  0xf2   :  { %vm6931_vm15 = vcmp.lt.s32.totalorder %v6930_v30, 0  ;;  %vm1650_vm11 = vcmp.lt.s32.totalorder %v1649_v28, 2  ;;  %vm1651_vm2 = vcmp.eq.s32.totalorder %v1649_v28, 0  ;;  %vm1654_vm12 = vcmp.eq.s32.totalorder %v1649_v28, 2 }
  0xf3   :  { %v897_v60 = vsel %vm6931_vm15, 0, %v6930_v30  ;;  %v6972_v42 = vadd.s32 4294967169, %v1809_v59  ;;  %v1912_v20 = vand.u32 2139095040, %v8461_v37  ;;  %v1813_v29 = vor.u32 8388608, %v1812_v56 }
  0xf4   :  { %v898_v51 = vsub.s32 32, %v897_v60  ;;  %v899_v9 = vshll.u32 %v890_v12, %v897_v60  ;;  %v902_v36 = vsub.s32 4294967266, %v897_v60  ;;  %v1909_v19 = vand.u32 2147483647, %v8461_v37 }
  0xf5   :  { %v7375_v26 = vpop.eup %7374  ;;  %v1815_v32 = vadd.s32 1, %v6972_v42  ;;  %v1913_v13 = vshrl.u32 %v1912_v20, 23  ;;  %v8472_v53 = vand.u32 3, %v919_v38  ;;  %v8482_v61 = vand.u32 3, %v915_v24 }
  0xf6   :  { %v7377_v63 = vpop.eup %7376  ;;  %v822_v35 = vxor.u32 2147483648, %v7375_v26  ;;  %v900_v22 = vshrl.u32 %v882_v31, %v898_v51  ;;  %v903_v34 = vadd.s32 127, %v902_v36  ;;  %v8484_v50 = vshll.u32 %v1813_v29, 8 }
  0xf7   :  { %v819_v52 = vxor.u32 2147483648, %v7377_v63  ;;  %vm1816_vm13 = vcmp.gt.s32.totalorder %v1815_v32, 0  ;;  %v6976_v58 = vadd.s32 4294967169, %v1913_v13  ;;  %v1916_v23 = vand.u32 8388607, %v1909_v19 }
  0xf8   :  { %v823_v41 = vsel %vm821_vm8, %v822_v35, %v7377_v63  ;;  %v901_v10 = vor.u32 %v900_v22, %v899_v9  ;;  %v904_v11 = vshll.u32 %v903_v34, 23  ;;  %v1656_v1 = vsel %vm1654_vm12, %v822_v35, %v7377_v63 }
  0xf9   :  { %v820_v48 = vsel %vm818_vm7, %v7375_v26, %v819_v52  ;;  %v1653_v43 = vsel %vm1651_vm2, %v7375_v26, %v819_v52  ;;  %v1817_v25 = vsel %vm1816_vm13, %v1815_v32, 0  ;;  %v1919_v16 = vadd.s32 1, %v6976_v58 }
  0xfa   :  { %v824_v12 = vsel %vm817_vm4, %v820_v48, %v823_v41  ;;  %v905_v44 = vor.u32 4788187, %v904_v11  ;;  %v908_v4 = vcvt.s32.f32 %v901_v10  ;;  %v1657_v2 = vsel %vm1650_vm11, %v1653_v43, %v1656_v1 }
  0xfb   :  { %v825_v27 = vsel %vm814_vm1, nan, %v824_v12  ;;  %v1658_v40 = vsel %vm814_vm1, nan, %v1657_v2  ;;  %v1818_v49 = vshrl.u32 %v1817_v25, 5  ;;  %v1819_v39 = vand.u32 31, %v1817_v25 }
  0xfc   :  { %936 = vst [vmem:[%s11174_s1 + $0x110] sm:$0x3] %v825_v27  ;;  %v906_v55 = vand.u32 2147483647, %v905_v44  ;;  %6970 = vst [vmem:[%s11174_s1 + $0x190] sm:$0x3] %v1658_v40  ;;  %v8490_v33 = vmul.f32 %v8417_v14, %v7540_v17  ;;  %vm918_vm1 = vweird.f32 %v8114_v47 }
  0xfd   :  { %v1820_v0 = vsub.s32 32, %v1819_v39  ;;  %v1822_v28 = vshll.u32 %v11198_v54, %v1819_v39  ;;  %v1825_v31 = vshll.u32 %v11237_v45, %v1819_v39  ;;  %v1828_v24 = vshll.u32 %v11238_v7, %v1819_v39 }
  0xfe   :  { %v909_v30 = vmul.f32 %v908_v4, %v906_v55  ;;  %v1831_v59 = vshll.u32 %v11242_v15, %v1819_v39  ;;  %v1834_v60 = vshll.u32 %v7510_v62, %v1819_v39  ;;  %vm1837_vm6 = vcmp.lt.s32.totalorder %v1818_v49, 1 }
  0xff   :  { %v1821_v56 = vshrl.u32 %v11198_v54, %v1820_v0  ;;  %v1823_v51 = vshrl.u32 %v11237_v45, %v1820_v0  ;;  %v1826_v14 = vshrl.u32 %v11238_v7, %v1820_v0  ;;  %v1829_v9 = vshrl.u32 %v11242_v15, %v1820_v0 }
 0x100   :  { %v910_v38 = vxor.u32 2147483648, %v909_v30  ;;  %v1832_v36 = vshrl.u32 %v7510_v62, %v1820_v0  ;;  %v1835_v42 = vshrl.u32 %v11211_v8, %v1820_v0  ;;  %vm1838_vm10 = vcmp.lt.s32.totalorder %v1818_v49, 2 }
 0x101   :  { %v1824_v20 = vor.u32 %v1823_v51, %v1822_v28  ;;  %v1827_v63 = vor.u32 %v1826_v14, %v1825_v31  ;;  %vm1839_vm5 = vcmp.lt.s32.totalorder %v1818_v49, 3  ;;  %v1830_v22 = vor.u32 %v1829_v9, %v1828_v24 }
 0x102   :  { %v911_v26 = vsel %vm828_vm9, %v910_v38, %v909_v30  ;;  %v1833_v34 = vor.u32 %v1832_v36, %v1831_v59  ;;  %v1836_v32 = vor.u32 %v1835_v42, %v1834_v60  ;;  %vm1840_vm0 = vcmp.lt.s32.totalorder %v1818_v49, 4 }
 0x103   :  { %v914_v35 = vsel %vm8437_vm3, %v8114_v47, %v911_v26  ;;  %v1841_v52 = vsel %vm1837_vm6, %v1821_v56, %v1824_v20  ;;  %v1845_v29 = vsel %vm1837_vm6, %v1824_v20, %v1827_v63  ;;  %v1842_v13 = vsel %vm1840_vm0, %v1830_v22, 2102212464 }
 0x104   :  { %7378 = vcosq.f32 %v914_v35  ;;  %v1846_v41 = vsel %vm1840_vm0, %v1833_v34, 920167782  ;;  %v1849_v10 = vsel %vm1837_vm6, %v1827_v63, %v1830_v22  ;;  %v1843_v11 = vsel %vm1839_vm5, %v1827_v63, %v1842_v13 }
 0x105   :  { %7380 = vsinq.f32 %v914_v35  ;;  %v1847_v1 = vsel %vm1839_vm5, %v1830_v22, %v1846_v41  ;;  %v1850_v46 = vsel %vm1840_vm0, %v1836_v32, 1326507024  ;;  %vm1920_vm14 = vcmp.gt.s32.totalorder %v1919_v16, 0 }
 0x106   :  { %vm922_vm9 = vcmp.eq.s32.totalorder %v8472_v53, 0  ;;  %v1848_v48 = vsel %vm1838_vm10, %v1845_v29, %v1847_v1  ;;  %v1851_v43 = vsel %vm1839_vm5, %v1833_v34, %v1850_v46  ;;  %v1917_v58 = vor.u32 8388608, %v1916_v23 }
 0x107   :  { %v1921_v12 = vsel %vm1920_vm14, %v1919_v16, 0  ;;  %vm921_vm3 = vcmp.lt.s32.totalorder %v8472_v53, 2  ;;  %v1844_v44 = vsel %vm1838_vm10, %v1841_v52, %v1843_v11  ;;  %v1852_v4 = vsel %vm1838_vm10, %v1849_v10, %v1851_v43 }
 0x108   :  { %v8520_v2 = vmul.u32.u64.low %v8484_v50, %v1848_v48  ;;  %v8521_v27 = vmul.u32.u64.high %v8484_v50, %v1848_v48, %v8520_v2  ;;  %vm925_vm4 = vcmp.eq.s32.totalorder %v8472_v53, 2  ;;  %v1923_v55 = vand.u32 31, %v1921_v12 }
 0x109   :  { %v8527_v40 = vmul.u32.u64.low %v8484_v50, %v1852_v4  ;;  %v8528_v25 = vmul.u32.u64.high %v8484_v50, %v1852_v4, %v8527_v40  ;;  %vm1753_vm7 = vcmp.lt.s32.totalorder %v8482_v61, 2  ;;  %vm1754_vm8 = vcmp.eq.s32.totalorder %v8482_v61, 0 }
 0x10a   :  { %vm1757_vm15 = vcmp.eq.s32.totalorder %v8482_v61, 2  ;;  %v2016_v49 = vand.u32 2139095040, %v8490_v33  ;;  %v1860_v39 = vmul.u32 %v8484_v50, %v1844_v44  ;;  %v8535_v23 = vshrl.u32 %v1921_v12, 5 }
 0x10b   :  { %v1924_v16 = vsub.s32 32, %v1923_v55  ;;  %v8537_v30 = vshll.u32 %v1917_v58, 8  ;;  %v1863_v0 = vadd.s32 1, %v8521_v27  ;;  %v1926_v28 = vshll.u32 %v11198_v54, %v1923_v55 }
 0x10c   :  { %v1929_v31 = vshll.u32 %v11237_v45, %v1923_v55  ;;  %v1932_v24 = vshll.u32 %v11238_v7, %v1923_v55  ;;  %vm1862_vm11 = vc.u32 %v8528_v25, %v8520_v2  ;;  %v1935_v50 = vshll.u32 %v11242_v15, %v1923_v55 }
 0x10d   :  { %v1927_v59 = vshrl.u32 %v11237_v45, %v1924_v16  ;;  %v1938_v60 = vshll.u32 %v7510_v62, %v1923_v55  ;;  %v1864_v56 = vsel %vm1862_vm11, %v1863_v0, %v8521_v27  ;;  %v1930_v51 = vshrl.u32 %v11238_v7, %v1924_v16 }
 0x10e   :  { %v7379_v38 = vpop.eup %7378  ;;  %v1933_v14 = vshrl.u32 %v11242_v15, %v1924_v16  ;;  %v1936_v9 = vshrl.u32 %v7510_v62, %v1924_v16  ;;  %v1865_v26 = vadd.s32 %v1864_v56, %v1860_v39  ;;  %v1939_v20 = vshrl.u32 %v11211_v8, %v1924_v16 }
 0x10f   :  { %v7381_v36 = vpop.eup %7380  ;;  %v926_v42 = vxor.u32 2147483648, %v7379_v38  ;;  %vm1941_vm2 = vcmp.lt.s32.totalorder %v8535_v23, 1  ;;  %v1925_v35 = vshrl.u32 %v11198_v54, %v1924_v16  ;;  %v1928_v22 = vor.u32 %v1927_v59, %v1926_v28 }
 0x110   :  { %v923_v63 = vxor.u32 2147483648, %v7381_v36  ;;  %v1931_v34 = vor.u32 %v1930_v51, %v1929_v31  ;;  %v1866_v29 = vadd.s32 536870912, %v1865_v26  ;;  %v1934_v13 = vor.u32 %v1933_v14, %v1932_v24 }
 0x111   :  { %v927_v32 = vsel %vm925_vm4, %v926_v42, %v7381_v36  ;;  %v1759_v52 = vsel %vm1757_vm15, %v926_v42, %v7381_v36  ;;  %v1937_v11 = vor.u32 %v1936_v9, %v1935_v50  ;;  %v1940_v1 = vor.u32 %v1939_v20, %v1938_v60 }
 0x112   :  { %v924_v41 = vsel %vm922_vm9, %v7379_v38, %v923_v63  ;;  %v1756_v10 = vsel %vm1754_vm8, %v7379_v38, %v923_v63  ;;  %v1867_v43 = vshrl.u32 %v1866_v29, 30  ;;  %vm1944_vm12 = vcmp.lt.s32.totalorder %v8535_v23, 4 }
 0x113   :  { %v928_v46 = vsel %vm921_vm3, %v924_v41, %v927_v32  ;;  %v1760_v48 = vsel %vm1753_vm7, %v1756_v10, %v1759_v52  ;;  %vm1943_vm13 = vcmp.lt.s32.totalorder %v8535_v23, 3  ;;  %v1946_v44 = vsel %vm1944_vm12, %v1934_v13, 2102212464 }
 0x114   :  { %v929_v58 = vsel %vm918_vm1, nan, %v928_v46  ;;  %v1761_v12 = vsel %vm918_vm1, nan, %v1760_v48  ;;  %v1868_v53 = vshll.u32 %v1867_v43, 30  ;;  %vm1942_vm6 = vcmp.lt.s32.totalorder %v8535_v23, 2 }
 0x115   :  { %937 = vst [vmem:[%s11174_s1 + $0x118] sm:$0x3] %v929_v58  ;;  %6971 = vst [vmem:[%s11174_s1 + $0x198] sm:$0x3] %v1761_v12  ;;  %v1949_v61 = vsel %vm1941_vm2, %v1928_v22, %v1931_v34  ;;  %v2017_v4 = vshrl.u32 %v2016_v49, 23  ;;  %v1945_v47 = vsel %vm1941_vm2, %v1925_v35, %v1928_v22  ;;  %v1953_v40 = vsel %vm1941_vm2, %v1931_v34, %v1934_v13 }
 0x116   :  { %v1950_v27 = vsel %vm1944_vm12, %v1937_v11, 920167782  ;;  %v1954_v55 = vsel %vm1944_vm12, %v1940_v1, 1326507024  ;;  %v1869_v39 = vsub.s32 %v1865_v26, %v1868_v53  ;;  %v1947_v16 = vsel %vm1943_vm13, %v1931_v34, %v1946_v44 }
 0x117   :  { %v1951_v0 = vsel %vm1943_vm13, %v1934_v13, %v1950_v27  ;;  %v1955_v28 = vsel %vm1943_vm13, %v1937_v11, %v1954_v55  ;;  %v1891_v31 = vsub.s32 4, %v1867_v43  ;;  %v2013_v38 = vand.u32 2147483647, %v8490_v33  ;;  %v8611_v35 = vld [vmem:[#allocation2 + $0x9] ss:$4 sm:$0x3] }
 0x118   :  { %v1952_v24 = vsel %vm1942_vm6, %v1949_v61, %v1951_v0  ;;  %v1956_v59 = vsel %vm1942_vm6, %v1953_v40, %v1955_v28  ;;  %v1871_v49 = vsub.s32 0, %v1869_v39  ;;  %v1948_v56 = vsel %vm1942_vm6, %v1945_v47, %v1947_v16 }
 0x119   :  { %v8591_v50 = vmul.u32.u64.low %v8537_v30, %v1956_v59  ;;  %v8592_v60 = vmul.u32.u64.high %v8537_v30, %v1956_v59, %v8591_v50  ;;  %v8598_v51 = vmul.u32.u64.low %v8537_v30, %v1952_v24  ;;  %v8599_v14 = vmul.u32.u64.high %v8537_v30, %v1952_v24, %v8598_v51 }
 0x11a   :  { %v6980_v9 = vadd.s32 4294967169, %v2017_v4  ;;  %vm1807_vm10 = vcmp.lt.s32.totalorder %v8433_v3, 0  ;;  %v6973_v36 = vmin.u32 %v1871_v49, %v1869_v39  ;;  %vm8606_vm5 = vcmp.le.f32.partialorder %v1805_v21, 0.7853982 }
 0x11b   :  { %v1892_v42 = vsel %vm1807_vm10, %v1891_v31, %v1867_v43  ;;  %v1964_v63 = vmul.u32 %v8537_v30, %v1948_v56  ;;  %vm1966_vm0 = vc.u32 %v8592_v60, %v8598_v51  ;;  %v1967_v22 = vadd.s32 1, %v8599_v14 }
 0x11c   :  { %v2023_v26 = vadd.s32 1, %v6980_v9  ;;  %v1873_v23 = vclz %v6973_v36  ;;  %v2020_v34 = vand.u32 8388607, %v2013_v38  ;;  %v8619_v21 = vsel %vm8606_vm5, 0, %v1892_v42 }
 0x11d   :  { %v1968_v29 = vsel %vm1966_vm0, %v1967_v22, %v8599_v14  ;;  %v1861_v30 = vadd.s32 %v8520_v2, %v8528_v25  ;;  %v8626_v10 = vrot.slane %v8611_v35, %v7534_v5  ;;  %v8629_v1 = vadd.s32 3, %v8619_v21 }
 0x11e   :  { %vm2024_vm14 = vcmp.gt.s32.totalorder %v2023_v26, 0  ;;  %v6974_v32 = vadd.s32 4294967294, %v1873_v23  ;;  %v1969_v41 = vadd.s32 %v1968_v29, %v1964_v63  ;;  %v2021_v46 = vor.u32 8388608, %v2020_v34 }
 0x11f   :  { %v2025_v52 = vsel %vm2024_vm14, %v2023_v26, 0  ;;  %v8636_v61 = vmul.f32 %v8453_v57, %v7540_v17  ;;  %vm1911_vm3 = vcmp.lt.s32.totalorder %v8461_v37, 0  ;;  %v1965_v59 = vadd.s32 %v8598_v51, %v8592_v60 }
 0x120   :  { %v2027_v13 = vand.u32 31, %v2025_v52  ;;  %vm6975_vm9 = vcmp.lt.s32.totalorder %v6974_v32, 0  ;;  %v1970_v44 = vadd.s32 536870912, %v1969_v41  ;;  %v2026_v57 = vshrl.u32 %v2025_v52, 5 }
 0x121   :  { %v1876_v11 = vsel %vm6975_vm9, 0, %v6974_v32  ;;  %v8647_v56 = vshll.u32 %v2021_v46, 8  ;;  %vm8655_vm4 = vcmp.le.f32.partialorder %v1909_v19, 0.7853982  ;;  %v2120_v29 = vand.u32 2139095040, %v8636_v61 }
 0x122   :  { %v2028_v48 = vsub.s32 32, %v2027_v13  ;;  %v1877_v43 = vsub.s32 32, %v1876_v11  ;;  %v1878_v58 = vshll.u32 %v1869_v39, %v1876_v11  ;;  %v1881_v12 = vsub.s32 4294967266, %v1876_v11 }
 0x123   :  { %v2030_v53 = vshll.u32 %v11198_v54, %v2027_v13  ;;  %v2033_v25 = vshll.u32 %v11237_v45, %v2027_v13  ;;  %v1971_v27 = vshrl.u32 %v1970_v44, 30  ;;  %v2036_v55 = vshll.u32 %v11238_v7, %v2027_v13 }
 0x124   :  { %v2031_v2 = vshrl.u32 %v11237_v45, %v2028_v48  ;;  %v1879_v4 = vshrl.u32 %v1861_v30, %v1877_v43  ;;  %v1882_v47 = vadd.s32 127, %v1881_v12  ;;  %v2034_v40 = vshrl.u32 %v11238_v7, %v2028_v48 }
 0x125   :  { %v2037_v39 = vshrl.u32 %v11242_v15, %v2028_v48  ;;  %v2039_v16 = vshll.u32 %v11242_v15, %v2027_v13  ;;  %v2040_v0 = vshrl.u32 %v7510_v62, %v2028_v48  ;;  %v1972_v24 = vshll.u32 %v1971_v27, 30 }
 0x126   :  { %v1880_v28 = vor.u32 %v1879_v4, %v1878_v58  ;;  %v1883_v31 = vshll.u32 %v1882_v47, 23  ;;  %v2042_v49 = vshll.u32 %v7510_v62, %v2027_v13  ;;  %v2043_v50 = vshrl.u32 %v11211_v8, %v2028_v48 }
 0x127   :  { %v8649_v36 = vsub.s32 %v1969_v41, %v1972_v24  ;;  %v2032_v42 = vor.u32 %v2031_v2, %v2030_v53  ;;  %v2035_v26 = vor.u32 %v2034_v40, %v2033_v25  ;;  %v2038_v23 = vor.u32 %v2037_v39, %v2036_v55 }
 0x128   :  { %v1884_v14 = vor.u32 4788187, %v1883_v31  ;;  %v1887_v9 = vcvt.s32.f32 %v1880_v28  ;;  %v2041_v63 = vor.u32 %v2040_v0, %v2039_v16  ;;  %v2044_v22 = vor.u32 %v2043_v50, %v2042_v49 }
 0x129   :  { %v1975_v32 = vsub.s32 0, %v8649_v36  ;;  %v2029_v60 = vshrl.u32 %v11198_v54, %v2028_v48  ;;  %vm2045_vm1 = vcmp.lt.s32.totalorder %v2026_v57, 1  ;;  %v1995_v52 = vsub.s32 4, %v1971_v27 }
 0x12a   :  { %v1885_v34 = vand.u32 2147483647, %v1884_v14  ;;  %vm2046_vm7 = vcmp.lt.s32.totalorder %v2026_v57, 2  ;;  %vm2048_vm8 = vcmp.lt.s32.totalorder %v2026_v57, 4  ;;  %vm2047_vm15 = vcmp.lt.s32.totalorder %v2026_v57, 3 }
 0x12b   :  { %v6977_v30 = vmin.u32 %v1975_v32, %v8649_v36  ;;  %v2050_v41 = vsel %vm2048_vm8, %v2038_v23, 2102212464  ;;  %v2053_v11 = vsel %vm2045_vm1, %v2032_v42, %v2035_v26  ;;  %v2054_v46 = vsel %vm2048_vm8, %v2041_v63, 920167782 }
 0x12c   :  { %v1888_v13 = vmul.f32 %v1887_v9, %v1885_v34  ;;  %v2057_v48 = vsel %vm2045_vm1, %v2035_v26, %v2038_v23  ;;  %v2058_v43 = vsel %vm2048_vm8, %v2044_v22, 1326507024  ;;  %v2049_v12 = vsel %vm2045_vm1, %v2029_v60, %v2032_v42 }
 0x12d   :  { %v1977_v58 = vclz %v6977_v30  ;;  %v2051_v44 = vsel %vm2047_vm15, %v2035_v26, %v2050_v41  ;;  %v1996_v53 = vsel %vm1911_vm3, %v1995_v52, %v1971_v27  ;;  %v2055_v2 = vsel %vm2047_vm15, %v2038_v23, %v2054_v46 }
 0x12e   :  { %v1889_v19 = vxor.u32 2147483648, %v1888_v13  ;;  %v2059_v25 = vsel %vm2047_vm15, %v2041_v63, %v2058_v43  ;;  %v2121_v4 = vshrl.u32 %v2120_v29, 23  ;;  %v2056_v55 = vsel %vm2046_vm7, %v2053_v11, %v2055_v2 }
 0x12f   :  { %v6978_v40 = vadd.s32 4294967294, %v1977_v58  ;;  %v2060_v39 = vsel %vm2046_vm7, %v2057_v48, %v2059_v25  ;;  %v2052_v0 = vsel %vm2046_vm7, %v2049_v12, %v2051_v44  ;;  %v2117_v50 = vand.u32 2147483647, %v8636_v61 }
 0x130   :  { %v1890_v47 = vsel %vm1807_vm10, %v1889_v19, %v1888_v13  ;;  %v8675_v28 = vmul.u32.u64.low %v8647_v56, %v2060_v39  ;;  %v8676_v27 = vmul.u32.u64.high %v8647_v56, %v2060_v39, %v8675_v28  ;;  %v6984_v14 = vadd.s32 4294967169, %v2121_v4 }
 0x131   :  { %v1893_v16 = vsel %vm8606_vm5, %v8433_v3, %v1890_v47  ;;  %vm6979_vm11 = vcmp.lt.s32.totalorder %v6978_v40, 0  ;;  %v8679_v31 = vmul.u32.u64.low %v8647_v56, %v2056_v55  ;;  %v8680_v24 = vmul.u32.u64.high %v8647_v56, %v2056_v55, %v8679_v31 }
 0x132   :  { %7382 = vcosq.f32 %v1893_v16  ;;  %v1980_v49 = vsel %vm6979_vm11, 0, %v6978_v40  ;;  %v8687_v42 = vsel %vm8655_vm4, 0, %v1996_v53  ;;  %v2068_v26 = vmul.u32 %v8647_v56, %v2052_v0 }
 0x133   :  { %7384 = vsinq.f32 %v1893_v16  ;;  %v1981_v20 = vsub.s32 32, %v1980_v49  ;;  %v1982_v57 = vshll.u32 %v8649_v36, %v1980_v49  ;;  %v1985_v9 = vsub.s32 4294967266, %v1980_v49 }
 0x134   :  { %vm2070_vm2 = vc.u32 %v8676_v27, %v8679_v31  ;;  %v2127_v23 = vadd.s32 1, %v6984_v14  ;;  %v1899_v63 = vand.u32 3, %v8629_v1  ;;  %v2071_v32 = vadd.s32 1, %v8680_v24 }
 0x135   :  { %v1983_v22 = vshrl.u32 %v1965_v59, %v1981_v20  ;;  %v1986_v34 = vadd.s32 127, %v1985_v9  ;;  %vm1897_vm12 = vweird.f32 %v8433_v3  ;;  %v2002_v36 = vadd.s32 3, %v8687_v42 }
 0x136   :  { %v8698_v60 = vand.u32 8388607, %v2117_v50  ;;  %vm2128_vm13 = vcmp.gt.s32.totalorder %v2127_v23, 0  ;;  %v8702_v56 = vmul.f32 %v8626_v10, %v7542_v18  ;;  %v2072_v1 = vsel %vm2070_vm2, %v2071_v32, %v8680_v24 }
 0x137   :  { %v1984_v52 = vor.u32 %v1983_v22, %v1982_v57  ;;  %v1987_v29 = vshll.u32 %v1986_v34, 23  ;;  %v2129_v59 = vsel %vm2128_vm13, %v2127_v23, 0  ;;  %v2073_v13 = vadd.s32 %v2072_v1, %v2068_v26 }
 0x138   :  { %v2131_v30 = vand.u32 31, %v2129_v59  ;;  %v8707_v41 = vrot.slane %v8611_v35, %v7536_v6  ;;  %v8711_v11 = vmul.f32 %v8626_v10, %v7540_v17  ;;  %vm1900_vm6 = vcmp.lt.s32.totalorder %v1899_v63, 2 }
 0x139   :  { %vm1901_vm10 = vcmp.eq.s32.totalorder %v1899_v63, 0  ;;  %v1988_v46 = vor.u32 4788187, %v1987_v29  ;;  %v1991_v48 = vcvt.s32.f32 %v1984_v52  ;;  %vm1904_vm5 = vcmp.eq.s32.totalorder %v1899_v63, 2 }
 0x13a   :  { %v8713_v43 = vand.u32 3, %v2002_v36  ;;  %v2074_v19 = vadd.s32 536870912, %v2073_v13  ;;  %v2132_v58 = vsub.s32 32, %v2131_v30  ;;  %v2125_v53 = vor.u32 8388608, %v8698_v60 }
 0x13b   :  { %v1989_v44 = vand.u32 2147483647, %v1988_v46  ;;  %v8718_v35 = vshrl.u32 %v2129_v59, 5  ;;  %v2224_v2 = vand.u32 2139095040, %v8702_v56  ;;  %v2134_v47 = vshll.u32 %v11198_v54, %v2131_v30 }
 0x13c   :  { %v8715_v12 = vpop.eup %7382  ;;  %v2075_v4 = vshrl.u32 %v2074_v19, 30  ;;  %v2137_v40 = vshll.u32 %v11237_v45, %v2131_v30  ;;  %v2135_v16 = vshrl.u32 %v11237_v45, %v2132_v58  ;;  %v2140_v0 = vshll.u32 %v11238_v7, %v2131_v30 }
 0x13d   :  { %v8721_v10 = vpop.eup %7384  ;;  %v11193_v25 = vxor.u32 2147483648, %v8715_v12  ;;  %v1992_v39 = vmul.f32 %v1991_v48, %v1989_v44  ;;  %v2138_v49 = vshrl.u32 %v11238_v7, %v2132_v58  ;;  %v2141_v14 = vshrl.u32 %v11242_v15, %v2132_v58 }
 0x13e   :  { %v11194_v55 = vxor.u32 2147483648, %v8721_v10  ;;  %v2076_v24 = vshll.u32 %v2075_v4, 30  ;;  %v2143_v9 = vshll.u32 %v11242_v15, %v2131_v30  ;;  %v2146_v26 = vshll.u32 %v7510_v62, %v2131_v30 }
 0x13f   :  { %v1906_v28 = vsel %vm1904_vm5, %v11193_v25, %v8721_v10  ;;  %v1993_v57 = vxor.u32 2147483648, %v1992_v39  ;;  %v2133_v34 = vshrl.u32 %v11198_v54, %v2132_v58  ;;  %v2144_v32 = vshrl.u32 %v7510_v62, %v2132_v58 }
 0x140   :  { %v1903_v20 = vsel %vm1901_vm10, %v8715_v12, %v11194_v55  ;;  %v8742_v22 = vsub.s32 %v2073_v13, %v2076_v24  ;;  %vm2015_vm0 = vcmp.lt.s32.totalorder %v8490_v33, 0  ;;  %v2136_v52 = vor.u32 %v2135_v16, %v2134_v47 }
 0x141   :  { %v1907_v23 = vsel %vm1900_vm6, %v1903_v20, %v1906_v28  ;;  %v1994_v60 = vsel %vm1911_vm3, %v1993_v57, %v1992_v39  ;;  %v2147_v29 = vshrl.u32 %v11211_v8, %v2132_v58  ;;  %v2139_v59 = vor.u32 %v2138_v49, %v2137_v40 }
 0x142   :  { %v1908_v36 = vsel %vm1897_vm12, nan, %v1907_v23  ;;  %v1997_v63 = vsel %vm8655_vm4, %v8461_v37, %v1994_v60  ;;  %v2079_v1 = vsub.s32 0, %v8742_v22  ;;  %v2142_v13 = vor.u32 %v2141_v14, %v2140_v0 }
 0x143   :  { %7004 = vst [vmem:[%s11174_s1 + $0x20] sm:$0xff] %v1908_v36  ;;  %7386 = vcosq.f32 %v1997_v63  ;;  %v2145_v30 = vor.u32 %v2144_v32, %v2143_v9  ;;  %v2148_v46 = vor.u32 %v2147_v29, %v2146_v26  ;;  %vm2149_vm14 = vcmp.lt.s32.totalorder %v8718_v35, 1 }
 0x144   :  { %7388 = vsinq.f32 %v1997_v63  ;;  %vm8762_vm9 = vcmp.le.f32.partialorder %v2013_v38, 0.7853982  ;;  %v2069_v51 = vadd.s32 %v8679_v31, %v8676_v27  ;;  %v6981_v19 = vmin.u32 %v2079_v1, %v8742_v22 }
 0x145   :  { %v2165_v58 = vshll.u32 %v2125_v53, 8  ;;  %v2099_v44 = vsub.s32 4, %v2075_v4  ;;  %vm2151_vm3 = vcmp.lt.s32.totalorder %v8718_v35, 3  ;;  %vm2152_vm1 = vcmp.lt.s32.totalorder %v8718_v35, 4 }
 0x146   :  { %v2225_v47 = vshrl.u32 %v2224_v2, 23  ;;  %v2081_v40 = vclz %v6981_v19  ;;  %vm2150_vm4 = vcmp.lt.s32.totalorder %v8718_v35, 2  ;;  %v2157_v39 = vsel %vm2149_vm14, %v2136_v52, %v2139_v59 }
 0x147   :  { %v2161_v38 = vsel %vm2149_vm14, %v2139_v59, %v2142_v13  ;;  %vm2004_vm7 = vcmp.lt.s32.totalorder %v8713_v43, 2  ;;  %v2153_v16 = vsel %vm2149_vm14, %v2133_v34, %v2136_v52  ;;  %v2154_v0 = vsel %vm2152_vm1, %v2142_v13, 2102212464 }
 0x148   :  { %v2158_v28 = vsel %vm2152_vm1, %v2145_v30, 920167782  ;;  %v2162_v27 = vsel %vm2152_vm1, %v2148_v46, 1326507024  ;;  %vm2001_vm8 = vweird.f32 %v8461_v37  ;;  %v6982_v31 = vadd.s32 4294967294, %v2081_v40 }
 0x149   :  { %v2155_v53 = vsel %vm2151_vm3, %v2139_v59, %v2154_v0  ;;  %v2159_v2 = vsel %vm2151_vm3, %v2142_v13, %v2158_v28  ;;  %v2163_v24 = vsel %vm2151_vm3, %v2145_v30, %v2162_v27  ;;  %v2221_v20 = vand.u32 2147483647, %v8702_v56 }
 0x14a   :  { %v2160_v49 = vsel %vm2150_vm4, %v2157_v39, %v2159_v2  ;;  %v2164_v14 = vsel %vm2150_vm4, %v2161_v38, %v2163_v24  ;;  %v6988_v57 = vadd.s32 4294967169, %v2225_v47  ;;  %vm6983_vm15 = vcmp.lt.s32.totalorder %v6982_v31, 0 }
 0x14b   :  { %v2100_v9 = vsel %vm2015_vm0, %v2099_v44, %v2075_v4  ;;  %v8787_v26 = vmul.u32.u64.low %v2165_v58, %v2164_v14  ;;  %v8788_v23 = vmul.u32.u64.high %v2165_v58, %v2164_v14, %v8787_v26  ;;  %v2084_v34 = vsel %vm6983_vm15, 0, %v6982_v31 }
 0x14c   :  { %v2156_v32 = vsel %vm2150_vm4, %v2153_v16, %v2155_v53  ;;  %v8792_v36 = vmul.u32.u64.low %v2165_v58, %v2160_v49  ;;  %v8793_v60 = vmul.u32.u64.high %v2165_v58, %v2160_v49, %v8792_v36  ;;  %v2085_v52 = vsub.s32 32, %v2084_v34 }
 0x14d   :  { %v2086_v29 = vshll.u32 %v8742_v22, %v2084_v34  ;;  %v2089_v63 = vsub.s32 4294967266, %v2084_v34  ;;  %v2231_v1 = vadd.s32 1, %v6988_v57  ;;  %v8797_v59 = vpop.eup %7386  ;;  %vm2005_vm11 = vcmp.eq.s32.totalorder %v8713_v43, 0 }
 0x14e   :  { %vm2008_vm2 = vcmp.eq.s32.totalorder %v8713_v43, 2  ;;  %v8803_v4 = vsel %vm8762_vm9, 0, %v2100_v9  ;;  %v2228_v35 = vand.u32 8388607, %v2221_v20  ;;  %v8807_v13 = vpop.eup %7388  ;;  %v11191_v30 = vxor.u32 2147483648, %v8797_v59 }
 0x14f   :  { %v2087_v22 = vshrl.u32 %v2069_v51, %v2085_v52  ;;  %v2090_v46 = vadd.s32 127, %v2089_v63  ;;  %v2172_v19 = vmul.u32 %v2165_v58, %v2156_v32  ;;  %v11192_v44 = vxor.u32 2147483648, %v8807_v13 }
 0x150   :  { %vm2174_vm13 = vc.u32 %v8788_v23, %v8792_v36  ;;  %v2175_v47 = vadd.s32 1, %v8793_v60  ;;  %vm2232_vm6 = vcmp.gt.s32.totalorder %v2231_v1, 0  ;;  %v2010_v40 = vsel %vm2008_vm2, %v11191_v30, %v8807_v13 }
 0x151   :  { %v2088_v39 = vor.u32 %v2087_v22, %v2086_v29  ;;  %v2091_v38 = vshll.u32 %v2090_v46, 23  ;;  %v2233_v16 = vsel %vm2232_vm6, %v2231_v1, 0  ;;  %v2007_v51 = vsel %vm2005_vm11, %v8797_v59, %v11192_v44 }
 0x152   :  { %v2106_v58 = vadd.s32 3, %v8803_v4  ;;  %v2176_v0 = vsel %vm2174_vm13, %v2175_v47, %v8793_v60  ;;  %v2235_v28 = vand.u32 31, %v2233_v16  ;;  %v2011_v27 = vsel %vm2004_vm7, %v2007_v51, %v2010_v40 }
 0x153   :  { %v2092_v31 = vor.u32 4788187, %v2091_v38  ;;  %v2095_v53 = vcvt.s32.f32 %v2088_v39  ;;  %v2177_v2 = vadd.s32 %v2176_v0, %v2172_v19  ;;  %v2012_v24 = vsel %vm2001_vm8, nan, %v2011_v27 }
 0x154   :  { %v2229_v49 = vor.u32 8388608, %v2228_v35  ;;  %v2236_v14 = vsub.s32 32, %v2235_v28  ;;  %v2238_v57 = vshll.u32 %v11198_v54, %v2235_v28  ;;  %7005 = vst [vmem:[%s11174_s1 + $0x28] sm:$0xff] %v2012_v24  ;;  %v2241_v34 = vshll.u32 %v11237_v45, %v2235_v28 }
 0x155   :  { %v2093_v9 = vand.u32 2147483647, %v2092_v31  ;;  %v2178_v26 = vadd.s32 536870912, %v2177_v2  ;;  %v2244_v43 = vshll.u32 %v11238_v7, %v2235_v28  ;;  %v2247_v29 = vshll.u32 %v11242_v15, %v2235_v28 }
 0x156   :  { %v2239_v32 = vshrl.u32 %v11237_v45, %v2236_v14  ;;  %v2242_v60 = vshrl.u32 %v11238_v7, %v2236_v14  ;;  %v2245_v52 = vshrl.u32 %v11242_v15, %v2236_v14  ;;  %v2234_v35 = vshrl.u32 %v2233_v16, 5 }
 0x157   :  { %v2096_v63 = vmul.f32 %v2095_v53, %v2093_v9  ;;  %v2179_v1 = vshrl.u32 %v2178_v26, 30  ;;  %v2248_v22 = vshrl.u32 %v7510_v62, %v2236_v14  ;;  %v8839_v46 = vand.u32 3, %v2106_v58 }
 0x158   :  { %v2250_v19 = vshll.u32 %v7510_v62, %v2235_v28  ;;  %v2251_v47 = vshrl.u32 %v11211_v8, %v2236_v14  ;;  %v8845_v40 = vmul.f32 %v8707_v41, %v7542_v18  ;;  %v2237_v51 = vshrl.u32 %v11198_v54, %v2236_v14 }
 0x159   :  { %v2097_v39 = vxor.u32 2147483648, %v2096_v63  ;;  %v2180_v38 = vshll.u32 %v2179_v1, 30  ;;  %v8848_v0 = vshll.u32 %v2229_v49, 8  ;;  %v2240_v27 = vor.u32 %v2239_v32, %v2238_v57 }
 0x15a   :  { %v2243_v16 = vor.u32 %v2242_v60, %v2241_v34  ;;  %v2246_v31 = vor.u32 %v2245_v52, %v2244_v43  ;;  %v2249_v53 = vor.u32 %v2248_v22, %v2247_v29  ;;  %vm2253_vm10 = vcmp.lt.s32.totalorder %v2234_v35, 1 }
 0x15b   :  { %v2098_v58 = vsel %vm2015_vm0, %v2097_v39, %v2096_v63  ;;  %v8852_v28 = vsub.s32 %v2177_v2, %v2180_v38  ;;  %vm2256_vm5 = vcmp.lt.s32.totalorder %v2234_v35, 4  ;;  %v2203_v9 = vsub.s32 4, %v2179_v1 }
 0x15c   :  { %v2101_v24 = vsel %vm8762_vm9, %v8490_v33, %v2098_v58  ;;  %v2252_v26 = vor.u32 %v2251_v47, %v2250_v19  ;;  %vm2255_vm14 = vcmp.lt.s32.totalorder %v2234_v35, 3  ;;  %vm2254_vm3 = vcmp.lt.s32.totalorder %v2234_v35, 2 }
 0x15d   :  { %7390 = vcosq.f32 %v2101_v24  ;;  %v2183_v49 = vsub.s32 0, %v8852_v28  ;;  %v2258_v14 = vsel %vm2256_vm5, %v2246_v31, 2102212464  ;;  %v2261_v57 = vsel %vm2253_vm10, %v2240_v27, %v2243_v16 }
 0x15e   :  { %7392 = vsinq.f32 %v2101_v24  ;;  %v2262_v2 = vsel %vm2256_vm5, %v2249_v53, 920167782  ;;  %v2328_v34 = vand.u32 2139095040, %v8845_v40  ;;  %vm2119_vm0 = vcmp.lt.s32.totalorder %v8636_v61, 0 }
 0x15f   :  { %v6985_v48 = vmin.u32 %v2183_v49, %v8852_v28  ;;  %v2257_v43 = vsel %vm2253_vm10, %v2237_v51, %v2240_v27  ;;  %v2263_v32 = vsel %vm2255_vm14, %v2246_v31, %v2262_v2  ;;  %v2259_v60 = vsel %vm2255_vm14, %v2243_v16, %v2258_v14 }
 0x160   :  { %v2264_v52 = vsel %vm2254_vm3, %v2261_v57, %v2263_v32  ;;  %v2265_v29 = vsel %vm2253_vm10, %v2243_v16, %v2246_v31  ;;  %v2266_v63 = vsel %vm2256_vm5, %v2252_v26, 1326507024  ;;  %vm2108_vm9 = vcmp.lt.s32.totalorder %v8839_v46, 2 }
 0x161   :  { %vm8873_vm1 = vcmp.le.f32.partialorder %v2117_v50, 0.7853982  ;;  %v2185_v19 = vclz %v6985_v48  ;;  %v2204_v47 = vsel %vm2119_vm0, %v2203_v9, %v2179_v1  ;;  %v2267_v39 = vsel %vm2255_vm14, %v2249_v53, %v2266_v63 }
 0x162   :  { %v8881_v38 = vmul.u32.u64.low %v8848_v0, %v2264_v52  ;;  %v8882_v51 = vmul.u32.u64.high %v8848_v0, %v2264_v52, %v8881_v38  ;;  %v2329_v27 = vshrl.u32 %v2328_v34, 23  ;;  %v2260_v31 = vsel %vm2254_vm3, %v2257_v43, %v2259_v60 }
 0x163   :  { %v6986_v16 = vadd.s32 4294967294, %v2185_v19  ;;  %v2268_v50 = vsel %vm2254_vm3, %v2265_v29, %v2267_v39  ;;  %v2325_v58 = vand.u32 2147483647, %v8845_v40  ;;  %v8890_v24 = vsel %vm8873_vm1, 0, %v2204_v47 }
 0x164   :  { %v8893_v1 = vmul.u32.u64.low %v8848_v0, %v2268_v50  ;;  %v8894_v53 = vmul.u32.u64.high %v8848_v0, %v2268_v50, %v8893_v1  ;;  %v6992_v9 = vadd.s32 4294967169, %v2329_v27  ;;  %vm2109_vm4 = vcmp.eq.s32.totalorder %v8839_v46, 0 }
 0x165   :  { %vm2112_vm7 = vcmp.eq.s32.totalorder %v8839_v46, 2  ;;  %v2173_v26 = vadd.s32 %v8792_v36, %v8788_v23  ;;  %vm6987_vm15 = vcmp.lt.s32.totalorder %v6986_v16, 0  ;;  %v2276_v49 = vmul.u32 %v8848_v0, %v2260_v31 }
 0x166   :  { %v2188_v35 = vsel %vm6987_vm15, 0, %v6986_v16  ;;  %v2279_v14 = vadd.s32 1, %v8882_v51  ;;  %v2335_v57 = vadd.s32 1, %v6992_v9  ;;  %v2210_v32 = vadd.s32 3, %v8890_v24 }
 0x167   :  { %v8902_v2 = vpop.eup %7390  ;;  %v2189_v34 = vsub.s32 32, %v2188_v35  ;;  %v2190_v48 = vshll.u32 %v8852_v28, %v2188_v35  ;;  %v2193_v43 = vsub.s32 4294967266, %v2188_v35  ;;  %vm2278_vm11 = vc.u32 %v8894_v53, %v8881_v38 }
 0x168   :  { %v8906_v60 = vpop.eup %7392  ;;  %v11189_v52 = vxor.u32 2147483648, %v8902_v2  ;;  %v2332_v23 = vand.u32 8388607, %v2325_v58  ;;  %vm2336_vm2 = vcmp.gt.s32.totalorder %v2335_v57, 0  ;;  %v2280_v28 = vsel %vm2278_vm11, %v2279_v14, %v8882_v51 }
 0x169   :  { %v11190_v36 = vxor.u32 2147483648, %v8906_v60  ;;  %v2191_v0 = vshrl.u32 %v2173_v26, %v2189_v34  ;;  %v2194_v29 = vadd.s32 127, %v2193_v43  ;;  %vm2105_vm13 = vweird.f32 %v8490_v33 }
 0x16a   :  { %v2114_v63 = vsel %vm2112_vm7, %v11189_v52, %v8906_v60  ;;  %v2281_v19 = vadd.s32 %v2280_v28, %v2276_v49  ;;  %v2337_v47 = vsel %vm2336_vm2, %v2335_v57, 0  ;;  %v8926_v31 = vand.u32 3, %v2210_v32 }
 0x16b   :  { %v2111_v39 = vsel %vm2109_vm4, %v8902_v2, %v11190_v36  ;;  %v2192_v27 = vor.u32 %v2191_v0, %v2190_v48  ;;  %v2195_v16 = vshll.u32 %v2194_v29, 23  ;;  %vm2223_vm6 = vcmp.lt.s32.totalorder %v8702_v56, 0 }
 0x16c   :  { %v2115_v51 = vsel %vm2108_vm9, %v2111_v39, %v2114_v63  ;;  %v2282_v50 = vadd.s32 536870912, %v2281_v19  ;;  %v2333_v1 = vor.u32 8388608, %v2332_v23  ;;  %v2339_v9 = vand.u32 31, %v2337_v47 }
 0x16d   :  { %v2116_v26 = vsel %vm2105_vm13, nan, %v2115_v51  ;;  %v2196_v35 = vor.u32 4788187, %v2195_v16  ;;  %v2199_v49 = vcvt.s32.f32 %v2192_v27  ;;  %v2432_v14 = vand.u32 2139095040, %v8711_v11 }
 0x16e   :  { %7006 = vst [vmem:[%s11174_s1 + $0x30] sm:$0x3] %v2116_v26  ;;  %v2283_v57 = vshrl.u32 %v2282_v50, 30  ;;  %v2338_v34 = vshrl.u32 %v2337_v47, 5  ;;  %v2340_v48 = vsub.s32 32, %v2339_v9  ;;  %v2342_v46 = vshll.u32 %v11198_v54, %v2339_v9 }
 0x16f   :  { %v2197_v43 = vand.u32 2147483647, %v2196_v35  ;;  %v2345_v32 = vshll.u32 %v11237_v45, %v2339_v9  ;;  %v2348_v23 = vshll.u32 %v11238_v7, %v2339_v9  ;;  %v2351_v0 = vshll.u32 %v11242_v15, %v2339_v9 }
 0x170   :  { %v2284_v29 = vshll.u32 %v2283_v57, 30  ;;  %v2307_v28 = vsub.s32 4, %v2283_v57  ;;  %v2343_v63 = vshrl.u32 %v11237_v45, %v2340_v48  ;;  %v2354_v39 = vshll.u32 %v7510_v62, %v2339_v9 }
 0x171   :  { %v2200_v27 = vmul.f32 %v2199_v49, %v2197_v43  ;;  %vm8945_vm10 = vcmp.le.f32.partialorder %v2221_v20, 0.7853982  ;;  %v2346_v16 = vshrl.u32 %v11238_v7, %v2340_v48  ;;  %v2349_v51 = vshrl.u32 %v11242_v15, %v2340_v48 }
 0x172   :  { %v2352_v50 = vshrl.u32 %v7510_v62, %v2340_v48  ;;  %v8952_v26 = vsub.s32 %v2281_v19, %v2284_v29  ;;  %v2355_v35 = vshrl.u32 %v11211_v8, %v2340_v48  ;;  %v8955_v52 = vshll.u32 %v2333_v1, 8 }
 0x173   :  { %v2433_v9 = vshrl.u32 %v2432_v14, 23  ;;  %v2201_v49 = vxor.u32 2147483648, %v2200_v27  ;;  %v2344_v43 = vor.u32 %v2343_v63, %v2342_v46  ;;  %v2347_v36 = vor.u32 %v2346_v16, %v2345_v32 }
 0x174   :  { %vm2357_vm5 = vcmp.lt.s32.totalorder %v2338_v34, 1  ;;  %v2287_v20 = vsub.s32 0, %v8952_v26  ;;  %v2308_v30 = vsel %vm2223_vm6, %v2307_v28, %v2283_v57  ;;  %v2341_v44 = vshrl.u32 %v11198_v54, %v2340_v48 }
 0x175   :  { %v2353_v25 = vor.u32 %v2352_v50, %v2351_v0  ;;  %v2202_v19 = vsel %vm2119_vm0, %v2201_v49, %v2200_v27  ;;  %v2350_v29 = vor.u32 %v2349_v51, %v2348_v23  ;;  %v2356_v55 = vor.u32 %v2355_v35, %v2354_v39 }
 0x176   :  { %vm2360_vm14 = vcmp.lt.s32.totalorder %v2338_v34, 4  ;;  %v2205_v1 = vsel %vm8873_vm1, %v8636_v61, %v2202_v19  ;;  %v6989_v14 = vmin.u32 %v2287_v20, %v8952_v26  ;;  %vm2358_vm3 = vcmp.lt.s32.totalorder %v2338_v34, 2 }
 0x177   :  { %vm2359_vm9 = vcmp.lt.s32.totalorder %v2338_v34, 3  ;;  %7394 = vcosq.f32 %v2205_v1  ;;  %v2362_v57 = vsel %vm2360_vm14, %v2350_v29, 2102212464  ;;  %v2365_v48 = vsel %vm2357_vm5, %v2344_v43, %v2347_v36 }
 0x178   :  { %v2366_v46 = vsel %vm2360_vm14, %v2353_v25, 920167782  ;;  %7396 = vsinq.f32 %v2205_v1  ;;  %v2289_v32 = vclz %v6989_v14  ;;  %v11197_v23 = vand.u32 2147483647, %v8711_v11 }
 0x179   :  { %v6996_v0 = vadd.s32 4294967169, %v2433_v9  ;;  %v2361_v28 = vsel %vm2357_vm5, %v2341_v44, %v2344_v43  ;;  %v2363_v22 = vsel %vm2359_vm9, %v2347_v36, %v2362_v57  ;;  %v2367_v63 = vsel %vm2359_vm9, %v2350_v29, %v2366_v46 }
 0x17a   :  { %v2369_v39 = vsel %vm2357_vm5, %v2347_v36, %v2350_v29  ;;  %v6990_v27 = vadd.s32 4294967294, %v2289_v32  ;;  %v8977_v16 = vsel %vm8945_vm10, 0, %v2308_v30  ;;  %v2368_v51 = vsel %vm2358_vm3, %v2365_v48, %v2367_v63 }
 0x17b   :  { %v2370_v50 = vsel %vm2360_vm14, %v2356_v55, 1326507024  ;;  %v2277_v35 = vadd.s32 %v8881_v38, %v8894_v53  ;;  %v8985_v9 = vmul.u32.u64.low %v8955_v52, %v2368_v51  ;;  %v8986_v49 = vmul.u32.u64.high %v8955_v52, %v2368_v51, %v8985_v9 }
 0x17c   :  { %v2371_v44 = vsel %vm2359_vm9, %v2353_v25, %v2370_v50  ;;  %vm11201_vm0 = vweird.f32 %v8636_v61  ;;  %vm6991_vm1 = vcmp.lt.s32.totalorder %v6990_v27, 0  ;;  %v2364_v30 = vsel %vm2358_vm3, %v2361_v28, %v2363_v22 }
 0x17d   :  { %v2372_v36 = vsel %vm2358_vm3, %v2369_v39, %v2371_v44  ;;  %v2439_v43 = vadd.s32 1, %v6996_v0  ;;  %v2292_v20 = vsel %vm6991_vm1, 0, %v6990_v27  ;;  %v2314_v55 = vadd.s32 3, %v8977_v16 }
 0x17e   :  { %v8994_v38 = vmul.u32.u64.low %v8955_v52, %v2372_v36  ;;  %v8995_v53 = vmul.u32.u64.high %v8955_v52, %v2372_v36, %v8994_v38  ;;  %vm2212_vm4 = vcmp.lt.s32.totalorder %v8926_v31, 2  ;;  %v2293_v25 = vsub.s32 32, %v2292_v20 }
 0x17f   :  { %v2294_v19 = vshll.u32 %v8952_v26, %v2292_v20  ;;  %v2297_v29 = vsub.s32 4294967266, %v2292_v20  ;;  %v2380_v1 = vmul.u32 %v8955_v52, %v2364_v30  ;;  %v2383_v14 = vadd.s32 1, %v8986_v49 }
 0x180   :  { %v2436_v34 = vand.u32 8388607, %v11197_v23  ;;  %vm2440_vm7 = vcmp.gt.s32.totalorder %v2439_v43, 0  ;;  %vm2213_vm15 = vcmp.eq.s32.totalorder %v8926_v31, 0  ;;  %v2295_v57 = vshrl.u32 %v2277_v35, %v2293_v25 }
 0x181   :  { %v2298_v48 = vadd.s32 127, %v2297_v29  ;;  %v2441_v46 = vsel %vm2440_vm7, %v2439_v43, 0  ;;  %v9004_v32 = vpop.eup %7394  ;;  %vm2216_vm11 = vcmp.eq.s32.totalorder %v8926_v31, 2  ;;  %v9007_v0 = vand.u32 3, %v2314_v55 }
 0x182   :  { %vm2382_vm2 = vc.u32 %v8995_v53, %v8985_v9  ;;  %v2443_v52 = vand.u32 31, %v2441_v46  ;;  %v9011_v26 = vpop.eup %7396  ;;  %v11195_v28 = vxor.u32 2147483648, %v9004_v32  ;;  %v2296_v22 = vor.u32 %v2295_v57, %v2294_v19 }
 0x183   :  { %v2299_v63 = vshll.u32 %v2298_v48, 23  ;;  %v2384_v39 = vsel %vm2382_vm2, %v2383_v14, %v8986_v49  ;;  %v11196_v27 = vxor.u32 2147483648, %v9011_v26  ;;  %vm2327_vm5 = vcmp.lt.s32.totalorder %v8845_v40, 0 }
 0x184   :  { %v2385_v51 = vadd.s32 %v2384_v39, %v2380_v1  ;;  %v2437_v50 = vor.u32 8388608, %v2436_v34  ;;  %v2444_v35 = vsub.s32 32, %v2443_v52  ;;  %v2218_v44 = vsel %vm2216_vm11, %v11195_v28, %v9011_v26 }
 0x185   :  { %v2300_v30 = vor.u32 4788187, %v2299_v63  ;;  %v2303_v36 = vcvt.s32.f32 %v2296_v22  ;;  %v9020_v43 = vshrl.u32 %v2441_v46, 5  ;;  %v2215_v49 = vsel %vm2213_vm15, %v9004_v32, %v11196_v27 }
 0x186   :  { %v2386_v20 = vadd.s32 536870912, %v2385_v51  ;;  %v2446_v55 = vshll.u32 %v11198_v54, %v2443_v52  ;;  %v2449_v38 = vshll.u32 %v11237_v45, %v2443_v52  ;;  %v2219_v25 = vsel %vm2212_vm4, %v2215_v49, %v2218_v44 }
 0x187   :  { %v2301_v19 = vand.u32 2147483647, %v2300_v30  ;;  %v2447_v29 = vshrl.u32 %v11237_v45, %v2444_v35  ;;  %v2450_v1 = vshrl.u32 %v11238_v7, %v2444_v35  ;;  %v2220_v14 = vsel %vm11201_vm0, nan, %v2219_v25 }
 0x188   :  { %v2387_v34 = vshrl.u32 %v2386_v20, 30  ;;  %v2452_v57 = vshll.u32 %v11238_v7, %v2443_v52  ;;  %v2453_v48 = vshrl.u32 %v11242_v15, %v2444_v35  ;;  %7007 = vst [vmem:[%s11174_s1 + $0x38] sm:$0x3] %v2220_v14  ;;  %vm9042_vm14 = vcmp.le.f32.partialorder %v2325_v58, 0.7853982 }
 0x189   :  { %v2304_v46 = vmul.f32 %v2303_v36, %v2301_v19  ;;  %v2455_v22 = vshll.u32 %v11242_v15, %v2443_v52  ;;  %v2456_v63 = vshrl.u32 %v7510_v62, %v2444_v35  ;;  %v9048_v39 = vshll.u32 %v2437_v50, 8 }
 0x18a   :  { %v2388_v44 = vshll.u32 %v2387_v34, 30  ;;  %v2411_v30 = vsub.s32 4, %v2387_v34  ;;  %v2445_v49 = vshrl.u32 %v11198_v54, %v2444_v35  ;;  %v2458_v20 = vshll.u32 %v7510_v62, %v2443_v52 }
 0x18b   :  { %v2305_v25 = vxor.u32 2147483648, %v2304_v46  ;;  %v2448_v36 = vor.u32 %v2447_v29, %v2446_v55  ;;  %v2457_v19 = vor.u32 %v2456_v63, %v2455_v22  ;;  %v2459_v58 = vshrl.u32 %v11211_v8, %v2444_v35 }
 0x18c   :  { %v9053_v14 = vsub.s32 %v2385_v51, %v2388_v44  ;;  %v2451_v28 = vor.u32 %v2450_v1, %v2449_v38  ;;  %v2454_v27 = vor.u32 %v2453_v48, %v2452_v57  ;;  %vm2461_vm3 = vcmp.lt.s32.totalorder %v9020_v43, 1 }
 0x18d   :  { %v2306_v50 = vsel %vm2223_vm6, %v2305_v25, %v2304_v46  ;;  %v2412_v23 = vsel %vm2327_vm5, %v2411_v30, %v2387_v34  ;;  %v2460_v54 = vor.u32 %v2459_v58, %v2458_v20  ;;  %vm2464_vm9 = vcmp.lt.s32.totalorder %v9020_v43, 4 }
 0x18e   :  { %v2309_v52 = vsel %vm8945_vm10, %v8702_v56, %v2306_v50  ;;  %v2391_v51 = vsub.s32 0, %v9053_v14  ;;  %vm2462_vm1 = vcmp.lt.s32.totalorder %v9020_v43, 2  ;;  %vm2463_vm4 = vcmp.lt.s32.totalorder %v9020_v43, 3 }
 0x18f   :  { %7398 = vcosq.f32 %v2309_v52  ;;  %v2465_v35 = vsel %vm2461_vm3, %v2445_v49, %v2448_v36  ;;  %v2466_v55 = vsel %vm2464_vm9, %v2454_v27, 2102212464  ;;  %v2470_v38 = vsel %vm2464_vm9, %v2457_v19, 920167782 }
 0x190   :  { %7400 = vsinq.f32 %v2309_v52  ;;  %v6993_v29 = vmin.u32 %v2391_v51, %v9053_v14  ;;  %v2467_v1 = vsel %vm2463_vm4, %v2451_v28, %v2466_v55  ;;  %v2469_v47 = vsel %vm2461_vm3, %v2448_v36, %v2451_v28 }
 0x191   :  { %v2471_v34 = vsel %vm2463_vm4, %v2454_v27, %v2470_v38  ;;  %v2473_v57 = vsel %vm2461_vm3, %v2451_v28, %v2454_v27  ;;  %v2474_v48 = vsel %vm2464_vm9, %v2460_v54, 1326507024  ;;  %v9080_v46 = vmul.f32 %v8707_v41, %v7540_v17 }
 0x192   :  { %v2393_v22 = vclz %v6993_v29  ;;  %v9084_v63 = vsel %vm9042_vm14, 0, %v2412_v23  ;;  %v2739_v44 = vand.u32 3, %v8619_v21  ;;  %vm2316_vm6 = vcmp.lt.s32.totalorder %v9007_v0, 2 }
 0x193   :  { %v2468_v30 = vsel %vm2462_vm1, %v2465_v35, %v2467_v1  ;;  %v2472_v28 = vsel %vm2462_vm1, %v2469_v47, %v2471_v34  ;;  %v2475_v54 = vsel %vm2463_vm4, %v2457_v19, %v2474_v48  ;;  %v2533_v41 = vand.u32 2147483647, %v9080_v46 }
 0x194   :  { %vm11200_vm10 = vweird.f32 %v8702_v56  ;;  %v6994_v27 = vadd.s32 4294967294, %v2393_v22  ;;  %v2476_v23 = vsel %vm2462_vm1, %v2473_v57, %v2475_v54  ;;  %vm2317_vm7 = vcmp.eq.s32.totalorder %v9007_v0, 0 }
 0x195   :  { %v9099_v21 = vmul.u32.u64.low %v9048_v39, %v2472_v28  ;;  %v9100_v49 = vmul.u32.u64.high %v9048_v39, %v2472_v28, %v9099_v21  ;;  %vm2320_vm15 = vcmp.eq.s32.totalorder %v9007_v0, 2  ;;  %v2381_v36 = vadd.s32 %v8985_v9, %v8995_v53 }
 0x196   :  { %v9105_v20 = vmul.u32.u64.low %v9048_v39, %v2476_v23  ;;  %v9106_v25 = vmul.u32.u64.high %v9048_v39, %v2476_v23, %v9105_v20  ;;  %vm6995_vm11 = vcmp.lt.s32.totalorder %v6994_v27, 0  ;;  %v2418_v19 = vadd.s32 3, %v9084_v63 }
 0x197   :  { %v2536_v43 = vand.u32 2139095040, %v9080_v46  ;;  %v2396_v58 = vsel %vm6995_vm11, 0, %v6994_v27  ;;  %v2484_v50 = vmul.u32 %v9048_v39, %v2468_v30  ;;  %v2540_v52 = vand.u32 8388607, %v2533_v41 }
 0x198   :  { %vm2740_vm2 = vcmp.lt.s32.totalorder %v2739_v44, 2  ;;  %v2397_v51 = vsub.s32 32, %v2396_v58  ;;  %v2398_v35 = vshll.u32 %v9053_v14, %v2396_v58  ;;  %v2401_v55 = vsub.s32 4294967266, %v2396_v58 }
 0x199   :  { %v2487_v38 = vadd.s32 1, %v9100_v49  ;;  %v9117_v29 = vpop.eup %7398  ;;  %vm2486_vm3 = vc.u32 %v9106_v25, %v9099_v21  ;;  %v2537_v9 = vshrl.u32 %v2536_v43, 23  ;;  %vm2741_vm9 = vcmp.eq.s32.totalorder %v2739_v44, 0 }
 0x19a   :  { %vm2744_vm1 = vcmp.eq.s32.totalorder %v2739_v44, 2  ;;  %v9120_v53 = vpop.eup %7400  ;;  %v2321_v39 = vxor.u32 2147483648, %v9117_v29  ;;  %v2399_v1 = vshrl.u32 %v2381_v36, %v2397_v51  ;;  %v2402_v47 = vadd.s32 127, %v2401_v55 }
 0x19b   :  { %v2488_v34 = vsel %vm2486_vm3, %v2487_v38, %v9100_v49  ;;  %v2318_v14 = vxor.u32 2147483648, %v9120_v53  ;;  %v7000_v48 = vadd.s32 4294967169, %v2537_v9  ;;  %v2541_v22 = vor.u32 8388608, %v2540_v52 }
 0x19c   :  { %v2489_v57 = vadd.s32 %v2488_v34, %v2484_v50  ;;  %v2322_v30 = vsel %vm2320_vm15, %v2321_v39, %v9120_v53  ;;  %v2400_v28 = vor.u32 %v2399_v1, %v2398_v35  ;;  %v2403_v54 = vshll.u32 %v2402_v47, 23 }
 0x19d   :  { %v11264_v27 = vxor.u32 2147483648, %v8721_v10  ;;  %v2319_v49 = vsel %vm2317_vm7, %v9117_v29, %v2318_v14  ;;  %v2543_v36 = vadd.s32 1, %v7000_v48  ;;  %v11265_v43 = vxor.u32 2147483648, %v8715_v12 }
 0x19e   :  { %v2490_v20 = vadd.s32 536870912, %v2489_v57  ;;  %v2323_v50 = vsel %vm2316_vm6, %v2319_v49, %v2322_v30  ;;  %v2404_v52 = vor.u32 4788187, %v2403_v54  ;;  %v2407_v51 = vcvt.s32.f32 %v2400_v28 }
 0x19f   :  { %v2743_v23 = vsel %vm2741_vm9, %v8715_v12, %v11264_v27  ;;  %v2746_v58 = vsel %vm2744_vm1, %v11265_v43, %v8721_v10  ;;  %v2324_v55 = vsel %vm11200_vm10, nan, %v2323_v50  ;;  %vm2544_vm4 = vcmp.gt.s32.totalorder %v2543_v36, 0 }
 0x1a0   :  { %v2747_v35 = vsel %vm2740_vm2, %v2743_v23, %v2746_v58  ;;  %v2491_v38 = vshrl.u32 %v2490_v20, 30  ;;  %7008 = vst [vmem:[%s11174_s1 + $0x120] sm:$0xff] %v2324_v55  ;;  %v2405_v12 = vand.u32 2147483647, %v2404_v52  ;;  %v2545_v10 = vsel %vm2544_vm4, %v2543_v36, 0 }
 0x1a1   :  { %v2748_v9 = vsel %vm1897_vm12, nan, %v2747_v35  ;;  %vm2431_vm6 = vcmp.lt.s32.totalorder %v8711_v11, 0  ;;  %v2547_v44 = vand.u32 31, %v2545_v10  ;;  %v9156_v47 = vand.u32 3, %v2418_v19 }
 0x1a2   :  { %7044 = vst [vmem:[%s11174_s1 + $0xa0] sm:$0xff] %v2748_v9  ;;  %v2492_v0 = vshll.u32 %v2491_v38, 30  ;;  %v2408_v1 = vmul.f32 %v2407_v51, %v2405_v12  ;;  %v9159_v3 = vadd.s32 %v9099_v21, %v9106_v25  ;;  %v9161_v34 = vshll.u32 %v2541_v22, 8 }
 0x1a3   :  { %v2548_v30 = vsub.s32 32, %v2547_v44  ;;  %v9166_v28 = vand.u32 3, %v8687_v42  ;;  %v9169_v54 = vand.u32 3, %v8803_v4  ;;  %v2515_v23 = vsub.s32 4, %v2491_v38 }
 0x1a4   :  { %v9163_v48 = vsub.s32 %v2489_v57, %v2492_v0  ;;  %v2409_v27 = vxor.u32 2147483648, %v2408_v1  ;;  %v11266_v49 = vmov 683565275   ;;  %v2553_v19 = vshll.u32 %v11237_v45, %v2547_v44 }
 0x1a5   :  { %v2550_v20 = vshll.u32 %v11266_v49, %v2547_v44  ;;  %v2546_v25 = vshrl.u32 %v2545_v10, 5  ;;  %v2551_v22 = vshrl.u32 %v11237_v45, %v2548_v30  ;;  %v2556_v57 = vshll.u32 %v11238_v7, %v2547_v44 }
 0x1a6   :  { %v2495_v21 = vsub.s32 0, %v9163_v48  ;;  %v2410_v42 = vsel %vm2327_vm5, %v2409_v27, %v2408_v1  ;;  %v11267_v36 = vand.u32 2147483647, %v8711_v11  ;;  %v2554_v43 = vshrl.u32 %v11238_v7, %v2548_v30 }
 0x1a7   :  { %v2557_v58 = vshrl.u32 %v11242_v15, %v2548_v30  ;;  %v2559_v50 = vshll.u32 %v11242_v15, %v2547_v44  ;;  %v2413_v52 = vsel %vm9042_vm14, %v8845_v40, %v2410_v42  ;;  %v2549_v35 = vshrl.u32 %v11266_v49, %v2548_v30 }
 0x1a8   :  { %vm9180_vm12 = vcmp.le.f32.partialorder %v11267_v36, 0.7853982  ;;  %v6997_v51 = vmin.u32 %v2495_v21, %v9163_v48  ;;  %vm2844_vm5 = vcmp.eq.s32.totalorder %v9166_v28, 0  ;;  %7402 = vcosq.f32 %v2413_v52 }
 0x1a9   :  { %v2552_v55 = vor.u32 %v2551_v22, %v2550_v20  ;;  %v2555_v9 = vor.u32 %v2554_v43, %v2553_v19  ;;  %v2560_v12 = vshrl.u32 %v7510_v62, %v2548_v30  ;;  %vm2843_vm7 = vcmp.lt.s32.totalorder %v9166_v28, 2 }
 0x1aa   :  { %7404 = vsinq.f32 %v2413_v52  ;;  %v2497_v10 = vclz %v6997_v51  ;;  %v2558_v0 = vor.u32 %v2557_v58, %v2556_v57  ;;  %vm2847_vm15 = vcmp.eq.s32.totalorder %v9166_v28, 2 }
 0x1ab   :  { %vm2424_vm14 = vcmp.eq.s32.totalorder %v9156_v47, 2  ;;  %v2516_v31 = vsel %vm2431_vm6, %v2515_v23, %v2491_v38  ;;  %v2561_v1 = vor.u32 %v2560_v12, %v2559_v50  ;;  %v2562_v27 = vshll.u32 %v7510_v62, %v2547_v44 }
 0x1ac   :  { %v2563_v20 = vshrl.u32 %v11211_v8, %v2548_v30  ;;  %vm2421_vm11 = vcmp.eq.s32.totalorder %v9156_v47, 0  ;;  %v6998_v19 = vadd.s32 4294967294, %v2497_v10  ;;  %vm2565_vm2 = vcmp.lt.s32.totalorder %v2546_v25, 1 }
 0x1ad   :  { %vm2566_vm3 = vcmp.lt.s32.totalorder %v2546_v25, 2  ;;  %vm2567_vm9 = vcmp.lt.s32.totalorder %v2546_v25, 3  ;;  %vm2420_vm1 = vcmp.lt.s32.totalorder %v9156_v47, 2  ;;  %vm2568_vm4 = vcmp.lt.s32.totalorder %v2546_v25, 4 }
 0x1ae   :  { %v2564_v21 = vor.u32 %v2563_v20, %v2562_v27  ;;  %v2569_v22 = vsel %vm2565_vm2, %v2549_v35, %v2552_v55  ;;  %v2573_v57 = vsel %vm2565_vm2, %v2552_v55, %v2555_v9  ;;  %vm2417_vm10 = vweird.f32 %v8845_v40 }
 0x1af   :  { %vm6999_vm0 = vcmp.lt.s32.totalorder %v6998_v19, 0  ;;  %v2570_v38 = vsel %vm2568_vm4, %v2558_v0, 2102212464  ;;  %v2574_v23 = vsel %vm2568_vm4, %v2561_v1, 920167782  ;;  %v2577_v44 = vsel %vm2565_vm2, %v2555_v9, %v2558_v0 }
 0x1b0   :  { %v2500_v42 = vsel %vm6999_vm0, 0, %v6998_v19  ;;  %v2571_v30 = vsel %vm2567_vm9, %v2555_v9, %v2570_v38  ;;  %v2575_v36 = vsel %vm2567_vm9, %v2558_v0, %v2574_v23  ;;  %v2578_v43 = vsel %vm2568_vm4, %v2564_v21, 1326507024 }
 0x1b1   :  { %v2501_v58 = vsub.s32 32, %v2500_v42  ;;  %v2502_v50 = vshll.u32 %v9163_v48, %v2500_v42  ;;  %v2505_v52 = vsub.s32 4294967266, %v2500_v42  ;;  %v9209_v51 = vsel %vm9180_vm12, 0, %v2516_v31 }
 0x1b2   :  { %v2572_v35 = vsel %vm2566_vm3, %v2569_v22, %v2571_v30  ;;  %v2576_v55 = vsel %vm2566_vm3, %v2573_v57, %v2575_v36  ;;  %v2579_v12 = vsel %vm2567_vm9, %v2561_v1, %v2578_v43  ;;  %v11270_v10 = vxor.u32 2147483648, %v8807_v13  ;;  %v9226_v19 = vpop.eup %7402 }
 0x1b3   :  { %v2503_v0 = vshrl.u32 %v9159_v3, %v2501_v58  ;;  %v2506_v48 = vadd.s32 127, %v2505_v52  ;;  %v2580_v27 = vsel %vm2566_vm3, %v2577_v44, %v2579_v12  ;;  %v11271_v31 = vxor.u32 2147483648, %v8797_v59 }
 0x1b4   :  { %v2846_v9 = vsel %vm2844_vm5, %v8797_v59, %v11270_v10  ;;  %v9229_v1 = vmul.u32.u64.low %v9161_v34, %v2580_v27  ;;  %v9230_v21 = vmul.u32.u64.high %v9161_v34, %v2580_v27, %v9229_v1  ;;  %v9237_v3 = vpop.eup %7404  ;;  %v2425_v25 = vxor.u32 2147483648, %v9226_v19 }
 0x1b5   :  { %v2849_v20 = vsel %vm2847_vm15, %v11271_v31, %v8807_v13  ;;  %v9233_v22 = vmul.u32.u64.low %v9161_v34, %v2576_v55  ;;  %v9234_v57 = vmul.u32.u64.high %v9161_v34, %v2576_v55, %v9233_v22  ;;  %v2504_v38 = vor.u32 %v2503_v0, %v2502_v50 }
 0x1b6   :  { %v2507_v59 = vshll.u32 %v2506_v48, 23  ;;  %v2850_v13 = vsel %vm2843_vm7, %v2846_v9, %v2849_v20  ;;  %v2422_v23 = vxor.u32 2147483648, %v9237_v3  ;;  %v2588_v44 = vmul.u32 %v9161_v34, %v2572_v35 }
 0x1b7   :  { %v2851_v42 = vsel %vm2001_vm8, nan, %v2850_v13  ;;  %vm2947_vm0 = vcmp.eq.s32.totalorder %v9169_v54, 0  ;;  %v2426_v30 = vsel %vm2424_vm14, %v2425_v25, %v9237_v3  ;;  %v2511_v43 = vcvt.s32.f32 %v2504_v38 }
 0x1b8   :  { %v2508_v36 = vor.u32 4788187, %v2507_v59  ;;  %7045 = vst [vmem:[%s11174_s1 + $0xa8] sm:$0xff] %v2851_v42  ;;  %vm2946_vm5 = vcmp.lt.s32.totalorder %v9169_v54, 2  ;;  %v2423_v37 = vsel %vm2421_vm11, %v9226_v19, %v2422_v23  ;;  %vm2590_vm8 = vc.u32 %v9230_v21, %v9233_v22 }
 0x1b9   :  { %v2591_v34 = vadd.s32 1, %v9234_v57  ;;  %v11272_v28 = vxor.u32 2147483648, %v8906_v60  ;;  %v2427_v50 = vsel %vm2420_vm1, %v2423_v37, %v2426_v30  ;;  %vm2950_vm7 = vcmp.eq.s32.totalorder %v9169_v54, 2 }
 0x1ba   :  { %v2509_v52 = vand.u32 2147483647, %v2508_v36  ;;  %v3048_v35 = vand.u32 3, %v8890_v24  ;;  %v2428_v55 = vsel %vm2417_vm10, nan, %v2427_v50  ;;  %v11273_v10 = vxor.u32 2147483648, %v8902_v2 }
 0x1bb   :  { %v2949_v58 = vsel %vm2947_vm0, %v8902_v2, %v11272_v28  ;;  %v2592_v12 = vsel %vm2590_vm8, %v2591_v34, %v9234_v57  ;;  %v3151_v0 = vand.u32 3, %v8977_v16  ;;  %7009 = vst [vmem:[%s11174_s1 + $0x128] sm:$0xff] %v2428_v55  ;;  %v11274_v16 = vxor.u32 2147483648, %v9011_v26 }
 0x1bc   :  { %v2952_v9 = vsel %vm2950_vm7, %v11273_v10, %v8906_v60  ;;  %v2512_v47 = vmul.f32 %v2511_v43, %v2509_v52  ;;  %v2593_v48 = vadd.s32 %v2592_v12, %v2588_v44  ;;  %vm3049_vm15 = vcmp.lt.s32.totalorder %v3048_v35, 2 }
 0x1bd   :  { %v2953_v24 = vsel %vm2946_vm5, %v2949_v58, %v2952_v9  ;;  %vm3050_vm14 = vcmp.eq.s32.totalorder %v3048_v35, 0  ;;  %vm3053_vm11 = vcmp.eq.s32.totalorder %v3048_v35, 2  ;;  %vm3152_vm2 = vcmp.lt.s32.totalorder %v3151_v0, 2 }
 0x1be   :  { %v2954_v27 = vsel %vm2105_vm13, nan, %v2953_v24  ;;  %v2513_v2 = vxor.u32 2147483648, %v2512_v47  ;;  %v2594_v60 = vadd.s32 536870912, %v2593_v48  ;;  %v3052_v31 = vsel %vm3050_vm14, %v9004_v32, %v11274_v16 }
 0x1bf   :  { %7046 = vst [vmem:[%s11174_s1 + $0xb0] sm:$0x3] %v2954_v27  ;;  %v11275_v54 = vxor.u32 2147483648, %v9004_v32  ;;  %vm3153_vm3 = vcmp.eq.s32.totalorder %v3151_v0, 0  ;;  %vm3156_vm13 = vcmp.eq.s32.totalorder %v3151_v0, 2  ;;  %v3254_v33 = vand.u32 3, %v9084_v63 }
 0x1c0   :  { %v2514_v57 = vsel %vm2431_vm6, %v2513_v2, %v2512_v47  ;;  %v2595_v38 = vshrl.u32 %v2594_v60, 30  ;;  %vm11276_vm9 = vweird.f32 %v8636_v61  ;;  %v3155_v13 = vsel %vm3153_vm3, %v9117_v29, %v2318_v14  ;;  %v3480_v14 = vld [vmem:[#allocation2 + $0x2] ss:$4 sm:$0x3] }
 0x1c1   :  { %v3055_v20 = vsel %vm3053_vm11, %v11275_v54, %v9011_v26  ;;  %v2517_v32 = vsel %vm9180_vm12, %v8711_v11, %v2514_v57  ;;  %v2522_v26 = vadd.s32 3, %v9209_v51  ;;  %v3158_v63 = vsel %vm3156_vm13, %v2321_v39, %v9120_v53 }
 0x1c2   :  { %v3056_v1 = vsel %vm3049_vm15, %v3052_v31, %v3055_v20  ;;  %vm3256_vm6 = vcmp.eq.s32.totalorder %v3254_v33, 0  ;;  %7406 = vcosq.f32 %v2517_v32  ;;  %v2596_v61 = vshll.u32 %v2595_v38, 30 }
 0x1c3   :  { %v3057_v59 = vsel %vm11276_vm9, nan, %v3056_v1  ;;  %v3159_v44 = vsel %vm3152_vm2, %v3155_v13, %v3158_v63  ;;  %vm3255_vm1 = vcmp.lt.s32.totalorder %v3254_v33, 2  ;;  %7408 = vsinq.f32 %v2517_v32 }
 0x1c4   :  { %7047 = vst [vmem:[%s11174_s1 + $0xb8] sm:$0x3] %v3057_v59  ;;  %vm11277_vm12 = vweird.f32 %v8702_v56  ;;  %v3258_v42 = vsel %vm3256_vm6, %v9226_v19, %v2422_v23  ;;  %vm3259_vm4 = vcmp.eq.s32.totalorder %v3254_v33, 2  ;;  %v2597_v30 = vsub.s32 %v2593_v48, %v2596_v61 }
 0x1c5   :  { %v3160_v4 = vsel %vm11277_vm12, nan, %v3159_v44  ;;  %v3261_v29 = vsel %vm3259_vm4, %v2425_v25, %v9237_v3  ;;  %v2619_v53 = vsub.s32 4, %v2595_v38  ;;  %v9321_v36 = vrot.slane %v3480_v14, %v7534_v5 }
 0x1c6   :  { %7048 = vst [vmem:[%s11174_s1 + $0x1a0] sm:$0xff] %v3160_v4  ;;  %v3262_v39 = vsel %vm3255_vm1, %v3258_v42, %v3261_v29  ;;  %v2523_v43 = vand.u32 3, %v2522_v26  ;;  %v2599_v56 = vsub.s32 0, %v2597_v30  ;;  %v9326_v37 = vrot.slane %v3480_v14, %v7536_v6 }
 0x1c7   :  { %v3263_v23 = vsel %vm2417_vm10, nan, %v3262_v39  ;;  %v9333_v19 = vmul.f32 %v9321_v36, %v7542_v18  ;;  %vm2535_vm0 = vcmp.lt.s32.totalorder %v9080_v46, 0  ;;  %v3357_v25 = vand.u32 3, %v9209_v51 }
 0x1c8   :  { %7049 = vst [vmem:[%s11174_s1 + $0x1a8] sm:$0xff] %v3263_v23  ;;  %v7001_v3 = vmin.u32 %v2599_v56, %v2597_v30  ;;  %vm2521_vm5 = vweird.f32 %v8711_v11  ;;  %v2620_v40 = vsel %vm2535_vm0, %v2619_v53, %v2595_v38  ;;  %vm2524_vm10 = vcmp.lt.s32.totalorder %v2523_v43, 2 }
 0x1c9   :  { %v3513_v34 = vand.u32 2147483647, %v9333_v19  ;;  %vm9343_vm8 = vcmp.le.f32.partialorder %v2533_v41, 0.7853982  ;;  %v9349_v50 = vmul.f32 %v9326_v37, %v7542_v18  ;;  %vm2525_vm7 = vcmp.eq.s32.totalorder %v2523_v43, 0 }
 0x1ca   :  { %v2601_v58 = vclz %v7001_v3  ;;  %vm2528_vm15 = vcmp.eq.s32.totalorder %v2523_v43, 2  ;;  %v2589_v51 = vadd.s32 %v9233_v22, %v9230_v21  ;;  %v3516_v52 = vand.u32 2139095040, %v9333_v19 }
 0x1cb   :  { %v2622_v41 = vsel %vm9343_vm8, 0, %v2620_v40  ;;  %vm3358_vm14 = vcmp.lt.s32.totalorder %v3357_v25, 2  ;;  %vm3362_vm11 = vcmp.eq.s32.totalorder %v3357_v25, 2  ;;  %vm3359_vm2 = vcmp.eq.s32.totalorder %v3357_v25, 0 }
 0x1cc   :  { %v7407_v35 = vpop.eup %7406  ;;  %v7002_v55 = vadd.s32 4294967294, %v2601_v58  ;;  %v3517_v9 = vshrl.u32 %v3516_v52, 23  ;;  %v3520_v0 = vand.u32 8388607, %v3513_v34  ;;  %v3617_v21 = vand.u32 2147483647, %v9349_v50 }
 0x1cd   :  { %v7409_v12 = vpop.eup %7408  ;;  %v2529_v10 = vxor.u32 2147483648, %v7407_v35  ;;  %v3620_v22 = vand.u32 2139095040, %v9349_v50  ;;  %v2626_v26 = vadd.s32 3, %v2622_v41  ;;  %v9375_v42 = vand.u32 3, %v2622_v41 }
 0x1ce   :  { %v2526_v47 = vxor.u32 2147483648, %v7409_v12  ;;  %vm7003_vm3 = vcmp.lt.s32.totalorder %v7002_v55, 0  ;;  %v7052_v2 = vadd.s32 4294967169, %v3517_v9  ;;  %v3521_v33 = vor.u32 8388608, %v3520_v0 }
 0x1cf   :  { %v2530_v48 = vsel %vm2528_vm15, %v2529_v10, %v7409_v12  ;;  %v2604_v24 = vsel %vm7003_vm3, 0, %v7002_v55  ;;  %v3364_v27 = vsel %vm3362_vm11, %v2529_v10, %v7409_v12  ;;  %v3621_v4 = vshrl.u32 %v3620_v22, 23 }
 0x1d0   :  { %v2527_v60 = vsel %vm2525_vm7, %v7407_v35, %v2526_v47  ;;  %v2605_v16 = vsub.s32 32, %v2604_v24  ;;  %v2606_v31 = vshll.u32 %v2597_v30, %v2604_v24  ;;  %v2609_v54 = vsub.s32 4294967266, %v2604_v24 }
 0x1d1   :  { %v2531_v20 = vsel %vm2524_vm10, %v2527_v60, %v2530_v48  ;;  %v3361_v1 = vsel %vm3359_vm2, %v7407_v35, %v2526_v47  ;;  %v3523_v57 = vadd.s32 1, %v7052_v2  ;;  %v9379_v53 = vmul.f32 %v9321_v36, %v7540_v17 }
 0x1d2   :  { %v2532_v38 = vsel %vm2521_vm5, nan, %v2531_v20  ;;  %v2607_v59 = vshrl.u32 %v2589_v51, %v2605_v16  ;;  %v2610_v13 = vadd.s32 127, %v2609_v54  ;;  %v3365_v32 = vsel %vm3358_vm14, %v3361_v1, %v3364_v27 }
 0x1d3   :  { %7010 = vst [vmem:[%s11174_s1 + $0x130] sm:$0x3] %v2532_v38  ;;  %v3366_v63 = vsel %vm2521_vm5, nan, %v3365_v32  ;;  %vm3524_vm13 = vcmp.gt.s32.totalorder %v3523_v57, 0  ;;  %v9381_v43 = vshll.u32 %v3521_v33, 8  ;;  %v7056_v52 = vadd.s32 4294967169, %v3621_v4 }
 0x1d4   :  { %v2608_v61 = vor.u32 %v2607_v59, %v2606_v31  ;;  %v2611_v44 = vshll.u32 %v2610_v13, 23  ;;  %7050 = vst [vmem:[%s11174_s1 + $0x1b0] sm:$0x3] %v3366_v63  ;;  %v3525_v14 = vsel %vm3524_vm13, %v3523_v57, 0  ;;  %v9385_v56 = vand.u32 8388607, %v3617_v21 }
 0x1d5   :  { %v3526_v30 = vshrl.u32 %v3525_v14, 5  ;;  %v3527_v29 = vand.u32 31, %v3525_v14  ;;  %v9409_v32 = vand.u32 3, %v2626_v26  ;;  %v3627_v28 = vadd.s32 1, %v7056_v52 }
 0x1d6   :  { %v2612_v39 = vor.u32 4788187, %v2611_v44  ;;  %v2615_v11 = vcvt.s32.f32 %v2608_v61  ;;  %v3625_v26 = vor.u32 8388608, %v9385_v56  ;;  %vm3461_vm5 = vcmp.lt.s32.totalorder %v9375_v42, 2 }
 0x1d7   :  { %v3528_v23 = vsub.s32 32, %v3527_v29  ;;  %v3530_v3 = vshll.u32 %v11266_v49, %v3527_v29  ;;  %v3533_v25 = vshll.u32 %v11237_v45, %v3527_v29  ;;  %v3536_v40 = vshll.u32 %v11238_v7, %v3527_v29 }
 0x1d8   :  { %v2613_v58 = vand.u32 2147483647, %v2612_v39  ;;  %v3539_v51 = vshll.u32 %v11242_v15, %v3527_v29  ;;  %v3542_v36 = vshll.u32 %v7510_v62, %v3527_v29  ;;  %vm3545_vm9 = vcmp.lt.s32.totalorder %v3526_v30, 1 }
 0x1d9   :  { %v3531_v35 = vshrl.u32 %v11237_v45, %v3528_v23  ;;  %v3534_v55 = vshrl.u32 %v11238_v7, %v3528_v23  ;;  %v3537_v41 = vshrl.u32 %v11242_v15, %v3528_v23  ;;  %v3529_v10 = vshrl.u32 %v11266_v49, %v3528_v23 }
 0x1da   :  { %v2616_v12 = vmul.f32 %v2615_v11, %v2613_v58  ;;  %v3540_v9 = vshrl.u32 %v7510_v62, %v3528_v23  ;;  %v3543_v0 = vshrl.u32 %v11211_v8, %v3528_v23  ;;  %vm3547_vm6 = vcmp.lt.s32.totalorder %v3526_v30, 3 }
 0x1db   :  { %v3532_v47 = vor.u32 %v3531_v35, %v3530_v3  ;;  %v3535_v22 = vor.u32 %v3534_v55, %v3533_v25  ;;  %v3538_v48 = vor.u32 %v3537_v41, %v3536_v40  ;;  %vm3548_vm1 = vcmp.lt.s32.totalorder %v3526_v30, 4 }
 0x1dc   :  { %v2617_v24 = vxor.u32 2147483648, %v2616_v12  ;;  %v3541_v27 = vor.u32 %v3540_v9, %v3539_v51  ;;  %v3544_v2 = vor.u32 %v3543_v0, %v3542_v36  ;;  %vm3546_vm12 = vcmp.lt.s32.totalorder %v3526_v30, 2 }
 0x1dd   :  { %v3550_v60 = vsel %vm3548_vm1, %v3538_v48, 2102212464  ;;  %v3553_v16 = vsel %vm3545_vm9, %v3532_v47, %v3535_v22  ;;  %v3557_v31 = vsel %vm3545_vm9, %v3535_v22, %v3538_v48  ;;  %v3549_v20 = vsel %vm3545_vm9, %v3529_v10, %v3532_v47 }
 0x1de   :  { %v2618_v54 = vsel %vm2535_vm0, %v2617_v24, %v2616_v12  ;;  %v3554_v1 = vsel %vm3548_vm1, %v3541_v27, 920167782  ;;  %v3558_v33 = vsel %vm3548_vm1, %v3544_v2, 1326507024  ;;  %v3551_v38 = vsel %vm3547_vm6, %v3535_v22, %v3550_v60 }
 0x1df   :  { %v2621_v57 = vsel %vm9343_vm8, %v9080_v46, %v2618_v54  ;;  %v3555_v59 = vsel %vm3547_vm6, %v3538_v48, %v3554_v1  ;;  %v3559_v13 = vsel %vm3547_vm6, %v3541_v27, %v3558_v33  ;;  %v3552_v4 = vsel %vm3546_vm12, %v3549_v20, %v3551_v38 }
 0x1e0   :  { %7410 = vcosq.f32 %v2621_v57  ;;  %v3556_v63 = vsel %vm3546_vm12, %v3553_v16, %v3555_v59  ;;  %v3560_v61 = vsel %vm3546_vm12, %v3557_v31, %v3559_v13  ;;  %vm3628_vm4 = vcmp.gt.s32.totalorder %v3627_v28, 0 }
 0x1e1   :  { %7412 = vsinq.f32 %v2621_v57  ;;  %v9414_v44 = vmul.u32.u64.low %v9381_v43, %v3560_v61  ;;  %v9415_v14 = vmul.u32.u64.high %v9381_v43, %v3560_v61, %v9414_v44  ;;  %v3724_v11 = vand.u32 2139095040, %v9379_v53 }
 0x1e2   :  { %v9419_v29 = vmul.u32.u64.low %v9381_v43, %v3556_v63  ;;  %v9420_v39 = vmul.u32.u64.high %v9381_v43, %v3556_v63, %v9419_v29  ;;  %vm2628_vm0 = vcmp.lt.s32.totalorder %v9409_v32, 2  ;;  %vm3462_vm10 = vcmp.eq.s32.totalorder %v9375_v42, 0 }
 0x1e3   :  { %vm3465_vm8 = vcmp.eq.s32.totalorder %v9375_v42, 2  ;;  %v3629_v30 = vsel %vm3628_vm4, %v3627_v28, 0  ;;  %vm2625_vm7 = vweird.f32 %v9080_v46  ;;  %vm2629_vm15 = vcmp.eq.s32.totalorder %v9409_v32, 0 }
 0x1e4   :  { %v3568_v23 = vmul.u32 %v9381_v43, %v3552_v4  ;;  %vm3570_vm14 = vc.u32 %v9415_v14, %v9419_v29  ;;  %v3631_v56 = vand.u32 31, %v3629_v30  ;;  %vm2632_vm11 = vcmp.eq.s32.totalorder %v9409_v32, 2 }
 0x1e5   :  { %v3571_v3 = vadd.s32 1, %v9420_v39  ;;  %v9436_v25 = vshrl.u32 %v3629_v30, 5  ;;  %v9438_v40 = vshll.u32 %v3625_v26, 8  ;;  %v3721_v36 = vand.u32 2147483647, %v9379_v53 }
 0x1e6   :  { %v3632_v58 = vsub.s32 32, %v3631_v56  ;;  %v3634_v51 = vshll.u32 %v11266_v49, %v3631_v56  ;;  %v3725_v52 = vshrl.u32 %v3724_v11, 23  ;;  %v3637_v35 = vshll.u32 %v11237_v45, %v3631_v56 }
 0x1e7   :  { %v3572_v43 = vsel %vm3570_vm14, %v3571_v3, %v9420_v39  ;;  %v3640_v55 = vshll.u32 %v11238_v7, %v3631_v56  ;;  %v3643_v41 = vshll.u32 %v11242_v15, %v3631_v56  ;;  %v3646_v0 = vshll.u32 %v7510_v62, %v3631_v56 }
 0x1e8   :  { %v3573_v12 = vadd.s32 %v3572_v43, %v3568_v23  ;;  %v3635_v10 = vshrl.u32 %v11237_v45, %v3632_v58  ;;  %v3638_v9 = vshrl.u32 %v11238_v7, %v3632_v58  ;;  %v3641_v22 = vshrl.u32 %v11242_v15, %v3632_v58 }
 0x1e9   :  { %v3644_v48 = vshrl.u32 %v7510_v62, %v3632_v58  ;;  %v3647_v24 = vshrl.u32 %v11211_v8, %v3632_v58  ;;  %vm3649_vm2 = vcmp.lt.s32.totalorder %v9436_v25, 1  ;;  %v3633_v16 = vshrl.u32 %v11266_v49, %v3632_v58 }
 0x1ea   :  { %v7411_v47 = vpop.eup %7410  ;;  %v3574_v60 = vadd.s32 536870912, %v3573_v12  ;;  %vm3650_vm3 = vcmp.lt.s32.totalorder %v9436_v25, 2  ;;  %v3636_v54 = vor.u32 %v3635_v10, %v3634_v51  ;;  %v3639_v20 = vor.u32 %v3638_v9, %v3637_v35 }
 0x1eb   :  { %v7413_v27 = vpop.eup %7412  ;;  %v2633_v2 = vxor.u32 2147483648, %v7411_v47  ;;  %v3642_v1 = vor.u32 %v3641_v22, %v3640_v55  ;;  %v3645_v59 = vor.u32 %v3644_v48, %v3643_v41  ;;  %v3648_v61 = vor.u32 %v3647_v24, %v3646_v0 }
 0x1ec   :  { %v2630_v31 = vxor.u32 2147483648, %v7413_v27  ;;  %v3575_v38 = vshrl.u32 %v3574_v60, 30  ;;  %vm3652_vm13 = vcmp.lt.s32.totalorder %v9436_v25, 4  ;;  %vm3651_vm9 = vcmp.lt.s32.totalorder %v9436_v25, 3 }
 0x1ed   :  { %v2634_v33 = vsel %vm2632_vm11, %v2633_v2, %v7413_v27  ;;  %v3467_v57 = vsel %vm3465_vm8, %v2633_v2, %v7413_v27  ;;  %v3654_v11 = vsel %vm3652_vm13, %v3642_v1, 2102212464  ;;  %v3657_v30 = vsel %vm3649_vm2, %v3636_v54, %v3639_v20  ;;  %v9515_v2 = vld [vmem:[#allocation2 + $0xa] ss:$4 sm:$0x3] }
 0x1ee   :  { %v2631_v13 = vsel %vm2629_vm15, %v7411_v47, %v2630_v31  ;;  %v3464_v63 = vsel %vm3462_vm10, %v7411_v47, %v2630_v31  ;;  %v3576_v4 = vshll.u32 %v3575_v38, 30  ;;  %v3658_v32 = vsel %vm3652_vm13, %v3645_v59, 920167782 }
 0x1ef   :  { %v2635_v44 = vsel %vm2628_vm0, %v2631_v13, %v2634_v33  ;;  %v3468_v28 = vsel %vm3461_vm5, %v3464_v63, %v3467_v57  ;;  %v7060_v46 = vadd.s32 4294967169, %v3725_v52  ;;  %v3653_v23 = vsel %vm3649_vm2, %v3633_v16, %v3636_v54 }
 0x1f0   :  { %v2636_v39 = vsel %vm2625_vm7, nan, %v2635_v44  ;;  %v3469_v26 = vsel %vm2625_vm7, nan, %v3468_v28  ;;  %v3577_v42 = vsub.s32 %v3573_v12, %v3576_v4  ;;  %v3655_v56 = vsel %vm3651_vm9, %v3639_v20, %v3654_v11 }
 0x1f1   :  { %7011 = vst [vmem:[%s11174_s1 + $0x138] sm:$0x3] %v2636_v39  ;;  %7051 = vst [vmem:[%s11174_s1 + $0x1b8] sm:$0x3] %v3469_v26  ;;  %v3659_v3 = vsel %vm3651_vm9, %v3642_v1, %v3658_v32  ;;  %v3661_v58 = vsel %vm3649_vm2, %v3639_v20, %v3642_v1  ;;  %v3662_v35 = vsel %vm3652_vm13, %v3648_v61, 1326507024  ;;  %v3656_v0 = vsel %vm3650_vm3, %v3653_v23, %v3655_v56 }
 0x1f2   :  { %v3579_v51 = vsub.s32 0, %v3577_v42  ;;  %v3660_v43 = vsel %vm3650_vm3, %v3657_v30, %v3659_v3  ;;  %v3728_v52 = vand.u32 8388607, %v3721_v36  ;;  %v3599_v55 = vsub.s32 4, %v3575_v38 }
 0x1f3   :  { %v3663_v41 = vsel %vm3651_vm9, %v3645_v59, %v3662_v35  ;;  %v9502_v12 = vmul.u32.u64.low %v9438_v40, %v3660_v43  ;;  %v9503_v10 = vmul.u32.u64.high %v9438_v40, %v3660_v43, %v9502_v12  ;;  %v3731_v22 = vadd.s32 1, %v7060_v46 }
 0x1f4   :  { %v7053_v9 = vmin.u32 %v3579_v51, %v3577_v42  ;;  %v3664_v47 = vsel %vm3650_vm3, %v3661_v58, %v3663_v41  ;;  %vm3515_vm6 = vcmp.lt.s32.totalorder %v9333_v19, 0  ;;  %v3672_v60 = vmul.u32 %v9438_v40, %v3656_v0 }
 0x1f5   :  { %v9511_v48 = vmul.u32.u64.low %v9438_v40, %v3664_v47  ;;  %v9512_v24 = vmul.u32.u64.high %v9438_v40, %v3664_v47, %v9511_v48  ;;  %v3675_v16 = vadd.s32 1, %v9503_v10  ;;  %vm3732_vm1 = vcmp.gt.s32.totalorder %v3731_v22, 0 }
 0x1f6   :  { %v3581_v27 = vclz %v7053_v9  ;;  %v9521_v31 = vmul.f32 %v9326_v37, %v7540_v17  ;;  %v3600_v54 = vsel %vm3515_vm6, %v3599_v55, %v3575_v38  ;;  %v3729_v20 = vor.u32 8388608, %v3728_v52 }
 0x1f7   :  { %v3733_v1 = vsel %vm3732_vm1, %v3731_v22, 0  ;;  %vm9527_vm12 = vcmp.le.f32.partialorder %v3513_v34, 0.7853982  ;;  %vm3674_vm4 = vc.u32 %v9512_v24, %v9502_v12  ;;  %v9535_v37 = vrot.slane %v9515_v2, %v7534_v5 }
 0x1f8   :  { %v7054_v25 = vadd.s32 4294967294, %v3581_v27  ;;  %v3735_v40 = vand.u32 31, %v3733_v1  ;;  %v3569_v57 = vadd.s32 %v9419_v29, %v9415_v14  ;;  %v3676_v38 = vsel %vm3674_vm4, %v3675_v16, %v9503_v10 }
 0x1f9   :  { %v3825_v59 = vand.u32 2147483647, %v9521_v31  ;;  %v9543_v13 = vsel %vm9527_vm12, 0, %v3600_v54  ;;  %v3677_v63 = vadd.s32 %v3676_v38, %v3672_v60  ;;  %v9545_v39 = vshll.u32 %v3729_v20, 8 }
 0x1fa   :  { %vm7055_vm0 = vcmp.lt.s32.totalorder %v7054_v25, 0  ;;  %v3736_v61 = vsub.s32 32, %v3735_v40  ;;  %v3734_v11 = vshrl.u32 %v3733_v1, 5  ;;  %v3738_v14 = vshll.u32 %v11266_v49, %v3735_v40 }
 0x1fb   :  { %v3584_v34 = vsel %vm7055_vm0, 0, %v7054_v25  ;;  %v3678_v26 = vadd.s32 536870912, %v3677_v63  ;;  %v3741_v46 = vshll.u32 %v11237_v45, %v3735_v40  ;;  %v3744_v3 = vshll.u32 %v11238_v7, %v3735_v40 }
 0x1fc   :  { %v3585_v44 = vsub.s32 32, %v3584_v34  ;;  %v3586_v28 = vshll.u32 %v3577_v42, %v3584_v34  ;;  %v3589_v4 = vsub.s32 4294967266, %v3584_v34  ;;  %v3739_v29 = vshrl.u32 %v11237_v45, %v3736_v61 }
 0x1fd   :  { %v3742_v23 = vshrl.u32 %v11238_v7, %v3736_v61  ;;  %v3679_v56 = vshrl.u32 %v3678_v26, 30  ;;  %v3745_v42 = vshrl.u32 %v11242_v15, %v3736_v61  ;;  %v3747_v58 = vshll.u32 %v11242_v15, %v3735_v40 }
 0x1fe   :  { %v3587_v30 = vshrl.u32 %v3569_v57, %v3585_v44  ;;  %v3590_v32 = vadd.s32 127, %v3589_v4  ;;  %vm3619_vm5 = vcmp.lt.s32.totalorder %v9349_v50, 0  ;;  %v3748_v35 = vshrl.u32 %v7510_v62, %v3736_v61 }
 0x1ff   :  { %v3828_v52 = vand.u32 2139095040, %v9521_v31  ;;  %v3680_v55 = vshll.u32 %v3679_v56, 30  ;;  %v3740_v41 = vor.u32 %v3739_v29, %v3738_v14  ;;  %v3750_v10 = vshll.u32 %v7510_v62, %v3735_v40 }
 0x200   :  { %v3588_v51 = vor.u32 %v3587_v30, %v3586_v28  ;;  %v3591_v43 = vshll.u32 %v3590_v32, 23  ;;  %v3751_v9 = vshrl.u32 %v11211_v8, %v3736_v61  ;;  %v3743_v22 = vor.u32 %v3742_v23, %v3741_v46 }
 0x201   :  { %v3749_v48 = vor.u32 %v3748_v35, %v3747_v58  ;;  %v9559_v27 = vsub.s32 %v3677_v63, %v3680_v55  ;;  %v3737_v60 = vshrl.u32 %v11266_v49, %v3736_v61  ;;  %v3746_v16 = vor.u32 %v3745_v42, %v3744_v3 }
 0x202   :  { %v3592_v0 = vor.u32 4788187, %v3591_v43  ;;  %v3595_v47 = vcvt.s32.f32 %v3588_v51  ;;  %vm3753_vm10 = vcmp.lt.s32.totalorder %v3734_v11, 1  ;;  %vm9564_vm8 = vcmp.le.f32.partialorder %v3617_v21, 0.7853982 }
 0x203   :  { %v3752_v20 = vor.u32 %v3751_v9, %v3750_v10  ;;  %vm3755_vm7 = vcmp.lt.s32.totalorder %v3734_v11, 3  ;;  %vm3756_vm15 = vcmp.lt.s32.totalorder %v3734_v11, 4  ;;  %v3683_v1 = vsub.s32 0, %v9559_v27 }
 0x204   :  { %v3593_v25 = vand.u32 2147483647, %v3592_v0  ;;  %v3703_v40 = vsub.s32 4, %v3679_v56  ;;  %vm3754_vm14 = vcmp.lt.s32.totalorder %v3734_v11, 2  ;;  %v3758_v57 = vsel %vm3756_vm15, %v3746_v16, 2102212464 }
 0x205   :  { %v3761_v34 = vsel %vm3753_vm10, %v3740_v41, %v3743_v22  ;;  %v3762_v63 = vsel %vm3756_vm15, %v3749_v48, 920167782  ;;  %v3829_v61 = vshrl.u32 %v3828_v52, 23  ;;  %v7057_v21 = vmin.u32 %v3683_v1, %v9559_v27 }
 0x206   :  { %v3596_v38 = vmul.f32 %v3595_v47, %v3593_v25  ;;  %v3757_v44 = vsel %vm3753_vm10, %v3737_v60, %v3740_v41  ;;  %v3759_v28 = vsel %vm3755_vm7, %v3743_v22, %v3758_v57  ;;  %v3763_v4 = vsel %vm3755_vm7, %v3746_v16, %v3762_v63 }
 0x207   :  { %v3764_v14 = vsel %vm3754_vm14, %v3761_v34, %v3763_v4  ;;  %v3765_v29 = vsel %vm3753_vm10, %v3743_v22, %v3746_v16  ;;  %v3766_v30 = vsel %vm3756_vm15, %v3752_v20, 1326507024  ;;  %v3606_v32 = vadd.s32 3, %v9543_v13 }
 0x208   :  { %v3597_v26 = vxor.u32 2147483648, %v3596_v38  ;;  %v3685_v46 = vclz %v7057_v21  ;;  %v3704_v23 = vsel %vm3619_vm5, %v3703_v40, %v3679_v56  ;;  %v3832_v3 = vand.u32 8388607, %v3825_v59 }
 0x209   :  { %v3767_v58 = vsel %vm3755_vm7, %v3749_v48, %v3766_v30  ;;  %v9588_v51 = vmul.u32.u64.low %v9545_v39, %v3764_v14  ;;  %v9589_v43 = vmul.u32.u64.high %v9545_v39, %v3764_v14, %v9588_v51  ;;  %v3760_v56 = vsel %vm3754_vm14, %v3757_v44, %v3759_v28 }
 0x20a   :  { %v3598_v42 = vsel %vm3515_vm6, %v3597_v26, %v3596_v38  ;;  %v7058_v52 = vadd.s32 4294967294, %v3685_v46  ;;  %v3768_v55 = vsel %vm3754_vm14, %v3765_v29, %v3767_v58  ;;  %v7064_v9 = vadd.s32 4294967169, %v3829_v61 }
 0x20b   :  { %v3601_v35 = vsel %vm9527_vm12, %v9333_v19, %v3598_v42  ;;  %v9598_v41 = vmul.u32.u64.low %v9545_v39, %v3768_v55  ;;  %v9599_v10 = vmul.u32.u64.high %v9545_v39, %v3768_v55, %v9598_v41  ;;  %v3673_v0 = vadd.s32 %v9502_v12, %v9512_v24 }
 0x20c   :  { %7414 = vcosq.f32 %v3601_v35  ;;  %vm7059_vm11 = vcmp.lt.s32.totalorder %v7058_v52, 0  ;;  %v9605_v33 = vsel %vm9564_vm8, 0, %v3704_v23  ;;  %v3776_v22 = vmul.u32 %v9545_v39, %v3760_v56 }
 0x20d   :  { %7416 = vsinq.f32 %v3601_v35  ;;  %v3688_v47 = vsel %vm7059_vm11, 0, %v7058_v52  ;;  %v3779_v11 = vadd.s32 1, %v9589_v43  ;;  %v3835_v48 = vadd.s32 1, %v7064_v9 }
 0x20e   :  { %v3607_v60 = vand.u32 3, %v3606_v32  ;;  %v3689_v16 = vsub.s32 32, %v3688_v47  ;;  %v3690_v25 = vshll.u32 %v9559_v27, %v3688_v47  ;;  %v3693_v20 = vsub.s32 4294967266, %v3688_v47 }
 0x20f   :  { %v3710_v1 = vadd.s32 3, %v9605_v33  ;;  %vm3778_vm2 = vc.u32 %v9599_v10, %v9588_v51  ;;  %v3833_v12 = vor.u32 8388608, %v3832_v3  ;;  %vm3836_vm3 = vcmp.gt.s32.totalorder %v3835_v48, 0 }
 0x210   :  { %v3691_v24 = vshrl.u32 %v3673_v0, %v3689_v16  ;;  %v3694_v40 = vadd.s32 127, %v3693_v20  ;;  %v3780_v57 = vsel %vm3778_vm2, %v3779_v11, %v9589_v43  ;;  %v3837_v39 = vsel %vm3836_vm3, %v3835_v48, 0 }
 0x211   :  { %vm3605_vm13 = vweird.f32 %v9333_v19  ;;  %v3781_v38 = vadd.s32 %v3780_v57, %v3776_v22  ;;  %v3839_v34 = vand.u32 31, %v3837_v39  ;;  %vm3608_vm9 = vcmp.lt.s32.totalorder %v3607_v60, 2 }
 0x212   :  { %vm3609_vm6 = vcmp.eq.s32.totalorder %v3607_v60, 0  ;;  %v3692_v27 = vor.u32 %v3691_v24, %v3690_v25  ;;  %v3695_v63 = vshll.u32 %v3694_v40, 23  ;;  %vm3612_vm1 = vcmp.eq.s32.totalorder %v3607_v60, 2 }
 0x213   :  { %v9615_v61 = vand.u32 3, %v3710_v1  ;;  %v3782_v21 = vadd.s32 536870912, %v3781_v38  ;;  %v3840_v44 = vsub.s32 32, %v3839_v34  ;;  %v9617_v26 = vshll.u32 %v3833_v12, 8 }
 0x214   :  { %v3696_v28 = vor.u32 4788187, %v3695_v63  ;;  %v3699_v4 = vcvt.s32.f32 %v3692_v27  ;;  %v9621_v14 = vmul.f32 %v9535_v37, %v7542_v18  ;;  %v3838_v32 = vshrl.u32 %v3837_v39, 5 }
 0x215   :  { %v9625_v30 = vshrl.u32 %v3782_v21, 30  ;;  %v3842_v46 = vshll.u32 %v11266_v49, %v3839_v34  ;;  %v3845_v23 = vshll.u32 %v11237_v45, %v3839_v34  ;;  %v3843_v43 = vshrl.u32 %v11237_v45, %v3840_v44 }
 0x216   :  { %v9623_v29 = vpop.eup %7414  ;;  %v3697_v58 = vand.u32 2147483647, %v3696_v28  ;;  %v3848_v35 = vshll.u32 %v11238_v7, %v3839_v34  ;;  %v3846_v55 = vshrl.u32 %v11238_v7, %v3840_v44  ;;  %v3851_v41 = vshll.u32 %v11242_v15, %v3839_v34 }
 0x217   :  { %v9629_v3 = vpop.eup %7416  ;;  %v11206_v42 = vxor.u32 2147483648, %v9623_v29  ;;  %v3784_v56 = vshll.u32 %v9625_v30, 30  ;;  %v3849_v47 = vshrl.u32 %v11242_v15, %v3840_v44  ;;  %v3852_v22 = vshrl.u32 %v7510_v62, %v3840_v44 }
 0x218   :  { %v11210_v52 = vxor.u32 2147483648, %v9629_v3  ;;  %v3700_v0 = vmul.f32 %v3699_v4, %v3697_v58  ;;  %v3777_v48 = vadd.s32 %v9588_v51, %v9599_v10  ;;  %v3841_v25 = vshrl.u32 %v11266_v49, %v3840_v44 }
 0x219   :  { %v3614_v9 = vsel %vm3612_vm1, %v11206_v42, %v9629_v3  ;;  %v9650_v16 = vsub.s32 %v3781_v38, %v3784_v56  ;;  %v3844_v12 = vor.u32 %v3843_v43, %v3842_v46  ;;  %v3854_v24 = vshll.u32 %v7510_v62, %v3839_v34 }
 0x21a   :  { %v3611_v11 = vsel %vm3609_vm6, %v9623_v29, %v11210_v52  ;;  %v3701_v1 = vxor.u32 2147483648, %v3700_v0  ;;  %v3847_v39 = vor.u32 %v3846_v55, %v3845_v23  ;;  %v3855_v27 = vshrl.u32 %v11211_v8, %v3840_v44 }
 0x21b   :  { %v3615_v20 = vsel %vm3608_vm9, %v3611_v11, %v3614_v9  ;;  %v3787_v57 = vsub.s32 0, %v9650_v16  ;;  %v3850_v10 = vor.u32 %v3849_v47, %v3848_v35  ;;  %v3853_v60 = vor.u32 %v3852_v22, %v3851_v41 }
 0x21c   :  { %v3616_v40 = vsel %vm3605_vm13, nan, %v3615_v20  ;;  %v3702_v51 = vsel %vm3619_vm5, %v3701_v1, %v3700_v0  ;;  %vm3857_vm12 = vcmp.lt.s32.totalorder %v3838_v32, 1  ;;  %vm3723_vm4 = vcmp.lt.s32.totalorder %v9379_v53, 0 }
 0x21d   :  { %7084 = vst [vmem:[%s11174_s1 + $0x40] sm:$0xff] %v3616_v40  ;;  %v3705_v38 = vsel %vm9564_vm8, %v9349_v50, %v3702_v51  ;;  %v7061_v34 = vmin.u32 %v3787_v57, %v9650_v16  ;;  %v3856_v63 = vor.u32 %v3855_v27, %v3854_v24  ;;  %v3932_v21 = vand.u32 2139095040, %v9621_v14 }
 0x21e   :  { %7418 = vcosq.f32 %v3705_v38  ;;  %vm3858_vm0 = vcmp.lt.s32.totalorder %v3838_v32, 2  ;;  %vm3859_vm10 = vcmp.lt.s32.totalorder %v3838_v32, 3  ;;  %vm3860_vm7 = vcmp.lt.s32.totalorder %v3838_v32, 4 }
 0x21f   :  { %7420 = vsinq.f32 %v3705_v38  ;;  %v3789_v44 = vclz %v7061_v34  ;;  %v3861_v28 = vsel %vm3857_vm12, %v3841_v25, %v3844_v12  ;;  %v3865_v4 = vsel %vm3857_vm12, %v3844_v12, %v3847_v39 }
 0x220   :  { %v3807_v54 = vsub.s32 4, %v9625_v30  ;;  %v3862_v46 = vsel %vm3860_vm7, %v3850_v10, 2102212464  ;;  %v3866_v23 = vsel %vm3860_vm7, %v3853_v60, 920167782  ;;  %v3869_v58 = vsel %vm3857_vm12, %v3847_v39, %v3850_v10 }
 0x221   :  { %v7062_v43 = vadd.s32 4294967294, %v3789_v44  ;;  %v3863_v35 = vsel %vm3859_vm10, %v3847_v39, %v3862_v46  ;;  %v3867_v56 = vsel %vm3859_vm10, %v3850_v10, %v3866_v23  ;;  %v3870_v55 = vsel %vm3860_vm7, %v3856_v63, 1326507024 }
 0x222   :  { %v3864_v41 = vsel %vm3858_vm0, %v3861_v28, %v3863_v35  ;;  %v3868_v9 = vsel %vm3858_vm0, %v3865_v4, %v3867_v56  ;;  %v3871_v0 = vsel %vm3859_vm10, %v3853_v60, %v3870_v55  ;;  %v3933_v47 = vshrl.u32 %v3932_v21, 23 }
 0x223   :  { %vm3709_vm5 = vweird.f32 %v9349_v50  ;;  %vm7063_vm8 = vcmp.lt.s32.totalorder %v7062_v43, 0  ;;  %v3872_v22 = vsel %vm3858_vm0, %v3869_v58, %v3871_v0  ;;  %vm9688_vm15 = vcmp.le.f32.partialorder %v3721_v36, 0.7853982 }
 0x224   :  { %v9682_v11 = vmul.u32.u64.low %v9617_v26, %v3868_v9  ;;  %v9683_v25 = vmul.u32.u64.high %v9617_v26, %v3868_v9, %v9682_v11  ;;  %v3792_v1 = vsel %vm7063_vm8, 0, %v7062_v43  ;;  %v7068_v39 = vadd.s32 4294967169, %v3933_v47 }
 0x225   :  { %v9693_v12 = vmul.u32.u64.low %v9617_v26, %v3872_v22  ;;  %v9694_v24 = vmul.u32.u64.high %v9617_v26, %v3872_v22, %v9693_v12  ;;  %v3793_v40 = vsub.s32 32, %v3792_v1  ;;  %v3794_v32 = vshll.u32 %v9650_v16, %v3792_v1 }
 0x226   :  { %v3797_v57 = vsub.s32 4294967266, %v3792_v1  ;;  %vm3712_vm14 = vcmp.lt.s32.totalorder %v9615_v61, 2  ;;  %v3808_v27 = vsel %vm3723_vm4, %v3807_v54, %v9625_v30  ;;  %v3880_v36 = vmul.u32 %v9617_v26, %v3864_v41 }
 0x227   :  { %v9704_v51 = vrot.slane %v9515_v2, %v7536_v6  ;;  %v3795_v10 = vshrl.u32 %v3777_v48, %v3793_v40  ;;  %v3883_v38 = vadd.s32 1, %v9683_v25  ;;  %v3939_v34 = vadd.s32 1, %v7068_v39 }
 0x228   :  { %v3798_v60 = vadd.s32 127, %v3797_v57  ;;  %v9707_v16 = vpop.eup %7418  ;;  %vm3713_vm11 = vcmp.eq.s32.totalorder %v9615_v61, 0  ;;  %vm3716_vm2 = vcmp.eq.s32.totalorder %v9615_v61, 2  ;;  %vm3882_vm3 = vc.u32 %v9694_v24, %v9682_v11 }
 0x229   :  { %v3929_v26 = vand.u32 2147483647, %v9621_v14  ;;  %v9714_v30 = vpop.eup %7420  ;;  %v11204_v2 = vxor.u32 2147483648, %v9707_v16  ;;  %v3796_v48 = vor.u32 %v3795_v10, %v3794_v32  ;;  %v3884_v21 = vsel %vm3882_vm3, %v3883_v38, %v9683_v25 }
 0x22a   :  { %v3799_v63 = vshll.u32 %v3798_v60, 23  ;;  %v11205_v44 = vxor.u32 2147483648, %v9714_v30  ;;  %v9721_v28 = vsel %vm9688_vm15, 0, %v3808_v27  ;;  %v3885_v4 = vadd.s32 %v3884_v21, %v3880_v36 }
 0x22b   :  { %vm3940_vm9 = vcmp.gt.s32.totalorder %v3939_v34, 0  ;;  %v3718_v54 = vsel %vm3716_vm2, %v11204_v2, %v9714_v30  ;;  %v3803_v23 = vcvt.s32.f32 %v3796_v48  ;;  %v3936_v9 = vand.u32 8388607, %v3929_v26 }
 0x22c   :  { %v3800_v46 = vor.u32 4788187, %v3799_v63  ;;  %v3941_v58 = vsel %vm3940_vm9, %v3939_v34, 0  ;;  %v3715_v43 = vsel %vm3713_vm11, %v9707_v16, %v11205_v44  ;;  %v3886_v35 = vadd.s32 536870912, %v3885_v4 }
 0x22d   :  { %v3943_v56 = vand.u32 31, %v3941_v58  ;;  %v3719_v55 = vsel %vm3712_vm14, %v3715_v43, %v3718_v54  ;;  %v9737_v0 = vmul.f32 %v9704_v51, %v7542_v18  ;;  %v3814_v22 = vadd.s32 3, %v9721_v28 }
 0x22e   :  { %v3801_v41 = vand.u32 2147483647, %v3800_v46  ;;  %v3720_v47 = vsel %vm3709_vm5, nan, %v3719_v55  ;;  %v3887_v25 = vshrl.u32 %v3886_v35, 30  ;;  %v3942_v12 = vshrl.u32 %v3941_v58, 5 }
 0x22f   :  { %v3944_v1 = vsub.s32 32, %v3943_v56  ;;  %7085 = vst [vmem:[%s11174_s1 + $0x48] sm:$0xff] %v3720_v47  ;;  %v3946_v40 = vshll.u32 %v11266_v49, %v3943_v56  ;;  %v3949_v32 = vshll.u32 %v11237_v45, %v3943_v56  ;;  %v3952_v27 = vshll.u32 %v11238_v7, %v3943_v56 }
 0x230   :  { %v3804_v61 = vmul.f32 %v3803_v23, %v3801_v41  ;;  %v3888_v57 = vshll.u32 %v3887_v25, 30  ;;  %v3955_v36 = vshll.u32 %v11242_v15, %v3943_v56  ;;  %v9753_v48 = vand.u32 3, %v3814_v22 }
 0x231   :  { %v3947_v39 = vshrl.u32 %v11237_v45, %v3944_v1  ;;  %v3950_v60 = vshrl.u32 %v11238_v7, %v3944_v1  ;;  %v3953_v38 = vshrl.u32 %v11242_v15, %v3944_v1  ;;  %v3956_v34 = vshrl.u32 %v7510_v62, %v3944_v1 }
 0x232   :  { %v3805_v10 = vxor.u32 2147483648, %v3804_v61  ;;  %v9755_v63 = vsub.s32 %v3885_v4, %v3888_v57  ;;  %v3937_v21 = vor.u32 8388608, %v3936_v9  ;;  %v4036_v54 = vand.u32 2139095040, %v9737_v0 }
 0x233   :  { %vm3827_vm6 = vcmp.lt.s32.totalorder %v9521_v31, 0  ;;  %v3945_v23 = vshrl.u32 %v11266_v49, %v3944_v1  ;;  %v3948_v58 = vor.u32 %v3947_v39, %v3946_v40  ;;  %v3958_v43 = vshll.u32 %v7510_v62, %v3943_v56 }
 0x234   :  { %v3806_v46 = vsel %vm3723_vm4, %v3805_v10, %v3804_v61  ;;  %v3891_v4 = vsub.s32 0, %v9755_v63  ;;  %v3951_v55 = vor.u32 %v3950_v60, %v3949_v32  ;;  %v3954_v41 = vor.u32 %v3953_v38, %v3952_v27 }
 0x235   :  { %v3809_v35 = vsel %vm9688_vm15, %v9379_v53, %v3806_v46  ;;  %v3957_v9 = vor.u32 %v3956_v34, %v3955_v36  ;;  %v3959_v47 = vshrl.u32 %v11211_v8, %v3944_v1  ;;  %vm3961_vm1 = vcmp.lt.s32.totalorder %v3942_v12, 1 }
 0x236   :  { %7422 = vcosq.f32 %v3809_v35  ;;  %vm9770_vm12 = vcmp.le.f32.partialorder %v3825_v59, 0.7853982  ;;  %v7065_v56 = vmin.u32 %v3891_v4, %v9755_v63  ;;  %v3977_v20 = vshll.u32 %v3937_v21, 8 }
 0x237   :  { %7424 = vsinq.f32 %v3809_v35  ;;  %v4037_v61 = vshrl.u32 %v4036_v54, 23  ;;  %v3911_v40 = vsub.s32 4, %v3887_v25  ;;  %v3960_v57 = vor.u32 %v3959_v47, %v3958_v43 }
 0x238   :  { %vm3963_vm4 = vcmp.lt.s32.totalorder %v3942_v12, 3  ;;  %vm3964_vm0 = vcmp.lt.s32.totalorder %v3942_v12, 4  ;;  %v3893_v32 = vclz %v7065_v56  ;;  %vm3962_vm10 = vcmp.lt.s32.totalorder %v3942_v12, 2 }
 0x239   :  { %v3965_v1 = vsel %vm3961_vm1, %v3945_v23, %v3948_v58  ;;  %v3969_v39 = vsel %vm3961_vm1, %v3948_v58, %v3951_v55  ;;  %vm3816_vm7 = vcmp.lt.s32.totalorder %v9753_v48, 2  ;;  %v3966_v59 = vsel %vm3964_vm0, %v3954_v41, 2102212464 }
 0x23a   :  { %v3970_v27 = vsel %vm3964_vm0, %v3957_v9, 920167782  ;;  %v3973_v36 = vsel %vm3961_vm1, %v3951_v55, %v3954_v41  ;;  %v3974_v10 = vsel %vm3964_vm0, %v3960_v57, 1326507024  ;;  %vm3813_vm8 = vweird.f32 %v9379_v53 }
 0x23b   :  { %v7066_v60 = vadd.s32 4294967294, %v3893_v32  ;;  %v3967_v38 = vsel %vm3963_vm4, %v3951_v55, %v3966_v59  ;;  %v3971_v34 = vsel %vm3963_vm4, %v3954_v41, %v3970_v27  ;;  %v3975_v21 = vsel %vm3963_vm4, %v3957_v9, %v3974_v10 }
 0x23c   :  { %v3881_v54 = vadd.s32 %v9682_v11, %v9694_v24  ;;  %v3972_v46 = vsel %vm3962_vm10, %v3969_v39, %v3971_v34  ;;  %v3976_v23 = vsel %vm3962_vm10, %v3973_v36, %v3975_v21  ;;  %v7072_v58 = vadd.s32 4294967169, %v4037_v61 }
 0x23d   :  { %vm7067_vm15 = vcmp.lt.s32.totalorder %v7066_v60, 0  ;;  %v3912_v43 = vsel %vm3827_vm6, %v3911_v40, %v3887_v25  ;;  %v9786_v35 = vmul.u32.u64.low %v3977_v20, %v3976_v23  ;;  %v9787_v4 = vmul.u32.u64.high %v3977_v20, %v3976_v23, %v9786_v35 }
 0x23e   :  { %v3896_v47 = vsel %vm7067_vm15, 0, %v7066_v60  ;;  %v3968_v55 = vsel %vm3962_vm10, %v3965_v1, %v3967_v38  ;;  %v9790_v41 = vmul.u32.u64.low %v3977_v20, %v3972_v46  ;;  %v9791_v9 = vmul.u32.u64.high %v3977_v20, %v3972_v46, %v9790_v41 }
 0x23f   :  { %v3897_v11 = vsub.s32 32, %v3896_v47  ;;  %v3898_v24 = vshll.u32 %v9755_v63, %v3896_v47  ;;  %v3901_v56 = vsub.s32 4294967266, %v3896_v47  ;;  %v4043_v57 = vadd.s32 1, %v7072_v58 }
 0x240   :  { %v9795_v61 = vpop.eup %7422  ;;  %vm3817_vm14 = vcmp.eq.s32.totalorder %v9753_v48, 0  ;;  %vm3820_vm11 = vcmp.eq.s32.totalorder %v9753_v48, 2  ;;  %v9801_v25 = vsel %vm9770_vm12, 0, %v3912_v43  ;;  %v4033_v12 = vand.u32 2147483647, %v9737_v0 }
 0x241   :  { %v9804_v40 = vpop.eup %7424  ;;  %v11202_v32 = vxor.u32 2147483648, %v9795_v61  ;;  %v3899_v1 = vshrl.u32 %v3881_v54, %v3897_v11  ;;  %v3902_v63 = vadd.s32 127, %v3901_v56  ;;  %v3984_v39 = vmul.u32 %v3977_v20, %v3968_v55 }
 0x242   :  { %v11203_v59 = vxor.u32 2147483648, %v9804_v40  ;;  %vm3986_vm2 = vc.u32 %v9787_v4, %v9790_v41  ;;  %v3987_v27 = vadd.s32 1, %v9791_v9  ;;  %vm4044_vm3 = vcmp.gt.s32.totalorder %v4043_v57, 0 }
 0x243   :  { %v3822_v36 = vsel %vm3820_vm11, %v11202_v32, %v9804_v40  ;;  %v3900_v10 = vor.u32 %v3899_v1, %v3898_v24  ;;  %v3903_v60 = vshll.u32 %v3902_v63, 23  ;;  %v4045_v38 = vsel %vm4044_vm3, %v4043_v57, 0 }
 0x244   :  { %v3819_v20 = vsel %vm3817_vm14, %v9795_v61, %v11203_v59  ;;  %v3988_v34 = vsel %vm3986_vm2, %v3987_v27, %v9791_v9  ;;  %v4040_v21 = vand.u32 8388607, %v4033_v12  ;;  %v4047_v54 = vand.u32 31, %v4045_v38 }
 0x245   :  { %v3823_v46 = vsel %vm3816_vm7, %v3819_v20, %v3822_v36  ;;  %v3904_v23 = vor.u32 4788187, %v3903_v60  ;;  %v3907_v58 = vcvt.s32.f32 %v3900_v10  ;;  %v3989_v43 = vadd.s32 %v3988_v34, %v3984_v39 }
 0x246   :  { %v3824_v35 = vsel %vm3813_vm8, nan, %v3823_v46  ;;  %v3918_v47 = vadd.s32 3, %v9801_v25  ;;  %v4048_v55 = vsub.s32 32, %v4047_v54  ;;  %v4050_v11 = vshll.u32 %v11266_v49, %v4047_v54 }
 0x247   :  { %7086 = vst [vmem:[%s11174_s1 + $0x50] sm:$0x3] %v3824_v35  ;;  %v3905_v9 = vand.u32 2147483647, %v3904_v23  ;;  %v3990_v24 = vadd.s32 536870912, %v3989_v43  ;;  %v4053_v48 = vshll.u32 %v11237_v45, %v4047_v54  ;;  %v4056_v56 = vshll.u32 %v11238_v7, %v4047_v54 }
 0x248   :  { %v4051_v57 = vshrl.u32 %v11237_v45, %v4048_v55  ;;  %v4054_v1 = vshrl.u32 %v11238_v7, %v4048_v55  ;;  %v4057_v63 = vshrl.u32 %v11242_v15, %v4048_v55  ;;  %v4059_v39 = vshll.u32 %v11242_v15, %v4047_v54 }
 0x249   :  { %v3908_v27 = vmul.f32 %v3907_v58, %v3905_v9  ;;  %v3991_v36 = vshrl.u32 %v3990_v24, 30  ;;  %v4046_v10 = vshrl.u32 %v4045_v38, 5  ;;  %v4060_v60 = vshrl.u32 %v7510_v62, %v4048_v55 }
 0x24a   :  { %v9838_v20 = vand.u32 3, %v3918_v47  ;;  %vm3931_vm9 = vcmp.lt.s32.totalorder %v9621_v14, 0  ;;  %v4062_v34 = vshll.u32 %v7510_v62, %v4047_v54  ;;  %v4063_v46 = vshrl.u32 %v11211_v8, %v4048_v55 }
 0x24b   :  { %v3909_v23 = vxor.u32 2147483648, %v3908_v27  ;;  %v3992_v35 = vshll.u32 %v3991_v36, 30  ;;  %v4041_v32 = vor.u32 8388608, %v4040_v21  ;;  %v4049_v59 = vshrl.u32 %v11266_v49, %v4048_v55 }
 0x24c   :  { %v4052_v2 = vor.u32 %v4051_v57, %v4050_v11  ;;  %v4055_v44 = vor.u32 %v4054_v1, %v4053_v48  ;;  %v4058_v58 = vor.u32 %v4057_v63, %v4056_v56  ;;  %v4061_v9 = vor.u32 %v4060_v60, %v4059_v39 }
 0x24d   :  { %v3910_v38 = vsel %vm3827_vm6, %v3909_v23, %v3908_v27  ;;  %v9846_v47 = vsub.s32 %v3989_v43, %v3992_v35  ;;  %vm4065_vm1 = vcmp.lt.s32.totalorder %v4046_v10, 1  ;;  %vm4068_vm4 = vcmp.lt.s32.totalorder %v4046_v10, 4 }
 0x24e   :  { %v3913_v54 = vsel %vm9770_vm12, %v9521_v31, %v3910_v38  ;;  %v4015_v24 = vsub.s32 4, %v3991_v36  ;;  %v4064_v42 = vor.u32 %v4063_v46, %v4062_v34  ;;  %vm4067_vm0 = vcmp.lt.s32.totalorder %v4046_v10, 3 }
 0x24f   :  { %7426 = vcosq.f32 %v3913_v54  ;;  %v3995_v21 = vsub.s32 0, %v9846_v47  ;;  %vm4066_vm10 = vcmp.lt.s32.totalorder %v4046_v10, 2  ;;  %v4070_v55 = vsel %vm4068_vm4, %v4058_v58, 2102212464 }
 0x250   :  { %7428 = vsinq.f32 %v3913_v54  ;;  %v4073_v11 = vsel %vm4065_vm1, %v4052_v2, %v4055_v44  ;;  %v4074_v43 = vsel %vm4068_vm4, %v4061_v9, 920167782  ;;  %v4081_v48 = vshll.u32 %v4041_v32, 8 }
 0x251   :  { %v7069_v56 = vmin.u32 %v3995_v21, %v9846_v47  ;;  %v4069_v22 = vsel %vm4065_vm1, %v4049_v59, %v4052_v2  ;;  %v4075_v57 = vsel %vm4067_vm0, %v4058_v58, %v4074_v43  ;;  %v9860_v1 = vmul.f32 %v9535_v37, %v7540_v17 }
 0x252   :  { %v4071_v63 = vsel %vm4067_vm0, %v4055_v44, %v4070_v55  ;;  %v4076_v39 = vsel %vm4066_vm10, %v4073_v11, %v4075_v57  ;;  %v4077_v27 = vsel %vm4065_vm1, %v4055_v44, %v4058_v58  ;;  %v4078_v60 = vsel %vm4068_vm4, %v4064_v42, 1326507024 }
 0x253   :  { %vm9868_vm6 = vcmp.le.f32.partialorder %v3929_v26, 0.7853982  ;;  %v3997_v2 = vclz %v7069_v56  ;;  %v4016_v59 = vsel %vm3931_vm9, %v4015_v24, %v3991_v36  ;;  %vm3917_vm12 = vweird.f32 %v9521_v31 }
 0x254   :  { %v4079_v37 = vsel %vm4067_vm0, %v4061_v9, %v4078_v60  ;;  %v9876_v34 = vmul.u32.u64.low %v4081_v48, %v4076_v39  ;;  %v9877_v46 = vmul.u32.u64.high %v4081_v48, %v4076_v39, %v9876_v34  ;;  %v11207_v44 = vand.u32 2147483647, %v9860_v1 }
 0x255   :  { %v7070_v42 = vadd.s32 4294967294, %v3997_v2  ;;  %v4072_v23 = vsel %vm4066_vm10, %v4069_v22, %v4071_v63  ;;  %v4080_v26 = vsel %vm4066_vm10, %v4077_v27, %v4079_v37  ;;  %v4140_v35 = vand.u32 2139095040, %v9860_v1 }
 0x256   :  { %vm3920_vm7 = vcmp.lt.s32.totalorder %v9838_v20, 2  ;;  %vm3924_vm15 = vcmp.eq.s32.totalorder %v9838_v20, 2  ;;  %v9885_v36 = vmul.u32.u64.low %v4081_v48, %v4080_v26  ;;  %v9886_v58 = vmul.u32.u64.high %v4081_v48, %v4080_v26, %v9885_v36 }
 0x257   :  { %v3985_v9 = vadd.s32 %v9790_v41, %v9787_v4  ;;  %vm7071_vm14 = vcmp.lt.s32.totalorder %v7070_v42, 0  ;;  %v9892_v38 = vsel %vm9868_vm6, 0, %v4016_v59  ;;  %v4141_v54 = vshrl.u32 %v4140_v35, 23 }
 0x258   :  { %v4000_v10 = vsel %vm7071_vm14, 0, %v7070_v42  ;;  %v4088_v24 = vmul.u32 %v4081_v48, %v4072_v23  ;;  %v4091_v21 = vadd.s32 1, %v9877_v46  ;;  %v4144_v55 = vand.u32 8388607, %v11207_v44 }
 0x259   :  { %v9897_v11 = vpop.eup %7426  ;;  %v4001_v43 = vsub.s32 32, %v4000_v10  ;;  %v4002_v56 = vshll.u32 %v9846_v47, %v4000_v10  ;;  %v4005_v22 = vsub.s32 4294967266, %v4000_v10  ;;  %v7076_v4 = vadd.s32 4294967169, %v4141_v54 }
 0x25a   :  { %v9900_v41 = vpop.eup %7428  ;;  %vm3921_vm11 = vcmp.eq.s32.totalorder %v9838_v20, 0  ;;  %v11208_v57 = vxor.u32 2147483648, %v9897_v11  ;;  %vm4090_vm2 = vc.u32 %v9886_v58, %v9876_v34  ;;  %v9907_v48 = vmul.f32 %v9704_v51, %v7540_v17 }
 0x25b   :  { %v11209_v63 = vxor.u32 2147483648, %v9900_v41  ;;  %v4003_v39 = vshrl.u32 %v3985_v9, %v4001_v43  ;;  %v4006_v27 = vadd.s32 127, %v4005_v22  ;;  %v4092_v47 = vsel %vm4090_vm2, %v4091_v21, %v9877_v46 }
 0x25c   :  { %v3926_v60 = vsel %vm3924_vm15, %v11208_v57, %v9900_v41  ;;  %v4022_v2 = vadd.s32 3, %v9892_v38  ;;  %v4093_v59 = vadd.s32 %v4092_v47, %v4088_v24  ;;  %v4147_v37 = vadd.s32 1, %v7076_v4 }
 0x25d   :  { %v3923_v51 = vsel %vm3921_vm11, %v9897_v11, %v11209_v63  ;;  %v4004_v42 = vor.u32 %v4003_v39, %v4002_v56  ;;  %v4007_v23 = vshll.u32 %v4006_v27, 23  ;;  %v4145_v26 = vor.u32 8388608, %v4144_v55 }
 0x25e   :  { %v3927_v46 = vsel %vm3920_vm7, %v3923_v51, %v3926_v60  ;;  %v4094_v35 = vadd.s32 536870912, %v4093_v59  ;;  %vm4148_vm3 = vcmp.gt.s32.totalorder %v4147_v37, 0  ;;  %v4244_v36 = vand.u32 2139095040, %v9907_v48 }
 0x25f   :  { %v3928_v9 = vsel %vm3917_vm12, nan, %v3927_v46  ;;  %v4008_v54 = vor.u32 4788187, %v4007_v23  ;;  %v4011_v10 = vcvt.s32.f32 %v4004_v42  ;;  %v4149_v24 = vsel %vm4148_vm3, %v4147_v37, 0 }
 0x260   :  { %7087 = vst [vmem:[%s11174_s1 + $0x58] sm:$0x3] %v3928_v9  ;;  %v4095_v21 = vshrl.u32 %v4094_v35, 30  ;;  %v4151_v43 = vand.u32 31, %v4149_v24  ;;  %v9928_v56 = vand.u32 3, %v4022_v2  ;;  %vm4035_vm1 = vcmp.lt.s32.totalorder %v9737_v0, 0 }
 0x261   :  { %v4009_v55 = vand.u32 2147483647, %v4008_v54  ;;  %v11213_v20 = vand.u32 2147483647, %v9907_v48  ;;  %v9933_v22 = vadd.s32 %v9876_v34, %v9886_v58  ;;  %v9935_v27 = vshll.u32 %v4145_v26, 8 }
 0x262   :  { %v4096_v4 = vshll.u32 %v4095_v21, 30  ;;  %v4152_v39 = vsub.s32 32, %v4151_v43  ;;  %v4150_v60 = vshrl.u32 %v4149_v24, 5  ;;  %v4154_v37 = vshll.u32 %v11266_v49, %v4151_v43 }
 0x263   :  { %v4012_v47 = vmul.f32 %v4011_v10, %v4009_v55  ;;  %v4245_v51 = vshrl.u32 %v4244_v36, 23  ;;  %v4157_v23 = vshll.u32 %v11237_v45, %v4151_v43  ;;  %v4160_v46 = vshll.u32 %v11238_v7, %v4151_v43 }
 0x264   :  { %v9938_v42 = vsub.s32 %v4093_v59, %v4096_v4  ;;  %v4155_v2 = vshrl.u32 %v11237_v45, %v4152_v39  ;;  %vm9945_vm4 = vcmp.le.f32.partialorder %v4033_v12, 0.7853982  ;;  %v4158_v58 = vshrl.u32 %v11238_v7, %v4152_v39 }
 0x265   :  { %v4013_v35 = vxor.u32 2147483648, %v4012_v47  ;;  %v4161_v26 = vshrl.u32 %v11242_v15, %v4152_v39  ;;  %v4163_v59 = vshll.u32 %v11242_v15, %v4151_v43  ;;  %v4119_v9 = vsub.s32 4, %v4095_v21 }
 0x266   :  { %v4099_v36 = vsub.s32 0, %v9938_v42  ;;  %v4164_v54 = vshrl.u32 %v7510_v62, %v4152_v39  ;;  %v9956_v10 = vand.u32 8388607, %v11213_v20  ;;  %v4153_v24 = vshrl.u32 %v11266_v49, %v4152_v39 }
 0x267   :  { %v4014_v12 = vsel %vm3931_vm9, %v4013_v35, %v4012_v47  ;;  %v4156_v55 = vor.u32 %v4155_v2, %v4154_v37  ;;  %v4166_v4 = vshll.u32 %v7510_v62, %v4151_v43  ;;  %v4159_v63 = vor.u32 %v4158_v58, %v4157_v23 }
 0x268   :  { %v4017_v44 = vsel %vm9868_vm6, %v9621_v14, %v4014_v12  ;;  %v7073_v57 = vmin.u32 %v4099_v36, %v9938_v42  ;;  %v4162_v52 = vor.u32 %v4161_v26, %v4160_v46  ;;  %v4165_v8 = vor.u32 %v4164_v54, %v4163_v59 }
 0x269   :  { %7430 = vcosq.f32 %v4017_v44  ;;  %v11292_v20 = vmov 1326507024   ;;  %vm4169_vm0 = vcmp.lt.s32.totalorder %v4150_v60, 1  ;;  %v4120_v37 = vsel %vm4035_vm1, %v4119_v9, %v4095_v21 }
 0x26a   :  { %v4167_v17 = vshrl.u32 %v11292_v20, %v4152_v39  ;;  %7432 = vsinq.f32 %v4017_v44  ;;  %v4101_v47 = vclz %v7073_v57  ;;  %v7080_v2 = vadd.s32 4294967169, %v4245_v51 }
 0x26b   :  { %vm4170_vm9 = vcmp.lt.s32.totalorder %v4150_v60, 2  ;;  %vm4171_vm10 = vcmp.lt.s32.totalorder %v4150_v60, 3  ;;  %vm4172_vm7 = vcmp.lt.s32.totalorder %v4150_v60, 4  ;;  %v4173_v35 = vsel %vm4169_vm0, %v4153_v24, %v4156_v55 }
 0x26c   :  { %v4168_v43 = vor.u32 %v4167_v17, %v4166_v4  ;;  %v7074_v32 = vadd.s32 4294967294, %v4101_v47  ;;  %v4174_v23 = vsel %vm4172_vm7, %v4162_v52, 2102212464  ;;  %v4177_v46 = vsel %vm4169_vm0, %v4156_v55, %v4159_v63 }
 0x26d   :  { %vm4024_vm6 = vcmp.lt.s32.totalorder %v9928_v56, 2  ;;  %v4175_v39 = vsel %vm4171_vm10, %v4159_v63, %v4174_v23  ;;  %v4178_v58 = vsel %vm4172_vm7, %v4165_v8, 920167782  ;;  %v4181_v44 = vsel %vm4169_vm0, %v4159_v63, %v4162_v52 }
 0x26e   :  { %v4182_v57 = vsel %vm4172_vm7, %v4168_v43, 1326507024  ;;  %vm4021_vm15 = vweird.f32 %v9621_v14  ;;  %vm7075_vm14 = vcmp.lt.s32.totalorder %v7074_v32, 0  ;;  %v9976_v17 = vsel %vm9945_vm4, 0, %v4120_v37 }
 0x26f   :  { %v4179_v21 = vsel %vm4171_vm10, %v4162_v52, %v4178_v58  ;;  %v4183_v51 = vsel %vm4171_vm10, %v4165_v8, %v4182_v57  ;;  %v4104_v26 = vsel %vm7075_vm14, 0, %v7074_v32  ;;  %v4176_v59 = vsel %vm4170_vm9, %v4173_v35, %v4175_v39 }
 0x270   :  { %v4180_v36 = vsel %vm4170_vm9, %v4177_v46, %v4179_v21  ;;  %v4184_v9 = vsel %vm4170_vm9, %v4181_v44, %v4183_v51  ;;  %v4105_v54 = vsub.s32 32, %v4104_v26  ;;  %v4106_v63 = vshll.u32 %v9938_v42, %v4104_v26 }
 0x271   :  { %v4109_v12 = vsub.s32 4294967266, %v4104_v26  ;;  %v4251_v24 = vadd.s32 1, %v7080_v2  ;;  %v9983_v55 = vmul.u32.u64.low %v9935_v27, %v4184_v9  ;;  %v9984_v4 = vmul.u32.u64.high %v9935_v27, %v4184_v9, %v9983_v55 }
 0x272   :  { %v9987_v47 = vmul.u32.u64.low %v9935_v27, %v4180_v36  ;;  %v9988_v52 = vmul.u32.u64.high %v9935_v27, %v4180_v36, %v9987_v47  ;;  %vm4025_vm11 = vcmp.eq.s32.totalorder %v9928_v56, 0  ;;  %v4107_v8 = vshrl.u32 %v9933_v22, %v4105_v54 }
 0x273   :  { %v4110_v60 = vadd.s32 127, %v4109_v12  ;;  %vm4252_vm2 = vcmp.gt.s32.totalorder %v4251_v24, 0  ;;  %v9993_v37 = vpop.eup %7430  ;;  %vm4028_vm3 = vcmp.eq.s32.totalorder %v9928_v56, 2  ;;  %v4126_v42 = vadd.s32 3, %v9976_v17 }
 0x274   :  { %v4249_v2 = vor.u32 8388608, %v9956_v10  ;;  %v4253_v43 = vsel %vm4252_vm2, %v4251_v24, 0  ;;  %v9998_v32 = vpop.eup %7432  ;;  %v11216_v35 = vxor.u32 2147483648, %v9993_v37  ;;  %v4108_v23 = vor.u32 %v4107_v8, %v4106_v63 }
 0x275   :  { %v4111_v46 = vshll.u32 %v4110_v60, 23  ;;  %v4192_v39 = vmul.u32 %v9935_v27, %v4176_v59  ;;  %v11217_v22 = vxor.u32 2147483648, %v9998_v32  ;;  %vm4194_vm0 = vc.u32 %v9984_v4, %v9987_v47 }
 0x276   :  { %v4195_v58 = vadd.s32 1, %v9988_v52  ;;  %v10007_v44 = vand.u32 3, %v9543_v13  ;;  %v4030_v10 = vsel %vm4028_vm3, %v11216_v35, %v9998_v32  ;;  %v4115_v21 = vcvt.s32.f32 %v4108_v23 }
 0x277   :  { %v4112_v57 = vor.u32 4788187, %v4111_v46  ;;  %v4255_v51 = vand.u32 31, %v4253_v43  ;;  %v4027_v27 = vsel %vm4025_vm11, %v9993_v37, %v11217_v22  ;;  %v10017_v26 = vand.u32 3, %v4126_v42 }
 0x278   :  { %v4196_v59 = vsel %vm4194_vm0, %v4195_v58, %v9988_v52  ;;  %v4254_v36 = vshrl.u32 %v4253_v43, 5  ;;  %v4031_v13 = vsel %vm4024_vm6, %v4027_v27, %v4030_v10  ;;  %v10026_v8 = vshll.u32 %v4249_v2, 8 }
 0x279   :  { %v4113_v9 = vand.u32 2147483647, %v4112_v57  ;;  %v4197_v54 = vadd.s32 %v4196_v59, %v4192_v39  ;;  %v4256_v63 = vsub.s32 32, %v4255_v51  ;;  %v4032_v12 = vsel %vm4021_vm15, nan, %v4031_v13 }
 0x27a   :  { %v4258_v24 = vshll.u32 %v11266_v49, %v4255_v51  ;;  %v4261_v55 = vshll.u32 %v11237_v45, %v4255_v51  ;;  %7088 = vst [vmem:[%s11174_s1 + $0x140] sm:$0xff] %v4032_v12  ;;  %v4264_v42 = vshll.u32 %v11238_v7, %v4255_v51  ;;  %v4267_v46 = vshll.u32 %v11242_v15, %v4255_v51 }
 0x27b   :  { %v4116_v52 = vmul.f32 %v4115_v21, %v4113_v9  ;;  %v4198_v60 = vadd.s32 536870912, %v4197_v54  ;;  %v4259_v56 = vshrl.u32 %v11237_v45, %v4256_v63  ;;  %v4262_v43 = vshrl.u32 %v11238_v7, %v4256_v63 }
 0x27c   :  { %v4265_v23 = vshrl.u32 %v11242_v15, %v4256_v63  ;;  %v4268_v39 = vshrl.u32 %v7510_v62, %v4256_v63  ;;  %v4270_v10 = vshll.u32 %v7510_v62, %v4255_v51  ;;  %vm4273_vm9 = vcmp.lt.s32.totalorder %v4254_v36, 1 }
 0x27d   :  { %v4117_v2 = vxor.u32 2147483648, %v4116_v52  ;;  %v10037_v58 = vshrl.u32 %v4198_v60, 30  ;;  %v4257_v57 = vshrl.u32 %v11266_v49, %v4256_v63  ;;  %v4260_v21 = vor.u32 %v4259_v56, %v4258_v24 }
 0x27e   :  { %v4263_v27 = vor.u32 %v4262_v43, %v4261_v55  ;;  %v4271_v59 = vshrl.u32 %v11292_v20, %v4256_v63  ;;  %v4266_v12 = vor.u32 %v4265_v23, %v4264_v42  ;;  %v4269_v35 = vor.u32 %v4268_v39, %v4267_v46 }
 0x27f   :  { %v4118_v13 = vsel %vm4035_vm1, %v4117_v2, %v4116_v52  ;;  %v4200_v9 = vshll.u32 %v10037_v58, 30  ;;  %vm4274_vm10 = vcmp.lt.s32.totalorder %v4254_v36, 2  ;;  %vm4276_vm7 = vcmp.lt.s32.totalorder %v4254_v36, 4 }
 0x280   :  { %v4121_v60 = vsel %vm9945_vm4, %v9737_v0, %v4118_v13  ;;  %v4272_v22 = vor.u32 %v4271_v59, %v4270_v10  ;;  %vm4275_vm6 = vcmp.lt.s32.totalorder %v4254_v36, 3  ;;  %v4278_v63 = vsel %vm4276_vm7, %v4266_v12, 2102212464 }
 0x281   :  { %7434 = vcosq.f32 %v4121_v60  ;;  %v10048_v51 = vsub.s32 %v4197_v54, %v4200_v9  ;;  %v4277_v24 = vsel %vm4273_vm9, %v4257_v57, %v4260_v21  ;;  %v4279_v55 = vsel %vm4275_vm6, %v4263_v27, %v4278_v63 }
 0x282   :  { %7436 = vsinq.f32 %v4121_v60  ;;  %v4281_v52 = vsel %vm4273_vm9, %v4260_v21, %v4263_v27  ;;  %v4282_v34 = vsel %vm4276_vm7, %v4269_v35, 920167782  ;;  %vm4448_vm1 = vcmp.lt.s32.totalorder %v10007_v44, 2 }
 0x283   :  { %v4203_v56 = vsub.s32 0, %v10048_v51  ;;  %vm4449_vm4 = vcmp.eq.s32.totalorder %v10007_v44, 0  ;;  %vm4129_vm14 = vcmp.eq.s32.totalorder %v10017_v26, 0  ;;  %v4283_v54 = vsel %vm4275_vm6, %v4266_v12, %v4282_v34 }
 0x284   :  { %v4285_v42 = vsel %vm4273_vm9, %v4263_v27, %v4266_v12  ;;  %v4286_v43 = vsel %vm4276_vm7, %v4272_v22, 1326507024  ;;  %vm4452_vm11 = vcmp.eq.s32.totalorder %v10007_v44, 2  ;;  %vm4128_vm2 = vcmp.lt.s32.totalorder %v10017_v26, 2 }
 0x285   :  { %v7077_v23 = vmin.u32 %v4203_v56, %v10048_v51  ;;  %v4280_v46 = vsel %vm4274_vm10, %v4277_v24, %v4279_v55  ;;  %v4284_v39 = vsel %vm4274_vm10, %v4281_v52, %v4283_v54  ;;  %v4287_v2 = vsel %vm4275_vm6, %v4269_v35, %v4286_v43 }
 0x286   :  { %vm4125_vm3 = vweird.f32 %v9737_v0  ;;  %v4288_v10 = vsel %vm4274_vm10, %v4285_v42, %v4287_v2  ;;  %v10071_v57 = vmul.u32.u64.low %v10026_v8, %v4284_v39  ;;  %v10072_v21 = vmul.u32.u64.high %v10026_v8, %v4284_v39, %v10071_v57 }
 0x287   :  { %v11293_v22 = vxor.u32 2147483648, %v9629_v3  ;;  %vm4132_vm0 = vcmp.eq.s32.totalorder %v10017_v26, 2  ;;  %v4193_v59 = vadd.s32 %v9987_v47, %v9984_v4  ;;  %v4205_v13 = vclz %v7077_v23 }
 0x288   :  { %v4223_v35 = vsub.s32 4, %v10037_v58  ;;  %v10083_v36 = vmul.u32.u64.low %v10026_v8, %v4288_v10  ;;  %v10084_v9 = vmul.u32.u64.high %v10026_v8, %v4288_v10, %v10083_v36  ;;  %v11294_v12 = vxor.u32 2147483648, %v9623_v29 }
 0x289   :  { %v4451_v27 = vsel %vm4449_vm4, %v9623_v29, %v11293_v22  ;;  %v4550_v63 = vand.u32 3, %v9605_v33  ;;  %v7078_v24 = vadd.s32 4294967294, %v4205_v13  ;;  %v4296_v55 = vmul.u32 %v10026_v8, %v4280_v46 }
 0x28a   :  { %v4454_v60 = vsel %vm4452_vm11, %v11294_v12, %v9629_v3  ;;  %v4653_v47 = vand.u32 3, %v9721_v28  ;;  %v4299_v52 = vadd.s32 1, %v10072_v21  ;;  %v4756_v29 = vand.u32 3, %v9801_v25 }
 0x28b   :  { %v4455_v4 = vsel %vm4448_vm1, %v4451_v27, %v4454_v60  ;;  %vm4552_vm9 = vcmp.eq.s32.totalorder %v4550_v63, 0  ;;  %v10100_v34 = vpop.eup %7434  ;;  %vm7079_vm10 = vcmp.lt.s32.totalorder %v7078_v24, 0  ;;  %vm4551_vm7 = vcmp.lt.s32.totalorder %v4550_v63, 2 }
 0x28c   :  { %v4456_v56 = vsel %vm3605_vm13, nan, %v4455_v4  ;;  %v11295_v33 = vxor.u32 2147483648, %v9714_v30  ;;  %vm4555_vm6 = vcmp.eq.s32.totalorder %v4550_v63, 2  ;;  %v10108_v28 = vpop.eup %7436  ;;  %v4133_v19 = vxor.u32 2147483648, %v10100_v34 }
 0x28d   :  { %7124 = vst [vmem:[%s11174_s1 + $0xc0] sm:$0xff] %v4456_v56  ;;  %vm4139_vm13 = vcmp.lt.s32.totalorder %v9860_v1, 0  ;;  %v4208_v25 = vsel %vm7079_vm10, 0, %v7078_v24  ;;  %vm4298_vm1 = vc.u32 %v10084_v9, %v10071_v57  ;;  %vm4654_vm4 = vcmp.lt.s32.totalorder %v4653_v47, 2 }
 0x28e   :  { %v4554_v3 = vsel %vm4552_vm9, %v9707_v16, %v11295_v33  ;;  %v4130_v44 = vxor.u32 2147483648, %v10108_v28  ;;  %v4209_v8 = vsub.s32 32, %v4208_v25  ;;  %v4210_v54 = vshll.u32 %v10048_v51, %v4208_v25 }
 0x28f   :  { %v4213_v42 = vsub.s32 4294967266, %v4208_v25  ;;  %v4134_v43 = vsel %vm4132_vm0, %v4133_v19, %v10108_v28  ;;  %v4300_v23 = vsel %vm4298_vm1, %v4299_v52, %v10072_v21  ;;  %v11296_v46 = vxor.u32 2147483648, %v9707_v16 }
 0x290   :  { %vm4655_vm11 = vcmp.eq.s32.totalorder %v4653_v47, 0  ;;  %v4131_v51 = vsel %vm4129_vm14, %v10100_v34, %v4130_v44  ;;  %v4211_v2 = vshrl.u32 %v4193_v59, %v4209_v8  ;;  %v4301_v22 = vadd.s32 %v4300_v23, %v4296_v55 }
 0x291   :  { %v4557_v39 = vsel %vm4555_vm6, %v11296_v46, %v9714_v30  ;;  %v4214_v10 = vadd.s32 127, %v4213_v42  ;;  %v4135_v27 = vsel %vm4128_vm2, %v4131_v51, %v4134_v43  ;;  %v11297_v21 = vxor.u32 2147483648, %v9804_v40 }
 0x292   :  { %v4558_v13 = vsel %vm4551_vm7, %v4554_v3, %v4557_v39  ;;  %vm4658_vm0 = vcmp.eq.s32.totalorder %v4653_v47, 2  ;;  %v4136_v30 = vsel %vm4125_vm3, nan, %v4135_v27  ;;  %v4212_v36 = vor.u32 %v4211_v2, %v4210_v54 }
 0x293   :  { %v4657_v16 = vsel %vm4655_vm11, %v9795_v61, %v11297_v21  ;;  %v4215_v12 = vshll.u32 %v4214_v10, 23  ;;  %v4302_v60 = vadd.s32 536870912, %v4301_v22  ;;  %7089 = vst [vmem:[%s11174_s1 + $0x148] sm:$0xff] %v4136_v30  ;;  %v4559_v26 = vsel %vm3709_vm5, nan, %v4558_v13 }
 0x294   :  { %v11298_v59 = vxor.u32 2147483648, %v9795_v61  ;;  %vm4757_vm14 = vcmp.lt.s32.totalorder %v4756_v29, 2  ;;  %vm4758_vm2 = vcmp.eq.s32.totalorder %v4756_v29, 0  ;;  %v4219_v55 = vcvt.s32.f32 %v4212_v36  ;;  %7125 = vst [vmem:[%s11174_s1 + $0xc8] sm:$0xff] %v4559_v26 }
 0x295   :  { %v4216_v24 = vor.u32 4788187, %v4215_v12  ;;  %v4303_v4 = vshrl.u32 %v4302_v60, 30  ;;  %v11299_v50 = vxor.u32 2147483648, %v9900_v41  ;;  %vm4761_vm5 = vcmp.eq.s32.totalorder %v4756_v29, 2 }
 0x296   :  { %v4660_v63 = vsel %vm4658_vm0, %v11298_v59, %v9804_v40  ;;  %v4859_v61 = vand.u32 3, %v9892_v38  ;;  %v4224_v3 = vsel %vm4139_vm13, %v4223_v35, %v10037_v58  ;;  %v11300_v53 = vxor.u32 2147483648, %v9897_v11  ;;  %v5188_v21 = vld [vmem:[#allocation2 + $0x3] ss:$4 sm:$0x3] }
 0x297   :  { %v4661_v52 = vsel %vm4654_vm4, %v4657_v16, %v4660_v63  ;;  %v4760_v33 = vsel %vm4758_vm2, %v9897_v11, %v11299_v50  ;;  %v4217_v40 = vand.u32 2147483647, %v4216_v24  ;;  %v4304_v25 = vshll.u32 %v4303_v4, 30 }
 0x298   :  { %v4662_v56 = vsel %vm3813_vm8, nan, %v4661_v52  ;;  %v4763_v47 = vsel %vm4761_vm5, %v11300_v53, %v9900_v41  ;;  %vm4860_vm8 = vcmp.lt.s32.totalorder %v4859_v61, 2  ;;  %vm4861_vm9 = vcmp.eq.s32.totalorder %v4859_v61, 0 }
 0x299   :  { %7126 = vst [vmem:[%s11174_s1 + $0xd0] sm:$0x3] %v4662_v56  ;;  %v4764_v8 = vsel %vm4757_vm14, %v4760_v33, %v4763_v47  ;;  %vm4864_vm10 = vcmp.eq.s32.totalorder %v4859_v61, 2  ;;  %v4220_v38 = vmul.f32 %v4219_v55, %v4217_v40  ;;  %v4305_v54 = vsub.s32 %v4301_v22, %v4304_v25 }
 0x29a   :  { %v4765_v42 = vsel %vm3917_vm12, nan, %v4764_v8  ;;  %v11301_v58 = vand.u32 2147483647, %v9860_v1  ;;  %v11304_v11 = vxor.u32 2147483648, %v9998_v32  ;;  %v11305_v29 = vxor.u32 2147483648, %v9993_v37 }
 0x29b   :  { %7127 = vst [vmem:[%s11174_s1 + $0xd8] sm:$0x3] %v4765_v42  ;;  %v4962_v31 = vand.u32 3, %v9976_v17  ;;  %v4221_v23 = vxor.u32 2147483648, %v4220_v38  ;;  %v4307_v39 = vsub.s32 0, %v4305_v54  ;;  %v4327_v2 = vsub.s32 4, %v4303_v4 }
 0x29c   :  { %vm10170_vm7 = vcmp.le.f32.partialorder %v11301_v58, 0.7853982  ;;  %v4863_v41 = vsel %vm4861_vm9, %v9993_v37, %v11304_v11  ;;  %v4866_v43 = vsel %vm4864_vm10, %v11305_v29, %v9998_v32  ;;  %v4297_v60 = vadd.s32 %v10071_v57, %v10084_v9 }
 0x29d   :  { %v4226_v46 = vsel %vm10170_vm7, 0, %v4224_v3  ;;  %v4867_v51 = vsel %vm4860_vm8, %v4863_v41, %v4866_v43  ;;  %vm4964_vm12 = vcmp.eq.s32.totalorder %v4962_v31, 0  ;;  %vm4967_vm6 = vcmp.eq.s32.totalorder %v4962_v31, 2 }
 0x29e   :  { %v4868_v10 = vsel %vm4021_vm15, nan, %v4867_v51  ;;  %v4222_v22 = vsel %vm4139_vm13, %v4221_v23, %v4220_v38  ;;  %v7081_v27 = vmin.u32 %v4307_v39, %v4305_v54  ;;  %vm4963_vm1 = vcmp.lt.s32.totalorder %v4962_v31, 2 }
 0x29f   :  { %7128 = vst [vmem:[%s11174_s1 + $0x1c0] sm:$0xff] %v4868_v10  ;;  %v4966_v17 = vsel %vm4964_vm12, %v10100_v34, %v4130_v44  ;;  %v4225_v14 = vsel %vm10170_vm7, %v9860_v1, %v4222_v22  ;;  %v4230_v37 = vadd.s32 3, %v4226_v46  ;;  %v4969_v32 = vsel %vm4967_vm6, %v4133_v19, %v10108_v28 }
 0x2a0   :  { %7438 = vcosq.f32 %v4225_v14  ;;  %v4309_v13 = vclz %v7081_v27  ;;  %vm4243_vm15 = vcmp.lt.s32.totalorder %v9907_v48, 0  ;;  %v4970_v16 = vsel %vm4963_vm1, %v4966_v17, %v4969_v32 }
 0x2a1   :  { %7440 = vsinq.f32 %v4225_v14  ;;  %v4328_v44 = vsel %vm4243_vm15, %v4327_v2, %v4303_v4  ;;  %v4971_v36 = vsel %vm4125_vm3, nan, %v4970_v16  ;;  %v4231_v12 = vand.u32 3, %v4230_v37 }
 0x2a2   :  { %v7082_v30 = vadd.s32 4294967294, %v4309_v13  ;;  %7129 = vst [vmem:[%s11174_s1 + $0x1c8] sm:$0xff] %v4971_v36  ;;  %v5196_v34 = vrot.slane %v5188_v21, %v7534_v5  ;;  %v11306_v28 = vand.u32 2147483647, %v9907_v48  ;;  %v10220_v0 = vrot.slane %v5188_v21, %v7536_v6  ;;  %v11309_v36 = vld [vmem:[#allocation5_spill] sm:$0xff] }
 0x2a3   :  { %vm4229_vm3 = vweird.f32 %v9860_v1  ;;  %v5065_v63 = vand.u32 3, %v4226_v46  ;;  %vm4232_vm11 = vcmp.lt.s32.totalorder %v4231_v12, 2  ;;  %vm4233_vm0 = vcmp.eq.s32.totalorder %v4231_v12, 0 }
 0x2a4   :  { %vm10213_vm13 = vcmp.le.f32.partialorder %v11306_v28, 0.7853982  ;;  %vm7083_vm4 = vcmp.lt.s32.totalorder %v7082_v30, 0  ;;  %v10226_v24 = vmul.f32 %v5196_v34, %v7542_v18  ;;  %v10230_v57 = vmul.f32 %v10220_v0, %v7542_v18 }
 0x2a5   :  { %v4312_v26 = vsel %vm7083_vm4, 0, %v7082_v30  ;;  %v4330_v59 = vsel %vm10213_vm13, 0, %v4328_v44  ;;  %vm4236_vm14 = vcmp.eq.s32.totalorder %v4231_v12, 2  ;;  %vm5066_vm2 = vcmp.lt.s32.totalorder %v5065_v63, 2 }
 0x2a6   :  { %v4313_v55 = vsub.s32 32, %v4312_v26  ;;  %v4314_v4 = vshll.u32 %v4305_v54, %v4312_v26  ;;  %v4317_v52 = vsub.s32 4294967266, %v4312_v26  ;;  %v5221_v9 = vand.u32 2147483647, %v10226_v24 }
 0x2a7   :  { %v5224_v56 = vand.u32 2139095040, %v10226_v24  ;;  %v5325_v61 = vand.u32 2147483647, %v10230_v57  ;;  %v4334_v40 = vadd.s32 3, %v4330_v59  ;;  %v5328_v53 = vand.u32 2139095040, %v10230_v57 }
 0x2a8   :  { %v4315_v50 = vshrl.u32 %v4297_v60, %v4313_v55  ;;  %v4318_v33 = vadd.s32 127, %v4317_v52  ;;  %v5228_v25 = vand.u32 8388607, %v5221_v9  ;;  %vm5070_vm5 = vcmp.eq.s32.totalorder %v5065_v63, 2 }
 0x2a9   :  { %v5225_v3 = vshrl.u32 %v5224_v56, 23  ;;  %vm5067_vm8 = vcmp.eq.s32.totalorder %v5065_v63, 0  ;;  %v5329_v35 = vshrl.u32 %v5328_v53, 23  ;;  %v10240_v43 = vand.u32 8388607, %v5325_v61 }
 0x2aa   :  { %v7439_v47 = vpop.eup %7438  ;;  %v4316_v8 = vor.u32 %v4315_v50, %v4314_v4  ;;  %v4319_v38 = vshll.u32 %v4318_v33, 23  ;;  %v5229_v46 = vor.u32 8388608, %v5228_v25  ;;  %v10245_v17 = vand.u32 3, %v4334_v40 }
 0x2ab   :  { %v7441_v54 = vpop.eup %7440  ;;  %v4237_v42 = vxor.u32 2147483648, %v7439_v47  ;;  %v7132_v58 = vadd.s32 4294967169, %v5225_v3  ;;  %v7136_v22 = vadd.s32 4294967169, %v5329_v35  ;;  %v10258_v16 = vand.u32 3, %v4330_v59 }
 0x2ac   :  { %v4234_v11 = vxor.u32 2147483648, %v7441_v54  ;;  %v4320_v41 = vor.u32 4788187, %v4319_v38  ;;  %v4323_v29 = vcvt.s32.f32 %v4316_v8  ;;  %v10261_v12 = vmul.f32 %v5196_v34, %v11309_v36 }
 0x2ad   :  { %v4238_v31 = vsel %vm4236_vm14, %v4237_v42, %v7441_v54  ;;  %v5072_v23 = vsel %vm5070_vm5, %v4237_v42, %v7441_v54  ;;  %v5231_v39 = vadd.s32 1, %v7132_v58  ;;  %v10263_v60 = vshll.u32 %v5229_v46, 8 }
 0x2ae   :  { %v4235_v51 = vsel %vm4233_vm0, %v7439_v47, %v4234_v11  ;;  %v4321_v2 = vand.u32 2147483647, %v4320_v41  ;;  %v5069_v10 = vsel %vm5067_vm8, %v7439_v47, %v4234_v11  ;;  %v5333_v1 = vor.u32 8388608, %v10240_v43 }
 0x2af   :  { %v4239_v27 = vsel %vm4232_vm11, %v4235_v51, %v4238_v31  ;;  %v5073_v14 = vsel %vm5066_vm2, %v5069_v10, %v5072_v23  ;;  %vm5232_vm9 = vcmp.gt.s32.totalorder %v5231_v39, 0  ;;  %v5335_v26 = vadd.s32 1, %v7136_v22 }
 0x2b0   :  { %v4240_v37 = vsel %vm4229_vm3, nan, %v4239_v27  ;;  %v4324_v32 = vmul.f32 %v4323_v29, %v4321_v2  ;;  %v5074_v13 = vsel %vm4229_vm3, nan, %v5073_v14  ;;  %v5233_v21 = vsel %vm5232_vm9, %v5231_v39, 0 }
 0x2b1   :  { %7090 = vst [vmem:[%s11174_s1 + $0x150] sm:$0x3] %v4240_v37  ;;  %7130 = vst [vmem:[%s11174_s1 + $0x1d0] sm:$0x3] %v5074_v13  ;;  %v5234_v30 = vshrl.u32 %v5233_v21, 5  ;;  %v5235_v44 = vand.u32 31, %v5233_v21  ;;  %vm4333_vm4 = vweird.f32 %v9907_v48 }
 0x2b2   :  { %v4325_v28 = vxor.u32 2147483648, %v4324_v32  ;;  %vm4337_vm6 = vcmp.eq.s32.totalorder %v10245_v17, 0  ;;  %vm4340_vm3 = vcmp.eq.s32.totalorder %v10245_v17, 2  ;;  %vm5169_vm11 = vcmp.lt.s32.totalorder %v10258_v16, 2 }
 0x2b3   :  { %v5236_v63 = vsub.s32 32, %v5235_v44  ;;  %v5238_v55 = vshll.u32 %v11266_v49, %v5235_v44  ;;  %v5241_v4 = vshll.u32 %v11237_v45, %v5235_v44  ;;  %v5244_v52 = vshll.u32 %v11238_v7, %v5235_v44 }
 0x2b4   :  { %v4326_v59 = vsel %vm4243_vm15, %v4325_v28, %v4324_v32  ;;  %v5247_v56 = vshll.u32 %v11242_v15, %v5235_v44  ;;  %v5250_v34 = vshll.u32 %v7510_v62, %v5235_v44  ;;  %vm5253_vm10 = vcmp.lt.s32.totalorder %v5234_v30, 1 }
 0x2b5   :  { %v4329_v50 = vsel %vm10213_vm13, %v9907_v48, %v4326_v59  ;;  %v5237_v33 = vshrl.u32 %v11266_v49, %v5236_v63  ;;  %v5239_v40 = vshrl.u32 %v11237_v45, %v5236_v63  ;;  %v5242_v3 = vshrl.u32 %v11238_v7, %v5236_v63 }
 0x2b6   :  { %7442 = vcosq.f32 %v4329_v50  ;;  %v5245_v25 = vshrl.u32 %v11242_v15, %v5236_v63  ;;  %v5248_v53 = vshrl.u32 %v7510_v62, %v5236_v63  ;;  %v5251_v47 = vshrl.u32 %v11292_v20, %v5236_v63 }
 0x2b7   :  { %7444 = vsinq.f32 %v4329_v50  ;;  %v5240_v8 = vor.u32 %v5239_v40, %v5238_v55  ;;  %v5243_v38 = vor.u32 %v5242_v3, %v5241_v4  ;;  %vm5254_vm7 = vcmp.lt.s32.totalorder %v5234_v30, 2 }
 0x2b8   :  { %v5246_v54 = vor.u32 %v5245_v25, %v5244_v52  ;;  %v5249_v19 = vor.u32 %v5248_v53, %v5247_v56  ;;  %v5252_v42 = vor.u32 %v5251_v47, %v5250_v34  ;;  %vm5255_vm12 = vcmp.lt.s32.totalorder %v5234_v30, 3 }
 0x2b9   :  { %vm5256_vm1 = vcmp.lt.s32.totalorder %v5234_v30, 4  ;;  %v5257_v58 = vsel %vm5253_vm10, %v5237_v33, %v5240_v8  ;;  %v5261_v35 = vsel %vm5253_vm10, %v5240_v8, %v5243_v38  ;;  %vm5336_vm15 = vcmp.gt.s32.totalorder %v5335_v26, 0 }
 0x2ba   :  { %vm4336_vm13 = vcmp.lt.s32.totalorder %v10245_v17, 2  ;;  %v5258_v11 = vsel %vm5256_vm1, %v5246_v54, 2102212464  ;;  %v5262_v41 = vsel %vm5256_vm1, %v5249_v19, 920167782  ;;  %v5265_v29 = vsel %vm5253_vm10, %v5243_v38, %v5246_v54 }
 0x2bb   :  { %v5266_v43 = vsel %vm5256_vm1, %v5252_v42, 1326507024  ;;  %v5259_v31 = vsel %vm5255_vm12, %v5243_v38, %v5258_v11  ;;  %v5263_v23 = vsel %vm5255_vm12, %v5246_v54, %v5262_v41  ;;  %v5337_v39 = vsel %vm5336_vm15, %v5335_v26, 0 }
 0x2bc   :  { %v5267_v46 = vsel %vm5255_vm12, %v5249_v19, %v5266_v43  ;;  %v5260_v51 = vsel %vm5254_vm7, %v5257_v58, %v5259_v31  ;;  %v5264_v2 = vsel %vm5254_vm7, %v5261_v35, %v5263_v23  ;;  %v10291_v22 = vshrl.u32 %v5337_v39, 5 }
 0x2bd   :  { %v5268_v10 = vsel %vm5254_vm7, %v5265_v29, %v5267_v46  ;;  %v10298_v37 = vmul.u32.u64.low %v10263_v60, %v5264_v2  ;;  %v10299_v32 = vmul.u32.u64.high %v10263_v60, %v5264_v2, %v10298_v37  ;;  %v5339_v13 = vand.u32 31, %v5337_v39 }
 0x2be   :  { %v10294_v27 = vmul.u32.u64.low %v10263_v60, %v5268_v10  ;;  %v10295_v14 = vmul.u32.u64.high %v10263_v60, %v5268_v10, %v10294_v27  ;;  %v5432_v21 = vand.u32 2139095040, %v10261_v12  ;;  %vm5170_vm0 = vcmp.eq.s32.totalorder %v10258_v16, 0 }
 0x2bf   :  { %vm5173_vm14 = vcmp.eq.s32.totalorder %v10258_v16, 2  ;;  %v5276_v30 = vmul.u32 %v10263_v60, %v5260_v51  ;;  %v10308_v44 = vshll.u32 %v5333_v1, 8  ;;  %v5340_v26 = vsub.s32 32, %v5339_v13 }
 0x2c0   :  { %v7443_v28 = vpop.eup %7442  ;;  %v5342_v63 = vshll.u32 %v11266_v49, %v5339_v13  ;;  %v5345_v55 = vshll.u32 %v11237_v45, %v5339_v13  ;;  %vm5357_vm2 = vcmp.lt.s32.totalorder %v10291_v22, 1  ;;  %vm5278_vm5 = vc.u32 %v10295_v14, %v10298_v37 }
 0x2c1   :  { %v7445_v4 = vpop.eup %7444  ;;  %v4341_v52 = vxor.u32 2147483648, %v7443_v28  ;;  %v5279_v59 = vadd.s32 1, %v10299_v32  ;;  %v5348_v56 = vshll.u32 %v11238_v7, %v5339_v13  ;;  %v5343_v1 = vshrl.u32 %v11237_v45, %v5340_v26 }
 0x2c2   :  { %v4338_v60 = vxor.u32 2147483648, %v7445_v4  ;;  %v5346_v34 = vshrl.u32 %v11238_v7, %v5340_v26  ;;  %v5433_v50 = vshrl.u32 %v5432_v21, 23  ;;  %v5349_v25 = vshrl.u32 %v11242_v15, %v5340_v26 }
 0x2c3   :  { %v4342_v33 = vsel %vm4340_vm3, %v4341_v52, %v7445_v4  ;;  %v5175_v40 = vsel %vm5173_vm14, %v4341_v52, %v7445_v4  ;;  %v5280_v3 = vsel %vm5278_vm5, %v5279_v59, %v10299_v32  ;;  %v5344_v38 = vor.u32 %v5343_v1, %v5342_v63 }
 0x2c4   :  { %v4339_v53 = vsel %vm4337_vm6, %v7443_v28, %v4338_v60  ;;  %v5172_v47 = vsel %vm5170_vm0, %v7443_v28, %v4338_v60  ;;  %v5281_v8 = vadd.s32 %v5280_v3, %v5276_v30  ;;  %v5347_v42 = vor.u32 %v5346_v34, %v5345_v55 }
 0x2c5   :  { %v4343_v54 = vsel %vm4336_vm13, %v4339_v53, %v4342_v33  ;;  %v5176_v19 = vsel %vm5169_vm11, %v5172_v47, %v5175_v40  ;;  %v5350_v58 = vor.u32 %v5349_v25, %v5348_v56  ;;  %v5351_v29 = vshll.u32 %v11242_v15, %v5339_v13 }
 0x2c6   :  { %v4344_v35 = vsel %vm4333_vm4, nan, %v4343_v54  ;;  %v5177_v11 = vsel %vm4333_vm4, nan, %v5176_v19  ;;  %v5282_v41 = vadd.s32 536870912, %v5281_v8  ;;  %v5341_v17 = vshrl.u32 %v11266_v49, %v5340_v26 }
 0x2c7   :  { %7091 = vst [vmem:[%s11174_s1 + $0x158] sm:$0x3] %v4344_v35  ;;  %7131 = vst [vmem:[%s11174_s1 + $0x1d8] sm:$0x3] %v5177_v11  ;;  %v5352_v16 = vshrl.u32 %v7510_v62, %v5340_v26  ;;  %v5354_v43 = vshll.u32 %v7510_v62, %v5339_v13  ;;  %v5355_v48 = vshrl.u32 %v11292_v20, %v5340_v26  ;;  %vm5359_vm8 = vcmp.lt.s32.totalorder %v10291_v22, 3 }
 0x2c8   :  { %v5283_v31 = vshrl.u32 %v5282_v41, 30  ;;  %vm5360_vm9 = vcmp.lt.s32.totalorder %v10291_v22, 4  ;;  %v5429_v23 = vand.u32 2147483647, %v10261_v12  ;;  %v7140_v2 = vadd.s32 4294967169, %v5433_v50 }
 0x2c9   :  { %v5353_v46 = vor.u32 %v5352_v16, %v5351_v29  ;;  %v5356_v39 = vor.u32 %v5355_v48, %v5354_v43  ;;  %v5362_v51 = vsel %vm5360_vm9, %v5350_v58, 2102212464  ;;  %vm5358_vm10 = vcmp.lt.s32.totalorder %v10291_v22, 2 }
 0x2ca   :  { %v5284_v10 = vshll.u32 %v5283_v31, 30  ;;  %v5365_v27 = vsel %vm5357_vm2, %v5344_v38, %v5347_v42  ;;  %v5369_v32 = vsel %vm5357_vm2, %v5347_v42, %v5350_v58  ;;  %v5361_v13 = vsel %vm5357_vm2, %v5341_v17, %v5344_v38 }
 0x2cb   :  { %v5366_v21 = vsel %vm5360_vm9, %v5353_v46, 920167782  ;;  %v5370_v30 = vsel %vm5360_vm9, %v5356_v39, 1326507024  ;;  %v5439_v28 = vadd.s32 1, %v7140_v2  ;;  %v5363_v63 = vsel %vm5359_vm8, %v5347_v42, %v5362_v51 }
 0x2cc   :  { %v5285_v26 = vsub.s32 %v5281_v8, %v5284_v10  ;;  %v5367_v55 = vsel %vm5359_vm8, %v5350_v58, %v5366_v21  ;;  %v5371_v4 = vsel %vm5359_vm8, %v5353_v46, %v5370_v30  ;;  %v5364_v34 = vsel %vm5358_vm10, %v5361_v13, %v5363_v63 }
 0x2cd   :  { %v5368_v52 = vsel %vm5358_vm10, %v5365_v27, %v5367_v55  ;;  %v5372_v59 = vsel %vm5358_vm10, %v5369_v32, %v5371_v4  ;;  %vm5440_vm7 = vcmp.gt.s32.totalorder %v5439_v28, 0  ;;  %v5307_v3 = vsub.s32 4, %v5283_v31 }
 0x2ce   :  { %v5287_v56 = vsub.s32 0, %v5285_v26  ;;  %v10365_v60 = vmul.u32.u64.low %v10308_v44, %v5372_v59  ;;  %v10366_v1 = vmul.u32.u64.high %v10308_v44, %v5372_v59, %v10365_v60  ;;  %v5436_v22 = vand.u32 8388607, %v5429_v23 }
 0x2cf   :  { %v10369_v50 = vmul.u32.u64.low %v10308_v44, %v5368_v52  ;;  %v10370_v33 = vmul.u32.u64.high %v10308_v44, %v5368_v52, %v10369_v50  ;;  %v5441_v25 = vsel %vm5440_vm7, %v5439_v28, 0  ;;  %vm5223_vm12 = vcmp.lt.s32.totalorder %v10226_v24, 0  ;;  %v10407_v60 = vld [vmem:[#allocation2 + $0xb] ss:$4 sm:$0x3] }
 0x2d0   :  { %v7133_v40 = vmin.u32 %v5287_v56, %v5285_v26  ;;  %v5443_v53 = vand.u32 31, %v5441_v25  ;;  %v5380_v8 = vmul.u32 %v10308_v44, %v5364_v34  ;;  %v5277_v38 = vadd.s32 %v10298_v37, %v10295_v14 }
 0x2d1   :  { %vm5382_vm6 = vc.u32 %v10366_v1, %v10369_v50  ;;  %v5383_v54 = vadd.s32 1, %v10370_v33  ;;  %v5308_v58 = vsel %vm5223_vm12, %v5307_v3, %v5283_v31  ;;  %v5437_v35 = vor.u32 8388608, %v5436_v22 }
 0x2d2   :  { %v5289_v47 = vclz %v7133_v40  ;;  %v5444_v19 = vsub.s32 32, %v5443_v53  ;;  %v10384_v11 = vshrl.u32 %v5441_v25, 5  ;;  %v5446_v44 = vshll.u32 %v11266_v49, %v5443_v53 }
 0x2d3   :  { %v5384_v41 = vsel %vm5382_vm6, %v5383_v54, %v10370_v33  ;;  %v5449_v14 = vshll.u32 %v11237_v45, %v5443_v53  ;;  %vm10392_vm1 = vcmp.le.f32.partialorder %v5221_v9, 0.7853982  ;;  %v5455_v43 = vshll.u32 %v11242_v15, %v5443_v53 }
 0x2d4   :  { %v7134_v42 = vadd.s32 4294967294, %v5289_v47  ;;  %v5447_v29 = vshrl.u32 %v11237_v45, %v5444_v19  ;;  %v5385_v17 = vadd.s32 %v5384_v41, %v5380_v8  ;;  %v5450_v16 = vshrl.u32 %v11238_v7, %v5444_v19 }
 0x2d5   :  { %v5452_v31 = vshll.u32 %v11238_v7, %v5443_v53  ;;  %v5453_v46 = vshrl.u32 %v11242_v15, %v5444_v19  ;;  %v5456_v39 = vshrl.u32 %v7510_v62, %v5444_v19  ;;  %v5458_v13 = vshll.u32 %v7510_v62, %v5443_v53 }
 0x2d6   :  { %vm7135_vm15 = vcmp.lt.s32.totalorder %v7134_v42, 0  ;;  %v5386_v9 = vadd.s32 536870912, %v5385_v17  ;;  %v5448_v27 = vor.u32 %v5447_v29, %v5446_v44  ;;  %v5459_v21 = vshrl.u32 %v11292_v20, %v5444_v19 }
 0x2d7   :  { %v5292_v48 = vsel %vm7135_vm15, 0, %v7134_v42  ;;  %v5457_v32 = vor.u32 %v5456_v39, %v5455_v43  ;;  %v5451_v55 = vor.u32 %v5450_v16, %v5449_v14  ;;  %v5445_v4 = vshrl.u32 %v11266_v49, %v5444_v19 }
 0x2d8   :  { %v5293_v51 = vsub.s32 32, %v5292_v48  ;;  %v5294_v2 = vshll.u32 %v5285_v26, %v5292_v48  ;;  %v5297_v10 = vsub.s32 4294967266, %v5292_v48  ;;  %v5387_v63 = vshrl.u32 %v5386_v9, 30 }
 0x2d9   :  { %v5454_v52 = vor.u32 %v5453_v46, %v5452_v31  ;;  %vm5461_vm13 = vcmp.lt.s32.totalorder %v10384_v11, 1  ;;  %vm5464_vm4 = vcmp.lt.s32.totalorder %v10384_v11, 4  ;;  %vm5463_vm3 = vcmp.lt.s32.totalorder %v10384_v11, 3 }
 0x2da   :  { %v5295_v30 = vshrl.u32 %v5277_v38, %v5293_v51  ;;  %v5298_v28 = vadd.s32 127, %v5297_v10  ;;  %v5388_v56 = vshll.u32 %v5387_v63, 30  ;;  %v5460_v34 = vor.u32 %v5459_v21, %v5458_v13 }
 0x2db   :  { %vm5462_vm11 = vcmp.lt.s32.totalorder %v10384_v11, 2  ;;  %v5466_v33 = vsel %vm5464_vm4, %v5454_v52, 2102212464  ;;  %v5470_v40 = vsel %vm5464_vm4, %v5457_v32, 920167782  ;;  %v5469_v53 = vsel %vm5461_vm13, %v5448_v27, %v5451_v55 }
 0x2dc   :  { %v5296_v26 = vor.u32 %v5295_v30, %v5294_v2  ;;  %v5299_v59 = vshll.u32 %v5298_v28, 23  ;;  %v10414_v25 = vsub.s32 %v5385_v17, %v5388_v56  ;;  %v10420_v47 = vsel %vm10392_vm1, 0, %v5308_v58 }
 0x2dd   :  { %v5471_v8 = vsel %vm5463_vm3, %v5454_v52, %v5470_v40  ;;  %v5477_v38 = vshll.u32 %v5437_v35, 8  ;;  %v10426_v54 = vrot.slane %v10407_v60, %v7534_v5  ;;  %v5473_v41 = vsel %vm5461_vm13, %v5451_v55, %v5454_v52 }
 0x2de   :  { %v5300_v3 = vor.u32 4788187, %v5299_v59  ;;  %v5303_v22 = vcvt.s32.f32 %v5296_v26  ;;  %v5391_v42 = vsub.s32 0, %v10414_v25  ;;  %v10433_v44 = vmul.f32 %v10220_v0, %v11309_v36 }
 0x2df   :  { %v5465_v58 = vsel %vm5461_vm13, %v5445_v4, %v5448_v27  ;;  %v5467_v35 = vsel %vm5463_vm3, %v5451_v55, %v5466_v33  ;;  %v5472_v5 = vsel %vm5462_vm11, %v5469_v53, %v5471_v8  ;;  %v5474_v29 = vsel %vm5464_vm4, %v5460_v34, 1326507024 }
 0x2e0   :  { %v5301_v19 = vand.u32 2147483647, %v5300_v3  ;;  %v7137_v17 = vmin.u32 %v5391_v42, %v10414_v25  ;;  %v5411_v16 = vsub.s32 4, %v5387_v63  ;;  %v5475_v0 = vsel %vm5463_vm3, %v5457_v32, %v5474_v29 }
 0x2e1   :  { %vm5327_vm0 = vcmp.lt.s32.totalorder %v10230_v57, 0  ;;  %v5476_v43 = vsel %vm5462_vm11, %v5473_v41, %v5475_v0  ;;  %v10449_v48 = vmul.u32.u64.low %v5477_v38, %v5472_v5  ;;  %v10450_v31 = vmul.u32.u64.high %v5477_v38, %v5472_v5, %v10449_v48 }
 0x2e2   :  { %v5304_v14 = vmul.f32 %v5303_v22, %v5301_v19  ;;  %vm10454_vm14 = vcmp.le.f32.partialorder %v5325_v61, 0.7853982  ;;  %v5393_v51 = vclz %v7137_v17  ;;  %v5468_v2 = vsel %vm5462_vm11, %v5465_v58, %v5467_v35 }
 0x2e3   :  { %v5314_v10 = vadd.s32 3, %v10420_v47  ;;  %v10461_v9 = vmul.u32.u64.low %v5477_v38, %v5476_v43  ;;  %v10462_v27 = vmul.u32.u64.high %v5477_v38, %v5476_v43, %v10461_v9  ;;  %v10466_v32 = vmul.f32 %v10426_v54, %v7542_v18 }
 0x2e4   :  { %v5305_v46 = vxor.u32 2147483648, %v5304_v14  ;;  %v7138_v61 = vadd.s32 4294967294, %v5393_v51  ;;  %v5412_v21 = vsel %vm5327_vm0, %v5411_v16, %v5387_v63  ;;  %v5536_v30 = vand.u32 2139095040, %v10433_v44 }
 0x2e5   :  { %v5484_v28 = vmul.u32 %v5477_v38, %v5468_v2  ;;  %v5487_v55 = vadd.s32 1, %v10450_v31  ;;  %v5533_v4 = vand.u32 2147483647, %v10433_v44  ;;  %v5381_v52 = vadd.s32 %v10369_v50, %v10366_v1 }
 0x2e6   :  { %v5306_v13 = vsel %vm5223_vm12, %v5305_v46, %v5304_v14  ;;  %vm7139_vm2 = vcmp.lt.s32.totalorder %v7138_v61, 0  ;;  %v5537_v26 = vshrl.u32 %v5536_v30, 23  ;;  %v10482_v63 = vsel %vm10454_vm14, 0, %v5412_v21 }
 0x2e7   :  { %v5309_v11 = vsel %vm10392_vm1, %v10226_v24, %v5306_v13  ;;  %v5396_v59 = vsel %vm7139_vm2, 0, %v7138_v61  ;;  %vm5486_vm5 = vc.u32 %v10462_v27, %v10449_v48  ;;  %v5540_v1 = vand.u32 8388607, %v5533_v4 }
 0x2e8   :  { %7446 = vcosq.f32 %v5309_v11  ;;  %v5397_v37 = vsub.s32 32, %v5396_v59  ;;  %v5398_v56 = vshll.u32 %v10414_v25, %v5396_v59  ;;  %v5401_v34 = vsub.s32 4294967266, %v5396_v59 }
 0x2e9   :  { %7448 = vsinq.f32 %v5309_v11  ;;  %v5488_v33 = vsel %vm5486_vm5, %v5487_v55, %v10450_v31  ;;  %v7144_v3 = vadd.s32 4294967169, %v5537_v26  ;;  %v5637_v50 = vand.u32 2147483647, %v10466_v32 }
 0x2ea   :  { %v5489_v40 = vadd.s32 %v5488_v33, %v5484_v28  ;;  %v5399_v22 = vshrl.u32 %v5381_v52, %v5397_v37  ;;  %v5402_v53 = vadd.s32 127, %v5401_v34  ;;  %v5640_v8 = vand.u32 2139095040, %v10466_v32 }
 0x2eb   :  { %v5315_v38 = vand.u32 3, %v5314_v10  ;;  %v5543_v42 = vadd.s32 1, %v7144_v3  ;;  %v10493_v25 = vrot.slane %v10407_v60, %v7536_v6  ;;  %vm5313_vm8 = vweird.f32 %v10226_v24 }
 0x2ec   :  { %v5490_v19 = vadd.s32 536870912, %v5489_v40  ;;  %v5400_v41 = vor.u32 %v5399_v22, %v5398_v56  ;;  %v5403_v58 = vshll.u32 %v5402_v53, 23  ;;  %v5418_v35 = vadd.s32 3, %v10482_v63 }
 0x2ed   :  { %v5541_v29 = vor.u32 8388608, %v5540_v1  ;;  %vm5544_vm9 = vcmp.gt.s32.totalorder %v5543_v42, 0  ;;  %v10499_v14 = vand.u32 8388607, %v5637_v50  ;;  %vm5431_vm10 = vcmp.lt.s32.totalorder %v10261_v12, 0 }
 0x2ee   :  { %v5491_v5 = vshrl.u32 %v5490_v19, 30  ;;  %v5404_v17 = vor.u32 4788187, %v5403_v58  ;;  %v5407_v16 = vcvt.s32.f32 %v5400_v41  ;;  %v5545_v0 = vsel %vm5544_vm9, %v5543_v42, 0 }
 0x2ef   :  { %v5641_v6 = vshrl.u32 %v5640_v8, 23  ;;  %vm5316_vm7 = vcmp.lt.s32.totalorder %v5315_v38, 2  ;;  %vm5317_vm12 = vcmp.eq.s32.totalorder %v5315_v38, 0  ;;  %v5547_v43 = vand.u32 31, %v5545_v0 }
 0x2f0   :  { %v5492_v60 = vshll.u32 %v5491_v5, 30  ;;  %vm5320_vm6 = vcmp.eq.s32.totalorder %v5315_v38, 2  ;;  %v5405_v46 = vand.u32 2147483647, %v5404_v17  ;;  %v10504_v51 = vand.u32 3, %v5418_v35 }
 0x2f1   :  { %v10507_v2 = vadd.s32 %v10449_v48, %v10462_v27  ;;  %v5548_v61 = vsub.s32 32, %v5547_v43  ;;  %v10514_v21 = vshll.u32 %v5541_v29, 8  ;;  %v7148_v28 = vadd.s32 4294967169, %v5641_v6 }
 0x2f2   :  { %v10502_v31 = vpop.eup %7446  ;;  %v10512_v13 = vsub.s32 %v5489_v40, %v5492_v60  ;;  %v5408_v11 = vmul.f32 %v5407_v16, %v5405_v46  ;;  %v5645_v55 = vor.u32 8388608, %v10499_v14  ;;  %v5515_v52 = vsub.s32 4, %v5491_v5 }
 0x2f3   :  { %v10509_v10 = vpop.eup %7448  ;;  %v11223_v9 = vxor.u32 2147483648, %v10502_v31  ;;  %v5550_v26 = vshll.u32 %v11266_v49, %v5547_v43  ;;  %v5551_v56 = vshrl.u32 %v11237_v45, %v5548_v61  ;;  %v5553_v34 = vshll.u32 %v11237_v45, %v5547_v43 }
 0x2f4   :  { %v5318_v30 = vxor.u32 2147483648, %v10509_v10  ;;  %v5495_v27 = vsub.s32 0, %v10512_v13  ;;  %v5409_v37 = vxor.u32 2147483648, %v5408_v11  ;;  %vm10532_vm1 = vcmp.le.f32.partialorder %v5429_v23, 0.7853982 }
 0x2f5   :  { %v5322_v48 = vsel %vm5320_vm6, %v11223_v9, %v10509_v10  ;;  %v5546_v1 = vshrl.u32 %v5545_v0, 5  ;;  %v5554_v22 = vshrl.u32 %v11238_v7, %v5548_v61  ;;  %v5556_v38 = vshll.u32 %v11238_v7, %v5547_v43 }
 0x2f6   :  { %v5319_v59 = vsel %vm5317_vm12, %v10502_v31, %v5318_v30  ;;  %v7141_v3 = vmin.u32 %v5495_v27, %v10512_v13  ;;  %v5410_v8 = vsel %vm5327_vm0, %v5409_v37, %v5408_v11  ;;  %v5647_v19 = vadd.s32 1, %v7148_v28 }
 0x2f7   :  { %v5323_v33 = vsel %vm5316_vm7, %v5319_v59, %v5322_v48  ;;  %v5413_v23 = vsel %vm10454_vm14, %v10230_v57, %v5410_v8  ;;  %v5516_v41 = vsel %vm5431_vm10, %v5515_v52, %v5491_v5  ;;  %v5549_v58 = vshrl.u32 %v11266_v49, %v5548_v61 }
 0x2f8   :  { %v5324_v53 = vsel %vm5313_vm8, nan, %v5323_v33  ;;  %v5497_v42 = vclz %v7141_v3  ;;  %7450 = vcosq.f32 %v5413_v23  ;;  %v5552_v35 = vor.u32 %v5551_v56, %v5550_v26 }
 0x2f9   :  { %7164 = vst [vmem:[%s11174_s1 + $0x60] sm:$0xff] %v5324_v53  ;;  %v5555_v29 = vor.u32 %v5554_v22, %v5553_v34  ;;  %v5557_v17 = vshrl.u32 %v11242_v15, %v5548_v61  ;;  %7452 = vsinq.f32 %v5413_v23  ;;  %v5559_v0 = vshll.u32 %v11242_v15, %v5547_v43 }
 0x2fa   :  { %v7142_v16 = vadd.s32 4294967294, %v5497_v42  ;;  %v5560_v6 = vshrl.u32 %v7510_v62, %v5548_v61  ;;  %vm5424_vm15 = vcmp.eq.s32.totalorder %v10504_v51, 2  ;;  %v5562_v60 = vshll.u32 %v7510_v62, %v5547_v43 }
 0x2fb   :  { %v5558_v39 = vor.u32 %v5557_v17, %v5556_v38  ;;  %v5563_v5 = vshrl.u32 %v11292_v20, %v5548_v61  ;;  %vm5565_vm13 = vcmp.lt.s32.totalorder %v5546_v1, 1  ;;  %vm5421_vm4 = vcmp.eq.s32.totalorder %v10504_v51, 0 }
 0x2fc   :  { %vm7143_vm3 = vcmp.lt.s32.totalorder %v7142_v16, 0  ;;  %v5561_v46 = vor.u32 %v5560_v6, %v5559_v0  ;;  %vm5566_vm11 = vcmp.lt.s32.totalorder %v5546_v1, 2  ;;  %vm5567_vm0 = vcmp.lt.s32.totalorder %v5546_v1, 3 }
 0x2fd   :  { %vm5420_vm14 = vcmp.lt.s32.totalorder %v10504_v51, 2  ;;  %v5500_v11 = vsel %vm7143_vm3, 0, %v7142_v16  ;;  %v5564_v28 = vor.u32 %v5563_v5, %v5562_v60  ;;  %vm5568_vm2 = vcmp.lt.s32.totalorder %v5546_v1, 4 }
 0x2fe   :  { %v5569_v48 = vsel %vm5565_vm13, %v5549_v58, %v5552_v35  ;;  %vm5417_vm5 = vweird.f32 %v10230_v57  ;;  %v5501_v27 = vsub.s32 32, %v5500_v11  ;;  %v5502_v43 = vshll.u32 %v10512_v13, %v5500_v11 }
 0x2ff   :  { %v5505_v61 = vsub.s32 4294967266, %v5500_v11  ;;  %v5570_v52 = vsel %vm5568_vm2, %v5558_v39, 2102212464  ;;  %v10566_v26 = vsel %vm10532_vm1, 0, %v5516_v41  ;;  %v5573_v37 = vsel %vm5565_vm13, %v5552_v35, %v5555_v29 }
 0x300   :  { %v5571_v59 = vsel %vm5567_vm0, %v5555_v29, %v5570_v52  ;;  %v5574_v56 = vsel %vm5568_vm2, %v5561_v46, 920167782  ;;  %v5503_v34 = vshrl.u32 %v10507_v2, %v5501_v27  ;;  %v5577_v13 = vsel %vm5565_vm13, %v5555_v29, %v5558_v39 }
 0x301   :  { %v5506_v33 = vadd.s32 127, %v5505_v61  ;;  %v5575_v3 = vsel %vm5567_vm0, %v5558_v39, %v5574_v56  ;;  %v5572_v22 = vsel %vm5566_vm11, %v5569_v48, %v5571_v59  ;;  %v5578_v8 = vsel %vm5568_vm2, %v5564_v28, 1326507024 }
 0x302   :  { %v5576_v53 = vsel %vm5566_vm11, %v5573_v37, %v5575_v3  ;;  %vm5648_vm9 = vcmp.gt.s32.totalorder %v5647_v19, 0  ;;  %v5504_v38 = vor.u32 %v5503_v34, %v5502_v43  ;;  %v5579_v42 = vsel %vm5567_vm0, %v5561_v46, %v5578_v8  ;;  %v10578_v58 = vpop.eup %7450 }
 0x303   :  { %v5507_v23 = vshll.u32 %v5506_v33, 23  ;;  %v5649_v41 = vsel %vm5648_vm9, %v5647_v19, 0  ;;  %v5580_v2 = vsel %vm5566_vm11, %v5577_v13, %v5579_v42  ;;  %v10588_v16 = vpop.eup %7452  ;;  %v11220_v0 = vxor.u32 2147483648, %v10578_v58 }
 0x304   :  { %v10582_v35 = vmul.u32.u64.low %v10514_v21, %v5576_v53  ;;  %v10583_v17 = vmul.u32.u64.high %v10514_v21, %v5576_v53, %v10582_v35  ;;  %v10586_v29 = vshrl.u32 %v5649_v41, 5  ;;  %v5511_v39 = vcvt.s32.f32 %v5504_v38 }
 0x305   :  { %v5508_v6 = vor.u32 4788187, %v5507_v23  ;;  %v5651_v60 = vand.u32 31, %v5649_v41  ;;  %v11221_v19 = vxor.u32 2147483648, %v10588_v16  ;;  %v5522_v5 = vadd.s32 3, %v10566_v26 }
 0x306   :  { %v10594_v1 = vmul.u32.u64.low %v10514_v21, %v5580_v2  ;;  %v10595_v46 = vmul.u32.u64.high %v10514_v21, %v5580_v2, %v10594_v1  ;;  %v5426_v11 = vsel %vm5424_vm15, %v11220_v0, %v10588_v16  ;;  %v5588_v48 = vmul.u32 %v10514_v21, %v5572_v22 }
 0x307   :  { %v5509_v28 = vand.u32 2147483647, %v5508_v6  ;;  %v5652_v27 = vsub.s32 32, %v5651_v60  ;;  %v5423_v43 = vsel %vm5421_vm4, %v10578_v58, %v11221_v19  ;;  %v5591_v61 = vadd.s32 1, %v10583_v17 }
 0x308   :  { %v5654_v52 = vshll.u32 %v11266_v49, %v5651_v60  ;;  %vm5669_vm7 = vcmp.lt.s32.totalorder %v10586_v29, 1  ;;  %v5427_v59 = vsel %vm5420_vm14, %v5423_v43, %v5426_v11  ;;  %v5657_v21 = vshll.u32 %v11237_v45, %v5651_v60 }
 0x309   :  { %v5512_v37 = vmul.f32 %v5511_v39, %v5509_v28  ;;  %v5655_v56 = vshrl.u32 %v11237_v45, %v5652_v27  ;;  %v5428_v34 = vsel %vm5417_vm5, nan, %v5427_v59  ;;  %vm5590_vm12 = vc.u32 %v10595_v46, %v10582_v35 }
 0x30a   :  { %v5658_v33 = vshrl.u32 %v11238_v7, %v5652_v27  ;;  %v5660_v3 = vshll.u32 %v11238_v7, %v5651_v60  ;;  %7165 = vst [vmem:[%s11174_s1 + $0x68] sm:$0xff] %v5428_v34  ;;  %v5592_v13 = vsel %vm5590_vm12, %v5591_v61, %v10583_v17  ;;  %v5653_v22 = vshrl.u32 %v11266_v49, %v5652_v27 }
 0x30b   :  { %v5513_v51 = vxor.u32 2147483648, %v5512_v37  ;;  %v5661_v53 = vshrl.u32 %v11242_v15, %v5652_v27  ;;  %v5593_v8 = vadd.s32 %v5592_v13, %v5588_v48  ;;  %v5656_v38 = vor.u32 %v5655_v56, %v5654_v52 }
 0x30c   :  { %v5663_v23 = vshll.u32 %v11242_v15, %v5651_v60  ;;  %v5664_v42 = vshrl.u32 %v7510_v62, %v5652_v27  ;;  %v5659_v2 = vor.u32 %v5658_v33, %v5657_v21  ;;  %v5666_v6 = vshll.u32 %v7510_v62, %v5651_v60 }
 0x30d   :  { %v5514_v41 = vsel %vm5431_vm10, %v5513_v51, %v5512_v37  ;;  %v5667_v39 = vshrl.u32 %v11292_v20, %v5652_v27  ;;  %v5594_v1 = vadd.s32 536870912, %v5593_v8  ;;  %v5662_v11 = vor.u32 %v5661_v53, %v5660_v3 }
 0x30e   :  { %v5517_v17 = vsel %vm10532_vm1, %v10261_v12, %v5514_v41  ;;  %v5665_v28 = vor.u32 %v5664_v42, %v5663_v23  ;;  %vm5671_vm6 = vcmp.lt.s32.totalorder %v10586_v29, 3  ;;  %vm5672_vm15 = vcmp.lt.s32.totalorder %v10586_v29, 4 }
 0x30f   :  { %7454 = vcosq.f32 %v5517_v17  ;;  %v5668_v48 = vor.u32 %v5667_v39, %v5666_v6  ;;  %v5595_v43 = vshrl.u32 %v5594_v1, 30  ;;  %vm5670_vm10 = vcmp.lt.s32.totalorder %v10586_v29, 2 }
 0x310   :  { %7456 = vsinq.f32 %v5517_v17  ;;  %v5674_v60 = vsel %vm5672_vm15, %v5662_v11, 2102212464  ;;  %v5677_v40 = vsel %vm5669_vm7, %v5656_v38, %v5659_v2  ;;  %v5678_v27 = vsel %vm5672_vm15, %v5665_v28, 920167782 }
 0x311   :  { %v5685_v61 = vshll.u32 %v5645_v55, 8  ;;  %v10649_v52 = vmul.f32 %v10493_v25, %v7542_v18  ;;  %v5596_v59 = vshll.u32 %v5595_v43, 30  ;;  %v5673_v37 = vsel %vm5669_vm7, %v5653_v22, %v5656_v38 }
 0x312   :  { %v5679_v56 = vsel %vm5671_vm6, %v5662_v11, %v5678_v27  ;;  %v5681_v21 = vsel %vm5669_vm7, %v5659_v2, %v5662_v11  ;;  %v5619_v34 = vsub.s32 4, %v5595_v43  ;;  %v5675_v33 = vsel %vm5671_vm6, %v5659_v2, %v5674_v60 }
 0x313   :  { %v5680_v14 = vsel %vm5670_vm10, %v5677_v40, %v5679_v56  ;;  %v5682_v18 = vsel %vm5672_vm15, %v5668_v48, 1326507024  ;;  %v5523_v55 = vand.u32 3, %v5522_v5  ;;  %vm5535_vm1 = vcmp.lt.s32.totalorder %v10433_v44, 0 }
 0x314   :  { %v10664_v3 = vsub.s32 %v5593_v8, %v5596_v59  ;;  %v5683_v51 = vsel %vm5671_vm6, %v5665_v28, %v5682_v18  ;;  %v10670_v22 = vmul.u32.u64.low %v5685_v61, %v5680_v14  ;;  %v10671_v53 = vmul.u32.u64.high %v5685_v61, %v5680_v14, %v10670_v22 }
 0x315   :  { %v5684_v13 = vsel %vm5670_vm10, %v5681_v21, %v5683_v51  ;;  %v10675_v38 = vmul.f32 %v10426_v54, %v11309_v36  ;;  %v5676_v5 = vsel %vm5670_vm10, %v5673_v37, %v5675_v33  ;;  %vm5521_vm13 = vweird.f32 %v10261_v12 }
 0x316   :  { %v5599_v23 = vsub.s32 0, %v10664_v3  ;;  %v10680_v8 = vmul.u32.u64.low %v5685_v61, %v5684_v13  ;;  %v10681_v42 = vmul.u32.u64.high %v5685_v61, %v5684_v13, %v10680_v8  ;;  %v5620_v41 = vsel %vm5535_vm1, %v5619_v34, %v5595_v43 }
 0x317   :  { %v5741_v2 = vand.u32 2147483647, %v10649_v52  ;;  %v5744_v6 = vand.u32 2139095040, %v10649_v52  ;;  %vm5524_vm4 = vcmp.lt.s32.totalorder %v5523_v55, 2  ;;  %vm5528_vm3 = vcmp.eq.s32.totalorder %v5523_v55, 2 }
 0x318   :  { %vm10690_vm11 = vcmp.le.f32.partialorder %v5533_v4, 0.7853982  ;;  %v7145_v29 = vmin.u32 %v5599_v23, %v10664_v3  ;;  %v5692_v17 = vmul.u32 %v5685_v61, %v5676_v5  ;;  %v5695_v1 = vadd.s32 1, %v10671_v53 }
 0x319   :  { %v10695_v39 = vpop.eup %7454  ;;  %v5745_v11 = vshrl.u32 %v5744_v6, 23  ;;  %v5848_v28 = vand.u32 2139095040, %v10675_v38  ;;  %vm5525_vm0 = vcmp.eq.s32.totalorder %v5523_v55, 0  ;;  %v10704_v4 = vsel %vm10690_vm11, 0, %v5620_v41 }
 0x31a   :  { %v10699_v48 = vpop.eup %7456  ;;  %v11218_v43 = vxor.u32 2147483648, %v10695_v39  ;;  %v5601_v60 = vclz %v7145_v29  ;;  %v5589_v27 = vadd.s32 %v10582_v35, %v10595_v46  ;;  %vm5694_vm14 = vc.u32 %v10681_v42, %v10670_v22 }
 0x31b   :  { %v11219_v40 = vxor.u32 2147483648, %v10699_v48  ;;  %v5748_v61 = vand.u32 8388607, %v5741_v2  ;;  %v5696_v56 = vsel %vm5694_vm14, %v5695_v1, %v10671_v53  ;;  %v7152_v21 = vadd.s32 4294967169, %v5745_v11 }
 0x31c   :  { %v5530_v59 = vsel %vm5528_vm3, %v11218_v43, %v10699_v48  ;;  %v7146_v37 = vadd.s32 4294967294, %v5601_v60  ;;  %v5626_v35 = vadd.s32 3, %v10704_v4  ;;  %v5697_v46 = vadd.s32 %v5696_v56, %v5692_v17 }
 0x31d   :  { %v5527_v34 = vsel %vm5525_vm0, %v10695_v39, %v11219_v40  ;;  %v5849_v33 = vshrl.u32 %v5848_v28, 23  ;;  %v5751_v18 = vadd.s32 1, %v7152_v21  ;;  %v11222_v51 = vand.u32 2147483647, %v10675_v38 }
 0x31e   :  { %v5531_v14 = vsel %vm5524_vm4, %v5527_v34, %v5530_v59  ;;  %vm7147_vm2 = vcmp.lt.s32.totalorder %v7146_v37, 0  ;;  %v5698_v53 = vadd.s32 536870912, %v5697_v46  ;;  %v5749_v5 = vor.u32 8388608, %v5748_v61 }
 0x31f   :  { %v5532_v13 = vsel %vm5521_vm13, nan, %v5531_v14  ;;  %v5604_v23 = vsel %vm7147_vm2, 0, %v7146_v37  ;;  %vm5752_vm9 = vcmp.gt.s32.totalorder %v5751_v18, 0  ;;  %v7156_v17 = vadd.s32 4294967169, %v5849_v33 }
 0x320   :  { %7166 = vst [vmem:[%s11174_s1 + $0x70] sm:$0x3] %v5532_v13  ;;  %v5605_v8 = vsub.s32 32, %v5604_v23  ;;  %v5606_v41 = vshll.u32 %v10664_v3, %v5604_v23  ;;  %v5609_v6 = vsub.s32 4294967266, %v5604_v23  ;;  %v5699_v55 = vshrl.u32 %v5698_v53, 30 }
 0x321   :  { %v5753_v29 = vsel %vm5752_vm9, %v5751_v18, 0  ;;  %vm5639_vm7 = vcmp.lt.s32.totalorder %v10466_v32, 0  ;;  %v10730_v60 = vand.u32 3, %v5626_v35  ;;  %v10733_v61 = vadd.s32 %v10670_v22, %v10681_v42 }
 0x322   :  { %v5607_v1 = vshrl.u32 %v5589_v27, %v5605_v8  ;;  %v5610_v11 = vadd.s32 127, %v5609_v6  ;;  %v5755_v28 = vand.u32 31, %v5753_v29  ;;  %v5700_v59 = vshll.u32 %v5699_v55, 30 }
 0x323   :  { %v10735_v37 = vshll.u32 %v5749_v5, 8  ;;  %v10739_v34 = vand.u32 8388607, %v11222_v51  ;;  %v5723_v33 = vsub.s32 4, %v5699_v55  ;;  %v10743_v14 = vshrl.u32 %v5753_v29, 5 }
 0x324   :  { %v5608_v56 = vor.u32 %v5607_v1, %v5606_v41  ;;  %v5611_v3 = vshll.u32 %v5610_v11, 23  ;;  %v5756_v21 = vsub.s32 32, %v5755_v28  ;;  %v10741_v27 = vsub.s32 %v5697_v46, %v5700_v59 }
 0x325   :  { %v5855_v35 = vadd.s32 1, %v7156_v17  ;;  %v5758_v22 = vshll.u32 %v11266_v49, %v5755_v28  ;;  %v5761_v42 = vshll.u32 %v11237_v45, %v5755_v28  ;;  %vm10749_vm12 = vcmp.le.f32.partialorder %v5637_v50, 0.7853982 }
 0x326   :  { %v5612_v18 = vor.u32 4788187, %v5611_v3  ;;  %v5615_v13 = vcvt.s32.f32 %v5608_v56  ;;  %v5703_v53 = vsub.s32 0, %v10741_v27  ;;  %v5759_v46 = vshrl.u32 %v11237_v45, %v5756_v21 }
 0x327   :  { %v5762_v5 = vshrl.u32 %v11238_v7, %v5756_v21  ;;  %v5764_v8 = vshll.u32 %v11238_v7, %v5755_v28  ;;  %v5765_v6 = vshrl.u32 %v11242_v15, %v5756_v21  ;;  %v5767_v29 = vshll.u32 %v11242_v15, %v5755_v28 }
 0x328   :  { %v5613_v41 = vand.u32 2147483647, %v5612_v18  ;;  %v5768_v17 = vshrl.u32 %v7510_v62, %v5756_v21  ;;  %v7149_v50 = vmin.u32 %v5703_v53, %v10741_v27  ;;  %v5757_v1 = vshrl.u32 %v11266_v49, %v5756_v21 }
 0x329   :  { %v5853_v11 = vor.u32 8388608, %v10739_v34  ;;  %vm5856_vm6 = vcmp.gt.s32.totalorder %v5855_v35, 0  ;;  %v5760_v56 = vor.u32 %v5759_v46, %v5758_v22  ;;  %v5763_v3 = vor.u32 %v5762_v5, %v5761_v42 }
 0x32a   :  { %v5616_v59 = vmul.f32 %v5615_v13, %v5613_v41  ;;  %v5770_v43 = vshll.u32 %v7510_v62, %v5755_v28  ;;  %v5705_v40 = vclz %v7149_v50  ;;  %v5724_v18 = vsel %vm5639_vm7, %v5723_v33, %v5699_v55 }
 0x32b   :  { %v5766_v0 = vor.u32 %v5765_v6, %v5764_v8  ;;  %v5769_v19 = vor.u32 %v5768_v17, %v5767_v29  ;;  %v5771_v9 = vshrl.u32 %v11292_v20, %v5756_v21  ;;  %vm5773_vm15 = vcmp.lt.s32.totalorder %v10743_v14, 1 }
 0x32c   :  { %v5617_v51 = vxor.u32 2147483648, %v5616_v59  ;;  %vm5774_vm10 = vcmp.lt.s32.totalorder %v10743_v14, 2  ;;  %v7150_v34 = vadd.s32 4294967294, %v5705_v40  ;;  %vm5775_vm4 = vcmp.lt.s32.totalorder %v10743_v14, 3 }
 0x32d   :  { %vm5776_vm3 = vcmp.lt.s32.totalorder %v10743_v14, 4  ;;  %v5777_v28 = vsel %vm5773_vm15, %v5757_v1, %v5760_v56  ;;  %v5772_v33 = vor.u32 %v5771_v9, %v5770_v43  ;;  %v5781_v21 = vsel %vm5773_vm15, %v5760_v56, %v5763_v3 }
 0x32e   :  { %v5618_v55 = vsel %vm5535_vm1, %v5617_v51, %v5616_v59  ;;  %v5778_v13 = vsel %vm5776_vm3, %v5766_v0, 2102212464  ;;  %vm7151_vm0 = vcmp.lt.s32.totalorder %v7150_v34, 0  ;;  %v5782_v42 = vsel %vm5776_vm3, %v5769_v19, 920167782 }
 0x32f   :  { %v5621_v40 = vsel %vm10690_vm11, %v10433_v44, %v5618_v55  ;;  %v5779_v22 = vsel %vm5775_vm4, %v5763_v3, %v5778_v13  ;;  %v5708_v51 = vsel %vm7151_vm0, 0, %v7150_v34  ;;  %v10788_v9 = vsel %vm10749_vm12, 0, %v5724_v18 }
 0x330   :  { %7458 = vcosq.f32 %v5621_v40  ;;  %v5783_v43 = vsel %vm5775_vm4, %v5766_v0, %v5782_v42  ;;  %v5709_v53 = vsub.s32 32, %v5708_v51  ;;  %v5710_v54 = vshll.u32 %v10741_v27, %v5708_v51 }
 0x331   :  { %7460 = vsinq.f32 %v5621_v40  ;;  %v5713_v46 = vsub.s32 4294967266, %v5708_v51  ;;  %v5780_v5 = vsel %vm5774_vm10, %v5777_v28, %v5779_v22  ;;  %v5784_v8 = vsel %vm5774_vm10, %v5781_v21, %v5783_v43 }
 0x332   :  { %v5785_v41 = vsel %vm5773_vm15, %v5763_v3, %v5766_v0  ;;  %v5786_v6 = vsel %vm5776_vm3, %v5772_v33, 1326507024  ;;  %vm5629_vm1 = vcmp.eq.s32.totalorder %v10730_v60, 0  ;;  %v5711_v29 = vshrl.u32 %v10733_v61, %v5709_v53 }
 0x333   :  { %v5714_v17 = vadd.s32 127, %v5713_v46  ;;  %v5787_v27 = vsel %vm5775_vm4, %v5769_v19, %v5786_v6  ;;  %v5857_v50 = vsel %vm5856_vm6, %v5855_v35, 0  ;;  %vm5628_vm11 = vcmp.lt.s32.totalorder %v10730_v60, 2 }
 0x334   :  { %v5788_v1 = vsel %vm5774_vm10, %v5785_v41, %v5787_v27  ;;  %v10810_v0 = vmul.u32.u64.low %v10735_v37, %v5784_v8  ;;  %v10811_v59 = vmul.u32.u64.high %v10735_v37, %v5784_v8, %v10810_v0  ;;  %v10814_v56 = vshrl.u32 %v5857_v50, 5 }
 0x335   :  { %vm5625_vm14 = vweird.f32 %v10433_v44  ;;  %v5712_v61 = vor.u32 %v5711_v29, %v5710_v54  ;;  %v5715_v3 = vshll.u32 %v5714_v17, 23  ;;  %vm5632_vm2 = vcmp.eq.s32.totalorder %v10730_v60, 2 }
 0x336   :  { %v10818_v19 = vmul.u32.u64.low %v10735_v37, %v5788_v1  ;;  %v10819_v18 = vmul.u32.u64.high %v10735_v37, %v5788_v1, %v10818_v19  ;;  %v10823_v14 = vadd.s32 3, %v10788_v9  ;;  %v5859_v35 = vand.u32 31, %v5857_v50 }
 0x337   :  { %v10825_v34 = vshll.u32 %v5853_v11, 8  ;;  %v5716_v28 = vor.u32 4788187, %v5715_v3  ;;  %v5719_v55 = vcvt.s32.f32 %v5712_v61  ;;  %v5796_v33 = vmul.u32 %v10735_v37, %v5780_v5 }
 0x338   :  { %vm5877_vm9 = vcmp.lt.s32.totalorder %v10814_v56, 1  ;;  %v5799_v13 = vadd.s32 1, %v10811_v59  ;;  %v5860_v21 = vsub.s32 32, %v5859_v35  ;;  %v5862_v40 = vshll.u32 %v11266_v49, %v5859_v35 }
 0x339   :  { %vm5879_vm6 = vcmp.lt.s32.totalorder %v10814_v56, 3  ;;  %v5717_v22 = vand.u32 2147483647, %v5716_v28  ;;  %vm5798_vm15 = vc.u32 %v10819_v18, %v10810_v0  ;;  %v5865_v11 = vshll.u32 %v11237_v45, %v5859_v35 }
 0x33a   :  { %vm5878_vm10 = vcmp.lt.s32.totalorder %v10814_v56, 2  ;;  %vm5880_vm4 = vcmp.lt.s32.totalorder %v10814_v56, 4  ;;  %v10837_v37 = vpop.eup %7458  ;;  %v5800_v42 = vsel %vm5798_vm15, %v5799_v13, %v10811_v59  ;;  %v5863_v51 = vshrl.u32 %v11237_v45, %v5860_v21 }
 0x33b   :  { %v5866_v43 = vshrl.u32 %v11238_v7, %v5860_v21  ;;  %v5868_v53 = vshll.u32 %v11238_v7, %v5859_v35  ;;  %v10843_v54 = vpop.eup %7460  ;;  %v5633_v46 = vxor.u32 2147483648, %v10837_v37  ;;  %v5720_v5 = vmul.f32 %v5719_v55, %v5717_v22 }
 0x33c   :  { %v5801_v8 = vadd.s32 %v5800_v42, %v5796_v33  ;;  %v5869_v41 = vshrl.u32 %v11242_v15, %v5860_v21  ;;  %v5630_v6 = vxor.u32 2147483648, %v10843_v54  ;;  %v5861_v29 = vshrl.u32 %v11266_v49, %v5860_v21 }
 0x33d   :  { %v5864_v17 = vor.u32 %v5863_v51, %v5862_v40  ;;  %v5871_v27 = vshll.u32 %v11242_v15, %v5859_v35  ;;  %v5634_v50 = vsel %vm5632_vm2, %v5633_v46, %v10843_v54  ;;  %v5721_v1 = vxor.u32 2147483648, %v5720_v5 }
 0x33e   :  { %v5802_v59 = vadd.s32 536870912, %v5801_v8  ;;  %v5867_v61 = vor.u32 %v5866_v43, %v5865_v11  ;;  %v5631_v3 = vsel %vm5629_vm1, %v10837_v37, %v5630_v6  ;;  %v5872_v19 = vshrl.u32 %v7510_v62, %v5860_v21 }
 0x33f   :  { %v5874_v28 = vshll.u32 %v7510_v62, %v5859_v35  ;;  %v5875_v55 = vshrl.u32 %v11292_v20, %v5860_v21  ;;  %v5635_v33 = vsel %vm5628_vm11, %v5631_v3, %v5634_v50  ;;  %v5722_v13 = vsel %vm5639_vm7, %v5721_v1, %v5720_v5 }
 0x340   :  { %v5803_v40 = vshrl.u32 %v5802_v59, 30  ;;  %v5870_v22 = vor.u32 %v5869_v41, %v5868_v53  ;;  %v5636_v11 = vsel %vm5625_vm14, nan, %v5635_v33  ;;  %v5725_v42 = vsel %vm10749_vm12, %v10466_v32, %v5722_v13 }
 0x341   :  { %v5873_v51 = vor.u32 %v5872_v19, %v5871_v27  ;;  %v5876_v43 = vor.u32 %v5875_v55, %v5874_v28  ;;  %7167 = vst [vmem:[%s11174_s1 + $0x78] sm:$0x3] %v5636_v11  ;;  %7462 = vcosq.f32 %v5725_v42  ;;  %v5881_v35 = vsel %vm5877_vm9, %v5861_v29, %v5864_v17 }
 0x342   :  { %v5804_v60 = vshll.u32 %v5803_v40, 30  ;;  %v5882_v21 = vsel %vm5880_vm4, %v5870_v22, 2102212464  ;;  %7464 = vsinq.f32 %v5725_v42  ;;  %v5885_v23 = vsel %vm5877_vm9, %v5864_v17, %v5867_v61 }
 0x343   :  { %v5883_v53 = vsel %vm5879_vm6, %v5867_v61, %v5882_v21  ;;  %v5886_v5 = vsel %vm5880_vm4, %v5873_v51, 920167782  ;;  %v5827_v27 = vsub.s32 4, %v5803_v40  ;;  %vm5743_vm7 = vcmp.lt.s32.totalorder %v10649_v52, 0 }
 0x344   :  { %v10885_v41 = vsub.s32 %v5801_v8, %v5804_v60  ;;  %v5887_v50 = vsel %vm5879_vm6, %v5870_v22, %v5886_v5  ;;  %v5889_v1 = vsel %vm5877_vm9, %v5867_v61, %v5870_v22  ;;  %v5890_v17 = vsel %vm5880_vm4, %v5876_v43, 1326507024 }
 0x345   :  { %v5888_v29 = vsel %vm5878_vm10, %v5885_v23, %v5887_v50  ;;  %v5731_v59 = vand.u32 3, %v10823_v14  ;;  %v5884_v3 = vsel %vm5878_vm10, %v5881_v35, %v5883_v53  ;;  %v5891_v19 = vsel %vm5879_vm6, %v5873_v51, %v5890_v17 }
 0x346   :  { %v5807_v8 = vsub.s32 0, %v10885_v41  ;;  %v5892_v28 = vsel %vm5878_vm10, %v5889_v1, %v5891_v19  ;;  %v10905_v55 = vmul.u32.u64.low %v10825_v34, %v5888_v29  ;;  %v10906_v33 = vmul.u32.u64.high %v10825_v34, %v5888_v29, %v10905_v55 }
 0x347   :  { %v10910_v61 = vmul.f32 %v10493_v25, %v11309_v36  ;;  %v5828_v13 = vsel %vm5743_vm7, %v5827_v27, %v5803_v40  ;;  %v10916_v22 = vmul.u32.u64.low %v10825_v34, %v5892_v28  ;;  %v10917_v11 = vmul.u32.u64.high %v10825_v34, %v5892_v28, %v10916_v22 }
 0x348   :  { %v7153_v14 = vmin.u32 %v5807_v8, %v10885_v41  ;;  %vm5729_vm12 = vweird.f32 %v10466_v32  ;;  %vm5732_vm3 = vcmp.lt.s32.totalorder %v5731_v59, 2  ;;  %vm10924_vm0 = vcmp.le.f32.partialorder %v5741_v2, 0.7853982 }
 0x349   :  { %v5949_v56 = vand.u32 2147483647, %v10910_v61  ;;  %v5952_v42 = vand.u32 2139095040, %v10910_v61  ;;  %v5900_v40 = vmul.u32 %v10825_v34, %v5884_v3  ;;  %vm5733_vm1 = vcmp.eq.s32.totalorder %v5731_v59, 0 }
 0x34a   :  { %v5809_v25 = vclz %v7153_v14  ;;  %v10931_v51 = vsel %vm10924_vm0, 0, %v5828_v13  ;;  %v5903_v43 = vadd.s32 1, %v10906_v33  ;;  %vm5736_vm11 = vcmp.eq.s32.totalorder %v5731_v59, 2 }
 0x34b   :  { %v5953_v60 = vshrl.u32 %v5952_v42, 23  ;;  %v10934_v35 = vpop.eup %7462  ;;  %v5797_v2 = vadd.s32 %v10810_v0, %v10819_v18  ;;  %vm5902_vm2 = vc.u32 %v10917_v11, %v10905_v55  ;;  %v5956_v27 = vand.u32 8388607, %v5949_v56 }
 0x34c   :  { %v7154_v21 = vadd.s32 4294967294, %v5809_v25  ;;  %v10939_v53 = vpop.eup %7464  ;;  %v5737_v34 = vxor.u32 2147483648, %v10934_v35  ;;  %v5904_v23 = vsel %vm5902_vm2, %v5903_v43, %v10906_v33  ;;  %v5834_v29 = vadd.s32 3, %v10931_v51 }
 0x34d   :  { %v7160_v5 = vadd.s32 4294967169, %v5953_v60  ;;  %v5734_v50 = vxor.u32 2147483648, %v10939_v53  ;;  %v5905_v1 = vadd.s32 %v5904_v23, %v5900_v40  ;;  %v10951_v8 = vand.u32 3, %v10420_v47 }
 0x34e   :  { %vm7155_vm9 = vcmp.lt.s32.totalorder %v7154_v21, 0  ;;  %v5738_v0 = vsel %vm5736_vm11, %v5737_v34, %v10939_v53  ;;  %v5957_v22 = vor.u32 8388608, %v5956_v27  ;;  %v10967_v59 = vand.u32 3, %v5834_v29 }
 0x34f   :  { %v5812_v18 = vsel %vm7155_vm9, 0, %v7154_v21  ;;  %v5959_v17 = vadd.s32 1, %v7160_v5  ;;  %v5735_v3 = vsel %vm5733_vm1, %v10934_v35, %v5734_v50  ;;  %v5906_v13 = vadd.s32 536870912, %v5905_v1 }
 0x350   :  { %v5813_v19 = vsub.s32 32, %v5812_v18  ;;  %v5814_v28 = vshll.u32 %v10885_v41, %v5812_v18  ;;  %v5817_v33 = vsub.s32 4294967266, %v5812_v18  ;;  %v5739_v14 = vsel %vm5732_vm3, %v5735_v3, %v5738_v0 }
 0x351   :  { %vm5960_vm6 = vcmp.gt.s32.totalorder %v5959_v17, 0  ;;  %v5740_v42 = vsel %vm5729_vm12, nan, %v5739_v14  ;;  %v10964_v43 = vshrl.u32 %v5906_v13, 30  ;;  %vm6157_vm15 = vcmp.eq.s32.totalorder %v10951_v8, 0 }
 0x352   :  { %v5815_v25 = vshrl.u32 %v5797_v2, %v5813_v19  ;;  %v5818_v47 = vadd.s32 127, %v5817_v33  ;;  %v5961_v40 = vsel %vm5960_vm6, %v5959_v17, 0  ;;  %7168 = vst [vmem:[%s11174_s1 + $0x160] sm:$0xff] %v5740_v42  ;;  %v10971_v0 = vadd.s32 %v10905_v55, %v10917_v11 }
 0x353   :  { %v5963_v60 = vand.u32 31, %v5961_v40  ;;  %v5908_v23 = vshll.u32 %v10964_v43, 30  ;;  %v10973_v18 = vshll.u32 %v5957_v22, 8  ;;  %v5962_v3 = vshrl.u32 %v5961_v40, 5 }
 0x354   :  { %v5816_v41 = vor.u32 %v5815_v25, %v5814_v28  ;;  %v5819_v21 = vshll.u32 %v5818_v47, 23  ;;  %v10981_v29 = vsel %vm6157_vm15, %v10502_v31, %v5318_v30  ;;  %v5931_v25 = vsub.s32 4, %v10964_v43 }
 0x355   :  { %v5964_v5 = vsub.s32 32, %v5963_v60  ;;  %v10975_v17 = vsub.s32 %v5905_v1, %v5908_v23  ;;  %v5966_v19 = vshll.u32 %v11266_v49, %v5963_v60  ;;  %v5969_v14 = vshll.u32 %v11237_v45, %v5963_v60 }
 0x356   :  { %v5820_v27 = vor.u32 4788187, %v5819_v21  ;;  %v5823_v2 = vcvt.s32.f32 %v5816_v41  ;;  %v5972_v1 = vshll.u32 %v11238_v7, %v5963_v60  ;;  %v5975_v22 = vshll.u32 %v11242_v15, %v5963_v60 }
 0x357   :  { %v5967_v33 = vshrl.u32 %v11237_v45, %v5964_v5  ;;  %v5970_v55 = vshrl.u32 %v11238_v7, %v5964_v5  ;;  %v5911_v11 = vsub.s32 0, %v10975_v17  ;;  %v5973_v13 = vshrl.u32 %v11242_v15, %v5964_v5 }
 0x358   :  { %v5821_v28 = vand.u32 2147483647, %v5820_v27  ;;  %v5976_v30 = vshrl.u32 %v7510_v62, %v5964_v5  ;;  %v10993_v47 = vand.u32 3, %v10482_v63  ;;  %v5965_v40 = vshrl.u32 %v11266_v49, %v5964_v5 }
 0x359   :  { %v7157_v45 = vmin.u32 %v5911_v11, %v10975_v17  ;;  %v5978_v41 = vshll.u32 %v7510_v62, %v5963_v60  ;;  %v5979_v7 = vshrl.u32 %v11292_v20, %v5964_v5  ;;  %vm6160_vm10 = vcmp.eq.s32.totalorder %v10951_v8, 2 }
 0x35a   :  { %v5824_v42 = vmul.f32 %v5823_v2, %v5821_v28  ;;  %v5968_v15 = vor.u32 %v5967_v33, %v5966_v19  ;;  %v5971_v23 = vor.u32 %v5970_v55, %v5969_v14  ;;  %v5977_v27 = vor.u32 %v5976_v30, %v5975_v22 }
 0x35b   :  { %vm6156_vm4 = vcmp.lt.s32.totalorder %v10951_v8, 2  ;;  %v5913_v2 = vclz %v7157_v45  ;;  %v5974_v28 = vor.u32 %v5973_v13, %v5972_v1  ;;  %vm5981_vm3 = vcmp.lt.s32.totalorder %v5962_v3, 1 }
 0x35c   :  { %v5825_v21 = vxor.u32 2147483648, %v5824_v42  ;;  %vm5982_vm1 = vcmp.lt.s32.totalorder %v5962_v3, 2  ;;  %v5980_v49 = vor.u32 %v5979_v7, %v5978_v41  ;;  %vm5983_vm11 = vcmp.lt.s32.totalorder %v5962_v3, 3 }
 0x35d   :  { %vm5984_vm2 = vcmp.lt.s32.totalorder %v5962_v3, 4  ;;  %v7158_v20 = vadd.s32 4294967294, %v5913_v2  ;;  %v5985_v60 = vsel %vm5981_vm3, %v5965_v40, %v5968_v15  ;;  %vm5847_vm9 = vcmp.lt.s32.totalorder %v10675_v38, 0 }
 0x35e   :  { %v5826_v63 = vsel %vm5743_vm7, %v5825_v21, %v5824_v42  ;;  %v5986_v5 = vsel %vm5984_vm2, %v5974_v28, 2102212464  ;;  %v5989_v33 = vsel %vm5981_vm3, %v5968_v15, %v5971_v23  ;;  %v5990_v14 = vsel %vm5984_vm2, %v5977_v27, 920167782 }
 0x35f   :  { %v5829_v62 = vsel %vm10924_vm0, %v10649_v52, %v5826_v63  ;;  %v5987_v19 = vsel %vm5983_vm11, %v5971_v23, %v5986_v5  ;;  %vm7159_vm7 = vcmp.lt.s32.totalorder %v7158_v20, 0  ;;  %v5991_v36 = vsel %vm5983_vm11, %v5974_v28, %v5990_v14 }
 0x360   :  { %7466 = vcosq.f32 %v5829_v62  ;;  %v5988_v55 = vsel %vm5982_vm1, %v5985_v60, %v5987_v19  ;;  %vm5840_vm0 = vcmp.eq.s32.totalorder %v10967_v59, 2  ;;  %v5916_v11 = vsel %vm7159_vm7, 0, %v7158_v20 }
 0x361   :  { %7468 = vsinq.f32 %v5829_v62  ;;  %v5992_v1 = vsel %vm5982_vm1, %v5989_v33, %v5991_v36  ;;  %v5993_v13 = vsel %vm5981_vm3, %v5971_v23, %v5974_v28  ;;  %v5994_v22 = vsel %vm5984_vm2, %v5980_v49, 1326507024 }
 0x362   :  { %vm5837_vm6 = vcmp.eq.s32.totalorder %v10967_v59, 0  ;;  %v5917_v42 = vsub.s32 32, %v5916_v11  ;;  %v5918_v30 = vshll.u32 %v10975_v17, %v5916_v11  ;;  %v5921_v45 = vsub.s32 4294967266, %v5916_v11 }
 0x363   :  { %v5995_v40 = vsel %vm5983_vm11, %v5977_v27, %v5994_v22  ;;  %vm5836_vm15 = vcmp.lt.s32.totalorder %v10967_v59, 2  ;;  %v11024_v7 = vmul.u32.u64.low %v10973_v18, %v5992_v1  ;;  %v11025_v21 = vmul.u32.u64.high %v10973_v18, %v5992_v1, %v11024_v7 }
 0x364   :  { %v5996_v41 = vsel %vm5982_vm1, %v5993_v13, %v5995_v40  ;;  %v6004_v15 = vmul.u32 %v10973_v18, %v5988_v55  ;;  %vm5833_vm3 = vweird.f32 %v10649_v52  ;;  %v5919_v23 = vshrl.u32 %v10971_v0, %v5917_v42 }
 0x365   :  { %v5922_v2 = vadd.s32 127, %v5921_v45  ;;  %v11032_v17 = vmul.u32.u64.low %v10973_v18, %v5996_v41  ;;  %v11033_v28 = vmul.u32.u64.high %v10973_v18, %v5996_v41, %v11032_v17  ;;  %v11322_v3 = vxor.u32 2147483648, %v10502_v31 }
 0x366   :  { %vm6259_vm1 = vcmp.lt.s32.totalorder %v10993_v47, 2  ;;  %vm6260_vm11 = vcmp.eq.s32.totalorder %v10993_v47, 0  ;;  %vm6263_vm2 = vcmp.eq.s32.totalorder %v10993_v47, 2  ;;  %v11323_v63 = vand.u32 2147483647, %v10675_v38 }
 0x367   :  { %v6162_v27 = vsel %vm6160_vm10, %v11322_v3, %v10509_v10  ;;  %v5920_v18 = vor.u32 %v5919_v23, %v5918_v30  ;;  %v5923_v49 = vshll.u32 %v5922_v2, 23  ;;  %v11326_v10 = vxor.u32 2147483648, %v10588_v16 }
 0x368   :  { %vm11045_vm7 = vcmp.le.f32.partialorder %v11323_v63, 0.7853982  ;;  %v6163_v31 = vsel %vm6156_vm4, %v10981_v29, %v6162_v27  ;;  %v6007_v20 = vadd.s32 1, %v11025_v21  ;;  %v11327_v5 = vxor.u32 2147483648, %v10578_v58 }
 0x369   :  { %v6262_v62 = vsel %vm6260_vm11, %v10578_v58, %v11326_v10  ;;  %v6164_v60 = vsel %vm5313_vm8, nan, %v6163_v31  ;;  %v6361_v33 = vand.u32 3, %v10566_v26  ;;  %v5924_v14 = vor.u32 4788187, %v5923_v49 }
 0x36a   :  { %v6265_v19 = vsel %vm6263_vm2, %v11327_v5, %v10588_v16  ;;  %v5927_v55 = vcvt.s32.f32 %v5920_v18  ;;  %v5932_v8 = vsel %vm5847_vm9, %v5931_v25, %v10964_v43  ;;  %vm6006_vm10 = vc.u32 %v11033_v28, %v11024_v7  ;;  %7204 = vst [vmem:[%s11174_s1 + $0xe0] sm:$0xff] %v6164_v60  ;;  %v11072_v24 = vpop.eup %7466 }
 0x36b   :  { %v6008_v58 = vsel %vm6006_vm10, %v6007_v20, %v11025_v21  ;;  %v6266_v26 = vsel %vm6259_vm1, %v6262_v62, %v6265_v19  ;;  %vm6362_vm8 = vcmp.lt.s32.totalorder %v6361_v33, 2  ;;  %vm6363_vm4 = vcmp.eq.s32.totalorder %v6361_v33, 0  ;;  %v7469_v16 = vpop.eup %7468 }
 0x36c   :  { %v5841_v29 = vxor.u32 2147483648, %v11072_v24  ;;  %v5925_v43 = vand.u32 2147483647, %v5924_v14  ;;  %v6009_v25 = vadd.s32 %v6008_v58, %v6004_v15  ;;  %v6267_v36 = vsel %vm5417_vm5, nan, %v6266_v26 }
 0x36d   :  { %v5838_v11 = vxor.u32 2147483648, %v7469_v16  ;;  %7205 = vst [vmem:[%s11174_s1 + $0xe8] sm:$0xff] %v6267_v36  ;;  %v11328_v1 = vxor.u32 2147483648, %v10699_v48  ;;  %vm6366_vm1 = vcmp.eq.s32.totalorder %v6361_v33, 2  ;;  %v6464_v13 = vand.u32 3, %v10704_v4 }
 0x36e   :  { %v5842_v22 = vsel %vm5840_vm0, %v5841_v29, %v7469_v16  ;;  %v5928_v42 = vmul.f32 %v5927_v55, %v5925_v43  ;;  %v6010_v30 = vadd.s32 536870912, %v6009_v25  ;;  %v11329_v57 = vxor.u32 2147483648, %v10695_v39 }
 0x36f   :  { %v6365_v47 = vsel %vm6363_vm4, %v10695_v39, %v11328_v1  ;;  %v5839_v40 = vsel %vm5837_vm6, %v11072_v24, %v5838_v11  ;;  %vm6465_vm5 = vcmp.lt.s32.totalorder %v6464_v13, 2  ;;  %vm6466_vm11 = vcmp.eq.s32.totalorder %v6464_v13, 0 }
 0x370   :  { %v6368_v45 = vsel %vm6366_vm1, %v11329_v57, %v10699_v48  ;;  %v5843_v4 = vsel %vm5836_vm15, %v5839_v40, %v5842_v22  ;;  %v5929_v21 = vxor.u32 2147483648, %v5928_v42  ;;  %v11098_v15 = vshrl.u32 %v6010_v30, 30 }
 0x371   :  { %v6369_v41 = vsel %vm6362_vm8, %v6365_v47, %v6368_v45  ;;  %v5844_v39 = vsel %vm5833_vm3, nan, %v5843_v4  ;;  %v6468_v48 = vsel %vm6466_vm11, %v10837_v37, %v5630_v6  ;;  %vm6469_vm0 = vcmp.eq.s32.totalorder %v6464_v13, 2 }
 0x372   :  { %v6370_v23 = vsel %vm5521_vm13, nan, %v6369_v41  ;;  %v6567_v59 = vand.u32 3, %v10788_v9  ;;  %7169 = vst [vmem:[%s11174_s1 + $0x168] sm:$0xff] %v5844_v39  ;;  %v5930_v12 = vsel %vm5847_vm9, %v5929_v21, %v5928_v42  ;;  %v5934_v2 = vsel %vm11045_vm7, 0, %v5932_v8 }
 0x373   :  { %7206 = vst [vmem:[%s11174_s1 + $0xf0] sm:$0x3] %v6370_v23  ;;  %v6012_v17 = vshll.u32 %v11098_v15, 30  ;;  %v6471_v3 = vsel %vm6469_vm0, %v5633_v46, %v10843_v54  ;;  %v5933_v9 = vsel %vm11045_vm7, %v10675_v38, %v5930_v12  ;;  %v5938_v18 = vadd.s32 3, %v5934_v2 }
 0x374   :  { %v6472_v6 = vsel %vm6465_vm5, %v6468_v48, %v6471_v3  ;;  %vm6569_vm13 = vcmp.eq.s32.totalorder %v6567_v59, 0  ;;  %7470 = vcosq.f32 %v5933_v9  ;;  %vm6568_vm9 = vcmp.lt.s32.totalorder %v6567_v59, 2 }
 0x375   :  { %v6013_v27 = vsub.s32 %v6009_v25, %v6012_v17  ;;  %v6473_v63 = vsel %vm5625_vm14, nan, %v6472_v6  ;;  %7472 = vsinq.f32 %v5933_v9  ;;  %v6571_v37 = vsel %vm6569_vm13, %v10934_v35, %v5734_v50 }
 0x376   :  { %7207 = vst [vmem:[%s11174_s1 + $0xf8] sm:$0x3] %v6473_v63  ;;  %vm6572_vm6 = vcmp.eq.s32.totalorder %v6567_v59, 2  ;;  %v6670_v44 = vand.u32 3, %v10931_v51  ;;  %v5939_v10 = vand.u32 3, %v5938_v18  ;;  %v6773_v62 = vand.u32 3, %v5934_v2 }
 0x377   :  { %v6015_v54 = vsub.s32 0, %v6013_v27  ;;  %v6574_v46 = vsel %vm6572_vm6, %v5737_v34, %v10939_v53  ;;  %v6005_v60 = vadd.s32 %v11024_v7, %v11033_v28  ;;  %v6035_v22 = vsub.s32 4, %v11098_v15 }
 0x378   :  { %v6575_v0 = vsel %vm6568_vm9, %v6571_v37, %v6574_v46  ;;  %vm6671_vm14 = vcmp.lt.s32.totalorder %v6670_v44, 2  ;;  %vm6672_vm15 = vcmp.eq.s32.totalorder %v6670_v44, 0  ;;  %vm6675_vm2 = vcmp.eq.s32.totalorder %v6670_v44, 2 }
 0x379   :  { %v7161_v49 = vmin.u32 %v6015_v54, %v6013_v27  ;;  %v6576_v31 = vsel %vm5729_vm12, nan, %v6575_v0  ;;  %v6674_v35 = vsel %vm6672_vm15, %v11072_v24, %v5838_v11  ;;  %v6677_v53 = vsel %vm6675_vm2, %v5841_v29, %v7469_v16 }
 0x37a   :  { %7208 = vst [vmem:[%s11174_s1 + $0x1e0] sm:$0xff] %v6576_v31  ;;  %v6678_v51 = vsel %vm6671_vm14, %v6674_v35, %v6677_v53  ;;  %vm5940_vm7 = vcmp.lt.s32.totalorder %v5939_v10, 2  ;;  %vm5941_vm10 = vcmp.eq.s32.totalorder %v5939_v10, 0  ;;  %vm5944_vm12 = vcmp.eq.s32.totalorder %v5939_v10, 2 }
 0x37b   :  { %v6017_v50 = vclz %v7161_v49  ;;  %v6679_v32 = vsel %vm5833_vm3, nan, %v6678_v51  ;;  %vm6778_vm4 = vcmp.eq.s32.totalorder %v6773_v62, 2  ;;  %vm6774_vm1 = vcmp.lt.s32.totalorder %v6773_v62, 2 }
 0x37c   :  { %7209 = vst [vmem:[%s11174_s1 + $0x1e8] sm:$0xff] %v6679_v32  ;;  %vm6775_vm5 = vcmp.eq.s32.totalorder %v6773_v62, 0  ;;  %vm5937_vm3 = vweird.f32 %v10675_v38  ;;  %vm5951_vm11 = vcmp.lt.s32.totalorder %v10910_v61, 0  ;;  %vm5950_vm0 = vcmp.le.f32.partialorder %v5949_v56, 0.7853982 }
 0x37d   :  { %v7162_v34 = vadd.s32 4294967294, %v6017_v50  ;;  %v6036_v57 = vsel %vm5951_vm11, %v6035_v22, %v11098_v15 }
 0x37e   :  { %v7471_v20 = vpop.eup %7470  ;;  %v6038_v41 = vsel %vm5950_vm0, 0, %v6036_v57 }
 0x37f   :  { %vm7163_vm8 = vcmp.lt.s32.totalorder %v7162_v34, 0  ;;  %v7473_v5 = vpop.eup %7472  ;;  %v5945_v19 = vxor.u32 2147483648, %v7471_v20  ;;  %v6042_v4 = vadd.s32 3, %v6038_v41  ;;  %v6876_v23 = vand.u32 3, %v6038_v41 }
 0x380   :  { %v6020_v33 = vsel %vm7163_vm8, 0, %v7162_v34  ;;  %v5942_v14 = vxor.u32 2147483648, %v7473_v5 }
 0x381   :  { %v6021_v55 = vsub.s32 32, %v6020_v33  ;;  %v6022_v52 = vshll.u32 %v6013_v27, %v6020_v33  ;;  %v6025_v8 = vsub.s32 4294967266, %v6020_v33  ;;  %v5946_v24 = vsel %vm5944_vm12, %v5945_v19, %v7473_v5 }
 0x382   :  { %v6780_v58 = vsel %vm6778_vm4, %v5945_v19, %v7473_v5  ;;  %v5943_v7 = vsel %vm5941_vm10, %v7471_v20, %v5942_v14  ;;  %v6777_v16 = vsel %vm6775_vm5, %v7471_v20, %v5942_v14  ;;  %v6043_v21 = vand.u32 3, %v6042_v4 }
 0x383   :  { %v6023_v28 = vshrl.u32 %v6005_v60, %v6021_v55  ;;  %v6026_v26 = vadd.s32 127, %v6025_v8  ;;  %v5947_v29 = vsel %vm5940_vm7, %v5943_v7, %v5946_v24  ;;  %v6781_v43 = vsel %vm6774_vm1, %v6777_v16, %v6780_v58 }
 0x384   :  { %v5948_v25 = vsel %vm5937_vm3, nan, %v5947_v29  ;;  %v6782_v1 = vsel %vm5937_vm3, nan, %v6781_v43  ;;  %vm6048_vm13 = vcmp.eq.s32.totalorder %v6043_v21, 2  ;;  %vm6881_vm9 = vcmp.eq.s32.totalorder %v6876_v23, 2 }
 0x385   :  { %v6024_v36 = vor.u32 %v6023_v28, %v6022_v52  ;;  %v6027_v11 = vshll.u32 %v6026_v26, 23  ;;  %7170 = vst [vmem:[%s11174_s1 + $0x170] sm:$0x3] %v5948_v25  ;;  %7210 = vst [vmem:[%s11174_s1 + $0x1f0] sm:$0x3] %v6782_v1  ;;  %vm6045_vm6 = vcmp.eq.s32.totalorder %v6043_v21, 0  ;;  %vm6041_vm7 = vweird.f32 %v10910_v61 }
 0x386   :  { %vm6878_vm14 = vcmp.eq.s32.totalorder %v6876_v23, 0  ;;  %vm6044_vm15 = vcmp.lt.s32.totalorder %v6043_v21, 2  ;;  %vm6877_vm2 = vcmp.lt.s32.totalorder %v6876_v23, 2 }
 0x387   :  { %v6028_v38 = vor.u32 4788187, %v6027_v11  ;;  %v6031_v47 = vcvt.s32.f32 %v6024_v36 }
 0x389   :  { %v6029_v13 = vand.u32 2147483647, %v6028_v38 }
 0x38b   :  { %v6032_v42 = vmul.f32 %v6031_v47, %v6029_v13 }
 0x38d   :  { %v6033_v30 = vxor.u32 2147483648, %v6032_v42 }
 0x38f   :  { %v6034_v45 = vsel %vm5951_vm11, %v6033_v30, %v6032_v42 }
 0x390   :  { %v6037_v40 = vsel %vm5950_vm0, %v10910_v61, %v6034_v45 }
 0x391   :  { %7474 = vcosq.f32 %v6037_v40 }
 0x392   :  { %7476 = vsinq.f32 %v6037_v40 }
 0x39b   :  { %v7475_v39 = vpop.eup %7474 }
 0x39c   :  { %v7477_v48 = vpop.eup %7476  ;;  %v6049_v59 = vxor.u32 2147483648, %v7475_v39 }
 0x39d   :  { %v6046_v56 = vxor.u32 2147483648, %v7477_v48 }
 0x39e   :  { %v6050_v15 = vsel %vm6048_vm13, %v6049_v59, %v7477_v48  ;;  %v6883_v12 = vsel %vm6881_vm9, %v6049_v59, %v7477_v48 }
 0x39f   :  { %v6047_v2 = vsel %vm6045_vm6, %v7475_v39, %v6046_v56  ;;  %v6880_v17 = vsel %vm6878_vm14, %v7475_v39, %v6046_v56 }
 0x3a0   :  { %v6051_v3 = vsel %vm6044_vm15, %v6047_v2, %v6050_v15  ;;  %v6884_v9 = vsel %vm6877_vm2, %v6880_v17, %v6883_v12 }
 0x3a1   :  { %v6052_v6 = vsel %vm6041_vm7, nan, %v6051_v3  ;;  %v6885_v27 = vsel %vm6041_vm7, nan, %v6884_v9 }
 0x3a2   :  { %7171 = vst [vmem:[%s11174_s1 + $0x178] sm:$0x3] %v6052_v6  ;;  %7211 = vst [vmem:[%s11174_s1 + $0x1f8] sm:$0x3] %v6885_v27 }
 0x3a3   :  { %6899 = vsyncpa [#allocation3], 1 }

</bundles_post_ra>
